<compile_context>
chip_gen: v7x
topology: tpu7x:2x2x1
jax: 0.10.0
libtpu: 0.0.40
codegen_flags: <defaults>
</compile_context>

<pallas_src>
import jax
import jax.numpy as jnp
from jax.experimental import pallas as pl
from jax.experimental.pallas import tpu as pltpu

EPS = 1e-5     # nn.BatchNorm2d default eps
LANE = 128     # TPU lane width; channels are zero-padded to this


def _round_up(x, m):
    return (x + m - 1) // m * m


# ----------------------------- Pallas kernel ------------------------------- #

def _make_stage_kernel(*, tm, wp, n_m, m_valid, halo, add_residual):
    """conv3x3(reflect-padded, stride 1) + BatchNorm(batch stats) [+res] + ReLU."""
    # Flat-row offset of tap (di, dj) into the extended padded flattened input.
    offs = [di * wp + dj for di in range(3) for dj in range(3)]

    def kernel(*refs):
        if add_residual:
            (xe_ref, w_ref, g_ref, b_ref, mask_ref, id_ref, o_ref,
             y_sc, s_sc, ss_sc, mean_sc, rstd_sc) = refs
        else:
            (xe_ref, w_ref, g_ref, b_ref, mask_ref, o_ref,
             y_sc, s_sc, ss_sc, mean_sc, rstd_sc) = refs
            id_ref = None

        ph = pl.program_id(0)     # 0: conv + stats accumulation, 1: normalize
        mi = pl.program_id(1)     # M tile index
        m0 = pl.multiple_of(mi * tm, 8)

        @pl.when(ph == 0)
        def _phase0():
            @pl.when(mi == 0)
            def _init():
                s_sc[...] = jnp.zeros_like(s_sc)
                ss_sc[...] = jnp.zeros_like(ss_sc)

            # One aligned halo-window load; the 9 taps are static shifted
            # views feeding 9 accumulated MXU matmuls (no im2col tensor).
            xw = xe_ref[pl.ds(m0, tm + halo), :]
            acc = jnp.dot(xw[offs[0]:offs[0] + tm, :], w_ref[0],
                          preferred_element_type=jnp.float32)
            for t in range(1, 9):
                acc = acc + jnp.dot(xw[offs[t]:offs[t] + tm, :], w_ref[t],
                                    preferred_element_type=jnp.float32)

            y_sc[pl.ds(m0, tm), :] = acc      # raw conv output stays in VMEM
            o_ref[...] = acc                  # keep the output block defined

            mask = mask_ref[...]              # (tm, 1): 1.0 on real pixels
            ym = acc * mask
            s_sc[...] += jnp.sum(ym, axis=0, keepdims=True)
            ss_sc[...] += jnp.sum(ym * acc, axis=0, keepdims=True)

            @pl.when(mi == n_m - 1)
            def _finalize():
                inv_m = 1.0 / float(m_valid)
                mean = s_sc[...] * inv_m
                var = ss_sc[...] * inv_m - mean * mean    # biased variance
                mean_sc[...] = mean
                rstd_sc[...] = jax.lax.rsqrt(var + EPS)

        @pl.when(ph == 1)
        def _phase1():
            y = y_sc[pl.ds(m0, tm), :]
            out = (y - mean_sc[...]) * rstd_sc[...] * g_ref[...] + b_ref[...]
            if add_residual:
                out = out + id_ref[...]
            o_ref[...] = jnp.maximum(out, 0.0)

    return kernel


def _conv_bn_act(xe, w9, g, b, mask, identity, *, tm, wp, n_m, m_valid, halo):
    mp_grid = n_m * tm
    cp = xe.shape[-1]
    add_res = identity is not None

    kernel = _make_stage_kernel(tm=tm, wp=wp, n_m=n_m, m_valid=m_valid,
                                halo=halo, add_residual=add_res)

    def full_spec(shape):
        nd = len(shape)
        return pl.BlockSpec(shape, lambda ph, m, _nd=nd: (0,) * _nd)

    in_arrays = [xe, w9, g, b, mask]
    in_specs = [
        full_spec(xe.shape),        # constant block index -> stays VMEM-resident
        full_spec(w9.shape),
        full_spec(g.shape),
        full_spec(b.shape),
        pl.BlockSpec((tm, 1), lambda ph, m: (m, 0)),
    ]
    if add_res:
        in_arrays.append(identity)
        in_specs.append(pl.BlockSpec((tm, cp), lambda ph, m: (m, 0)))

    return pl.pallas_call(
        kernel,
        out_shape=jax.ShapeDtypeStruct((mp_grid, cp), jnp.float32),
        grid=(2, n_m),                                    # (phase, M tiles)
        in_specs=in_specs,
        out_specs=pl.BlockSpec((tm, cp), lambda ph, m: (m, 0)),
        scratch_shapes=[
            pltpu.VMEM((mp_grid, cp), jnp.float32),       # raw conv, phase 0 -> 1
            pltpu.VMEM((1, cp), jnp.float32),             # per-channel sum
            pltpu.VMEM((1, cp), jnp.float32),             # per-channel sum of squares
            pltpu.VMEM((1, cp), jnp.float32),             # mean
            pltpu.VMEM((1, cp), jnp.float32),             # rsqrt(var + eps)
        ],
        compiler_params=pltpu.CompilerParams(
            # Both axes carry sequential deps (global BN accumulation, phases).
            dimension_semantics=("arbitrary", "arbitrary"),
            vmem_limit_bytes=32 * 1024 * 1024,            # fits v7x (64 MiB) too
        ),
    )(*in_arrays)


# ------------------------------- JAX wrapper -------------------------------- #

def basic_block_forward(x_nchw, params, *, compute_dtype=jnp.float32,
                        tm=128, cp=LANE):
    """Pallas implementation of BasicBlock.forward (stride=1, no downsample)."""
    assert tm % 8 == 0
    x = jnp.transpose(x_nchw, (0, 2, 3, 1)).astype(jnp.float32)    # NCHW -> NHWC
    n, h, w, cin = x.shape
    planes = params["w1"].shape[0]
    hp, wp = h + 2, w + 2
    mp = n * hp * wp                       # number of padded-grid pixels
    m_valid = n * h * w                    # real pixels for the BN statistics
    n_m = -(-mp // tm)
    mp_grid = n_m * tm
    halo = _round_up(2 * wp + 2, 8)        # max shifted-read overhang per tile
    le = mp_grid + halo                    # rows of the extended flat activation

    def pad_flat_ext(a_nhwc):
        """Reflect-pad HxW by 1, zero-pad channels to cp, flatten, and add
        lead/tail zero rows so every 3x3 tap of every tile reads in-bounds."""
        ap = jnp.pad(a_nhwc, ((0, 0), (1, 1), (1, 1), (0, 0)), mode="reflect")
        ap = jnp.pad(ap, ((0, 0), (0, 0), (0, 0), (0, cp - a_nhwc.shape[-1])))
        flat = ap.reshape(mp, cp)
        lead = jnp.zeros((wp + 1, cp), flat.dtype)
        tail = jnp.zeros((le - mp - (wp + 1), cp), flat.dtype)
        return jnp.concatenate([lead, flat, tail], axis=0).astype(compute_dtype)

    def weight_mat(w_oihw):
        """(Cout, Cin, 3, 3) torch weight -> (9, cp, cp) per-tap matmul weights."""
        cout, ci = w_oihw.shape[0], w_oihw.shape[1]
        wm = jnp.transpose(w_oihw, (2, 3, 1, 0)).reshape(9, ci, cout)
        wm = jnp.pad(wm, ((0, 0), (0, cp - ci), (0, cp - cout)))
        return wm.astype(compute_dtype)

    def vec(v, fill):
        return jnp.pad(v.astype(jnp.float32), (0, cp - v.shape[0]),
                       constant_values=fill).reshape(1, cp)

    # 1.0 exactly on rows that correspond to real (interior) output pixels.
    p = jnp.arange(mp_grid)
    col = p % wp
    row = (p // wp) % hp
    mask = ((p < mp) & (col >= 1) & (col <= w) & (row >= 1) & (row <= h))
    mask = mask.astype(jnp.float32).reshape(mp_grid, 1)

    def interior(flat_out, channels):
        a = flat_out[:mp, :channels].reshape(n, hp, wp, channels)
        return a[:, 1:-1, 1:-1, :]

    common = dict(tm=tm, wp=wp, n_m=n_m, m_valid=m_valid, halo=halo)

    # --- stage 1: conv1 + bn1 + relu ---------------------------------------
    xe1 = pad_flat_ext(x)
    y1 = _conv_bn_act(xe1, weight_mat(params["w1"]),
                      vec(params["g1"], 1.0), vec(params["b1"], 0.0),
                      mask, None, **common)

    # Identity (= x) laid out on the same padded-grid flat rows, kept in f32.
    idf = jnp.pad(
        jnp.pad(x, ((0, 0), (1, 1), (1, 1), (0, 0)), mode="reflect"),
        ((0, 0), (0, 0), (0, 0), (0, cp - cin))).reshape(mp, cp)
    idf = jnp.pad(idf, ((0, mp_grid - mp), (0, 0)))

    # --- stage 2: conv2 + bn2 + residual add + relu -------------------------
    # (intermediate stays lane-dense; only a cheap border re-reflect in XLA.)
    out1 = interior(y1, cp)
    xe2 = pad_flat_ext(out1)
    y2 = _conv_bn_act(xe2, weight_mat(params["w2"]),
                      vec(params["g2"], 1.0), vec(params["b2"], 0.0),
                      mask, idf, **common)

    out = interior(y2, planes)
    return jnp.transpose(out, (0, 3, 1, 2))               # NHWC -> NCHW


# --------------------------- pure-JAX reference ----------------------------- #

def _ref_forward(x, params):
    def conv(z, wgt):
        zp = jnp.pad(z, ((0, 0), (0, 0), (1, 1), (1, 1)), mode="reflect")
        return jax.lax.conv_general_dilated(
            zp, wgt, window_strides=(1, 1), padding="VALID",
            dimension_numbers=("NCHW", "OIHW", "NCHW"))

    def bn(y, g, b):
        mean = jnp.mean(y, axis=(0, 2, 3), keepdims=True)
        var = jnp.mean(jnp.square(y - mean), axis=(0, 2, 3), keepdims=True)
        yhat = (y - mean) * jax.lax.rsqrt(var + EPS)
        return yhat * g.reshape(1, -1, 1, 1) + b.reshape(1, -1, 1, 1)

    out = jax.nn.relu(bn(conv(x, params["w1"]), params["g1"], params["b1"]))
    out = bn(conv(out, params["w2"]), params["g2"], params["b2"])
    return jax.nn.relu(out + x)


# ----------------------------------- main ----------------------------------- #

if __name__ == "__main__":
    key = jax.random.PRNGKey(0)
    k_x, k_w1, k_w2, k_g1, k_b1, k_g2, k_b2 = jax.random.split(key, 7)

    N, C, H, W = 2, 4, 16, 16          # inplanes = planes = 4, stride = 1
    planes = C

    x = jax.random.normal(k_x, (N, C, H, W), dtype=jnp.float32)

    params = {
        "w1": 0.1 * jax.random.normal(k_w1, (planes, C, 3, 3), jnp.float32),
        "w2": 0.1 * jax.random.normal(k_w2, (planes, planes, 3, 3), jnp.float32),
        "g1": 1.0 + 0.05 * jax.random.normal(k_g1, (planes,), jnp.float32),
        "b1": 0.05 * jax.random.normal(k_b1, (planes,), jnp.float32),
        "g2": 1.0 + 0.05 * jax.random.normal(k_g2, (planes,), jnp.float32),
        "b2": 0.05 * jax.random.normal(k_b2, (planes,), jnp.float32),
    }

    fwd = jax.jit(basic_block_forward)
    out = jax.block_until_ready(fwd(x, params))
    ref = jax.block_until_ready(_ref_forward(x, params))

    assert out.shape == (N, planes, H, W), out.shape
    assert jnp.allclose(out, ref, atol=1e-4, rtol=1e-4), (
        float(jnp.max(jnp.abs(out - ref))))

    print("KERNEL_OK")
</pallas_src>

<mosaic_0001>
module attributes {stable_mosaic.version = 11 : i64} {
  func.func @kernel(%arg0: i32, %arg1: i32, %arg2: memref<808x128xf32, #tpu.memory_space<vmem>>, %arg3: memref<9x128x128xf32, #tpu.memory_space<vmem>>, %arg4: memref<1x128xf32, #tpu.memory_space<vmem>>, %arg5: memref<1x128xf32, #tpu.memory_space<vmem>>, %arg6: memref<128x1xf32, #tpu.memory_space<vmem>>, %arg7: memref<128x128xf32, #tpu.memory_space<vmem>>, %arg8: memref<768x128xf32, #tpu.memory_space<vmem>>, %arg9: memref<1x128xf32, #tpu.memory_space<vmem>>, %arg10: memref<1x128xf32, #tpu.memory_space<vmem>>, %arg11: memref<1x128xf32, #tpu.memory_space<vmem>>, %arg12: memref<1x128xf32, #tpu.memory_space<vmem>>) attributes {dimension_semantics = [#tpu.dimension_semantics<arbitrary>, #tpu.dimension_semantics<arbitrary>], iteration_bounds = array<i64: 2, 6>, scalar_prefetch = 0 : i64, scratch_operands = 5 : i64, tpu.core_type = #tpu.core_type<tc>, window_params = [{pipeline_mode = #tpu.pipeline_mode<synchronous>, transform_indices = @transform_0, window_bounds = array<i64: 808, 128>}, {pipeline_mode = #tpu.pipeline_mode<synchronous>, transform_indices = @transform_1, window_bounds = array<i64: 9, 128, 128>}, {pipeline_mode = #tpu.pipeline_mode<synchronous>, transform_indices = @transform_2, window_bounds = array<i64: 1, 128>}, {pipeline_mode = #tpu.pipeline_mode<synchronous>, transform_indices = @transform_3, window_bounds = array<i64: 1, 128>}, {transform_indices = @transform_4, window_bounds = array<i64: 128, 1>}, {transform_indices = @transform_5, window_bounds = array<i64: 128, 128>}]} {
    %c128_i32 = arith.constant 128 : i32
    %0 = arith.muli %arg1, %c128_i32 : i32
    %1 = tpu.assume_multiple %0, 8 : i32
    %c0_i32 = arith.constant 0 : i32
    %2 = arith.cmpi eq, %arg0, %c0_i32 : i32
    %3 = arith.extui %2 : i1 to i32
    %c0_i32_0 = arith.constant 0 : i32
    %4 = arith.cmpi ne, %3, %c0_i32_0 : i32
    scf.if %4 {
      %c0_i32_2 = arith.constant 0 : i32
      %8 = arith.cmpi eq, %arg1, %c0_i32_2 : i32
      %9 = arith.extui %8 : i1 to i32
      %c0_i32_3 = arith.constant 0 : i32
      %10 = arith.cmpi ne, %9, %c0_i32_3 : i32
      scf.if %10 {
        %cst_47 = arith.constant 0.000000e+00 : f32
        %77 = vector.broadcast %cst_47 : f32 to vector<1x128xf32>
        %c0_48 = arith.constant 0 : index
        %c0_49 = arith.constant 0 : index
        %78 = vector.load %arg9[%c0_48, %c0_49] : memref<1x128xf32, #tpu.memory_space<vmem>>, vector<1x128xf32>
        tpu.vector_store %arg9[%c0_48, %c0_49], %77 {strides = array<i32>} : memref<1x128xf32, #tpu.memory_space<vmem>>, vector<1x128xf32>,
        %cst_50 = arith.constant 0.000000e+00 : f32
        %79 = vector.broadcast %cst_50 : f32 to vector<1x128xf32>
        %c0_51 = arith.constant 0 : index
        %c0_52 = arith.constant 0 : index
        %80 = vector.load %arg10[%c0_51, %c0_52] : memref<1x128xf32, #tpu.memory_space<vmem>>, vector<1x128xf32>
        tpu.vector_store %arg10[%c0_51, %c0_52], %79 {strides = array<i32>} : memref<1x128xf32, #tpu.memory_space<vmem>>, vector<1x128xf32>,
      } else {
      }
      %11 = arith.index_cast %1 : i32 to index
      %c0 = arith.constant 0 : index
      %12 = vector.load %arg2[%11, %c0] : memref<808x128xf32, #tpu.memory_space<vmem>>, vector<168x128xf32>
      %13 = vector.extract_strided_slice %12 {offsets = [0, 0], sizes = [128, 128], strides = [1, 1]} : vector<168x128xf32> to vector<128x128xf32>
      %c0_4 = arith.constant 0 : index
      %c0_5 = arith.constant 0 : index
      %c0_6 = arith.constant 0 : index
      %14 = vector.load %arg3[%c0_4, %c0_5, %c0_6] : memref<9x128x128xf32, #tpu.memory_space<vmem>>, vector<1x128x128xf32>
      %15 = vector.shape_cast %14 : vector<1x128x128xf32> to vector<128x128xf32>
      %cst = arith.constant dense<0.000000e+00> : vector<128x128xf32>
      %16 = tpu.matmul %13, %15, %cst {dimension_numbers = #tpu.dot_dimension_numbers<[1], [0], [0], [1], [0, 0, 1, 1], [], []>} : vector<128x128xf32>, vector<128x128xf32>, vector<128x128xf32> -> vector<128x128xf32>
      %17 = vector.extract_strided_slice %12 {offsets = [1, 0], sizes = [128, 128], strides = [1, 1]} : vector<168x128xf32> to vector<128x128xf32>
      %c1 = arith.constant 1 : index
      %c0_7 = arith.constant 0 : index
      %c0_8 = arith.constant 0 : index
      %18 = vector.load %arg3[%c1, %c0_7, %c0_8] : memref<9x128x128xf32, #tpu.memory_space<vmem>>, vector<1x128x128xf32>
      %19 = vector.shape_cast %18 : vector<1x128x128xf32> to vector<128x128xf32>
      %cst_9 = arith.constant dense<0.000000e+00> : vector<128x128xf32>
      %20 = tpu.matmul %17, %19, %cst_9 {dimension_numbers = #tpu.dot_dimension_numbers<[1], [0], [0], [1], [0, 0, 1, 1], [], []>} : vector<128x128xf32>, vector<128x128xf32>, vector<128x128xf32> -> vector<128x128xf32>
      %21 = arith.addf %16, %20 : vector<128x128xf32>
      %22 = vector.extract_strided_slice %12 {offsets = [2, 0], sizes = [128, 128], strides = [1, 1]} : vector<168x128xf32> to vector<128x128xf32>
      %c2 = arith.constant 2 : index
      %c0_10 = arith.constant 0 : index
      %c0_11 = arith.constant 0 : index
      %23 = vector.load %arg3[%c2, %c0_10, %c0_11] : memref<9x128x128xf32, #tpu.memory_space<vmem>>, vector<1x128x128xf32>
      %24 = vector.shape_cast %23 : vector<1x128x128xf32> to vector<128x128xf32>
      %cst_12 = arith.constant dense<0.000000e+00> : vector<128x128xf32>
      %25 = tpu.matmul %22, %24, %cst_12 {dimension_numbers = #tpu.dot_dimension_numbers<[1], [0], [0], [1], [0, 0, 1, 1], [], []>} : vector<128x128xf32>, vector<128x128xf32>, vector<128x128xf32> -> vector<128x128xf32>
      %26 = arith.addf %21, %25 : vector<128x128xf32>
      %27 = vector.extract_strided_slice %12 {offsets = [18, 0], sizes = [128, 128], strides = [1, 1]} : vector<168x128xf32> to vector<128x128xf32>
      %c3 = arith.constant 3 : index
      %c0_13 = arith.constant 0 : index
      %c0_14 = arith.constant 0 : index
      %28 = vector.load %arg3[%c3, %c0_13, %c0_14] : memref<9x128x128xf32, #tpu.memory_space<vmem>>, vector<1x128x128xf32>
      %29 = vector.shape_cast %28 : vector<1x128x128xf32> to vector<128x128xf32>
      %cst_15 = arith.constant dense<0.000000e+00> : vector<128x128xf32>
      %30 = tpu.matmul %27, %29, %cst_15 {dimension_numbers = #tpu.dot_dimension_numbers<[1], [0], [0], [1], [0, 0, 1, 1], [], []>} : vector<128x128xf32>, vector<128x128xf32>, vector<128x128xf32> -> vector<128x128xf32>
      %31 = arith.addf %26, %30 : vector<128x128xf32>
      %32 = vector.extract_strided_slice %12 {offsets = [19, 0], sizes = [128, 128], strides = [1, 1]} : vector<168x128xf32> to vector<128x128xf32>
      %c4 = arith.constant 4 : index
      %c0_16 = arith.constant 0 : index
      %c0_17 = arith.constant 0 : index
      %33 = vector.load %arg3[%c4, %c0_16, %c0_17] : memref<9x128x128xf32, #tpu.memory_space<vmem>>, vector<1x128x128xf32>
      %34 = vector.shape_cast %33 : vector<1x128x128xf32> to vector<128x128xf32>
      %cst_18 = arith.constant dense<0.000000e+00> : vector<128x128xf32>
      %35 = tpu.matmul %32, %34, %cst_18 {dimension_numbers = #tpu.dot_dimension_numbers<[1], [0], [0], [1], [0, 0, 1, 1], [], []>} : vector<128x128xf32>, vector<128x128xf32>, vector<128x128xf32> -> vector<128x128xf32>
      %36 = arith.addf %31, %35 : vector<128x128xf32>
      %37 = vector.extract_strided_slice %12 {offsets = [20, 0], sizes = [128, 128], strides = [1, 1]} : vector<168x128xf32> to vector<128x128xf32>
      %c5 = arith.constant 5 : index
      %c0_19 = arith.constant 0 : index
      %c0_20 = arith.constant 0 : index
      %38 = vector.load %arg3[%c5, %c0_19, %c0_20] : memref<9x128x128xf32, #tpu.memory_space<vmem>>, vector<1x128x128xf32>
      %39 = vector.shape_cast %38 : vector<1x128x128xf32> to vector<128x128xf32>
      %cst_21 = arith.constant dense<0.000000e+00> : vector<128x128xf32>
      %40 = tpu.matmul %37, %39, %cst_21 {dimension_numbers = #tpu.dot_dimension_numbers<[1], [0], [0], [1], [0, 0, 1, 1], [], []>} : vector<128x128xf32>, vector<128x128xf32>, vector<128x128xf32> -> vector<128x128xf32>
      %41 = arith.addf %36, %40 : vector<128x128xf32>
      %42 = vector.extract_strided_slice %12 {offsets = [36, 0], sizes = [128, 128], strides = [1, 1]} : vector<168x128xf32> to vector<128x128xf32>
      %c6 = arith.constant 6 : index
      %c0_22 = arith.constant 0 : index
      %c0_23 = arith.constant 0 : index
      %43 = vector.load %arg3[%c6, %c0_22, %c0_23] : memref<9x128x128xf32, #tpu.memory_space<vmem>>, vector<1x128x128xf32>
      %44 = vector.shape_cast %43 : vector<1x128x128xf32> to vector<128x128xf32>
      %cst_24 = arith.constant dense<0.000000e+00> : vector<128x128xf32>
      %45 = tpu.matmul %42, %44, %cst_24 {dimension_numbers = #tpu.dot_dimension_numbers<[1], [0], [0], [1], [0, 0, 1, 1], [], []>} : vector<128x128xf32>, vector<128x128xf32>, vector<128x128xf32> -> vector<128x128xf32>
      %46 = arith.addf %41, %45 : vector<128x128xf32>
      %47 = vector.extract_strided_slice %12 {offsets = [37, 0], sizes = [128, 128], strides = [1, 1]} : vector<168x128xf32> to vector<128x128xf32>
      %c7 = arith.constant 7 : index
      %c0_25 = arith.constant 0 : index
      %c0_26 = arith.constant 0 : index
      %48 = vector.load %arg3[%c7, %c0_25, %c0_26] : memref<9x128x128xf32, #tpu.memory_space<vmem>>, vector<1x128x128xf32>
      %49 = vector.shape_cast %48 : vector<1x128x128xf32> to vector<128x128xf32>
      %cst_27 = arith.constant dense<0.000000e+00> : vector<128x128xf32>
      %50 = tpu.matmul %47, %49, %cst_27 {dimension_numbers = #tpu.dot_dimension_numbers<[1], [0], [0], [1], [0, 0, 1, 1], [], []>} : vector<128x128xf32>, vector<128x128xf32>, vector<128x128xf32> -> vector<128x128xf32>
      %51 = arith.addf %46, %50 : vector<128x128xf32>
      %52 = vector.extract_strided_slice %12 {offsets = [38, 0], sizes = [128, 128], strides = [1, 1]} : vector<168x128xf32> to vector<128x128xf32>
      %c8 = arith.constant 8 : index
      %c0_28 = arith.constant 0 : index
      %c0_29 = arith.constant 0 : index
      %53 = vector.load %arg3[%c8, %c0_28, %c0_29] : memref<9x128x128xf32, #tpu.memory_space<vmem>>, vector<1x128x128xf32>
      %54 = vector.shape_cast %53 : vector<1x128x128xf32> to vector<128x128xf32>
      %cst_30 = arith.constant dense<0.000000e+00> : vector<128x128xf32>
      %55 = tpu.matmul %52, %54, %cst_30 {dimension_numbers = #tpu.dot_dimension_numbers<[1], [0], [0], [1], [0, 0, 1, 1], [], []>} : vector<128x128xf32>, vector<128x128xf32>, vector<128x128xf32> -> vector<128x128xf32>
      %56 = arith.addf %51, %55 : vector<128x128xf32>
      %57 = arith.index_cast %1 : i32 to index
      %c0_31 = arith.constant 0 : index
      %58 = vector.load %arg8[%57, %c0_31] : memref<768x128xf32, #tpu.memory_space<vmem>>, vector<128x128xf32>
      tpu.vector_store %arg8[%57, %c0_31], %56 {strides = array<i32>} : memref<768x128xf32, #tpu.memory_space<vmem>>, vector<128x128xf32>,
      %c0_32 = arith.constant 0 : index
      %c0_33 = arith.constant 0 : index
      %59 = vector.load %arg7[%c0_32, %c0_33] : memref<128x128xf32, #tpu.memory_space<vmem>>, vector<128x128xf32>
      tpu.vector_store %arg7[%c0_32, %c0_33], %56 {strides = array<i32>} : memref<128x128xf32, #tpu.memory_space<vmem>>, vector<128x128xf32>,
      %c0_34 = arith.constant 0 : index
      %c0_35 = arith.constant 0 : index
      %60 = vector.load %arg6[%c0_34, %c0_35] : memref<128x1xf32, #tpu.memory_space<vmem>>, vector<128x1xf32>
      %61 = vector.broadcast %60 : vector<128x1xf32> to vector<128x128xf32>
      %62 = arith.mulf %56, %61 : vector<128x128xf32>
      %c0_36 = arith.constant 0 : index
      %c0_37 = arith.constant 0 : index
      %63 = vector.load %arg9[%c0_36, %c0_37] : memref<1x128xf32, #tpu.memory_space<vmem>>, vector<1x128xf32>
      %cst_38 = arith.constant dense<0.000000e+00> : vector<128xf32>
      %64 = vector.multi_reduction <add>, %62, %cst_38 [0] : vector<128x128xf32> to vector<128xf32>
      %65 = vector.shape_cast %64 : vector<128xf32> to vector<1x128xf32>
      %66 = arith.addf %63, %65 : vector<1x128xf32>
      %c0_39 = arith.constant 0 : index
      %c0_40 = arith.constant 0 : index
      %67 = vector.load %arg9[%c0_39, %c0_40] : memref<1x128xf32, #tpu.memory_space<vmem>>, vector<1x128xf32>
      tpu.vector_store %arg9[%c0_39, %c0_40], %66 {strides = array<i32>} : memref<1x128xf32, #tpu.memory_space<vmem>>, vector<1x128xf32>,
      %c0_41 = arith.constant 0 : index
      %c0_42 = arith.constant 0 : index
      %68 = vector.load %arg10[%c0_41, %c0_42] : memref<1x128xf32, #tpu.memory_space<vmem>>, vector<1x128xf32>
      %69 = arith.mulf %62, %56 : vector<128x128xf32>
      %cst_43 = arith.constant dense<0.000000e+00> : vector<128xf32>
      %70 = vector.multi_reduction <add>, %69, %cst_43 [0] : vector<128x128xf32> to vector<128xf32>
      %71 = vector.shape_cast %70 : vector<128xf32> to vector<1x128xf32>
      %72 = arith.addf %68, %71 : vector<1x128xf32>
      %c0_44 = arith.constant 0 : index
      %c0_45 = arith.constant 0 : index
      %73 = vector.load %arg10[%c0_44, %c0_45] : memref<1x128xf32, #tpu.memory_space<vmem>>, vector<1x128xf32>
      tpu.vector_store %arg10[%c0_44, %c0_45], %72 {strides = array<i32>} : memref<1x128xf32, #tpu.memory_space<vmem>>, vector<1x128xf32>,
      %c5_i32 = arith.constant 5 : i32
      %74 = arith.cmpi eq, %arg1, %c5_i32 : i32
      %75 = arith.extui %74 : i1 to i32
      %c0_i32_46 = arith.constant 0 : i32
      %76 = arith.cmpi ne, %75, %c0_i32_46 : i32
      scf.if %76 {
        %c0_47 = arith.constant 0 : index
        %c0_48 = arith.constant 0 : index
        %77 = vector.load %arg9[%c0_47, %c0_48] : memref<1x128xf32, #tpu.memory_space<vmem>>, vector<1x128xf32>
        %cst_49 = arith.constant 0.001953125 : f32
        %78 = vector.broadcast %cst_49 : f32 to vector<1x128xf32>
        %79 = arith.mulf %77, %78 : vector<1x128xf32>
        %c0_50 = arith.constant 0 : index
        %c0_51 = arith.constant 0 : index
        %80 = vector.load %arg10[%c0_50, %c0_51] : memref<1x128xf32, #tpu.memory_space<vmem>>, vector<1x128xf32>
        %cst_52 = arith.constant 0.001953125 : f32
        %81 = vector.broadcast %cst_52 : f32 to vector<1x128xf32>
        %82 = arith.mulf %80, %81 : vector<1x128xf32>
        %83 = arith.mulf %79, %79 : vector<1x128xf32>
        %84 = arith.subf %82, %83 : vector<1x128xf32>
        %c0_53 = arith.constant 0 : index
        %c0_54 = arith.constant 0 : index
        %85 = vector.load %arg11[%c0_53, %c0_54] : memref<1x128xf32, #tpu.memory_space<vmem>>, vector<1x128xf32>
        tpu.vector_store %arg11[%c0_53, %c0_54], %79 {strides = array<i32>} : memref<1x128xf32, #tpu.memory_space<vmem>>, vector<1x128xf32>,
        %cst_55 = arith.constant 9.99999974E-6 : f32
        %86 = vector.broadcast %cst_55 : f32 to vector<1x128xf32>
        %87 = arith.addf %84, %86 : vector<1x128xf32>
        %88 = math.rsqrt %87 : vector<1x128xf32>
        %c0_56 = arith.constant 0 : index
        %c0_57 = arith.constant 0 : index
        %89 = vector.load %arg12[%c0_56, %c0_57] : memref<1x128xf32, #tpu.memory_space<vmem>>, vector<1x128xf32>
        tpu.vector_store %arg12[%c0_56, %c0_57], %88 {strides = array<i32>} : memref<1x128xf32, #tpu.memory_space<vmem>>, vector<1x128xf32>,
      } else {
      }
    } else {
    }
    %c1_i32 = arith.constant 1 : i32
    %5 = arith.cmpi eq, %arg0, %c1_i32 : i32
    %6 = arith.extui %5 : i1 to i32
    %c0_i32_1 = arith.constant 0 : i32
    %7 = arith.cmpi ne, %6, %c0_i32_1 : i32
    scf.if %7 {
      %8 = arith.index_cast %1 : i32 to index
      %c0 = arith.constant 0 : index
      %9 = vector.load %arg8[%8, %c0] : memref<768x128xf32, #tpu.memory_space<vmem>>, vector<128x128xf32>
      %c0_2 = arith.constant 0 : index
      %c0_3 = arith.constant 0 : index
      %10 = vector.load %arg11[%c0_2, %c0_3] : memref<1x128xf32, #tpu.memory_space<vmem>>, vector<1x128xf32>
      %11 = vector.broadcast %10 : vector<1x128xf32> to vector<128x128xf32>
      %12 = arith.subf %9, %11 : vector<128x128xf32>
      %c0_4 = arith.constant 0 : index
      %c0_5 = arith.constant 0 : index
      %13 = vector.load %arg12[%c0_4, %c0_5] : memref<1x128xf32, #tpu.memory_space<vmem>>, vector<1x128xf32>
      %14 = vector.broadcast %13 : vector<1x128xf32> to vector<128x128xf32>
      %15 = arith.mulf %12, %14 : vector<128x128xf32>
      %c0_6 = arith.constant 0 : index
      %c0_7 = arith.constant 0 : index
      %16 = vector.load %arg4[%c0_6, %c0_7] : memref<1x128xf32, #tpu.memory_space<vmem>>, vector<1x128xf32>
      %17 = vector.broadcast %16 : vector<1x128xf32> to vector<128x128xf32>
      %18 = arith.mulf %15, %17 : vector<128x128xf32>
      %c0_8 = arith.constant 0 : index
      %c0_9 = arith.constant 0 : index
      %19 = vector.load %arg5[%c0_8, %c0_9] : memref<1x128xf32, #tpu.memory_space<vmem>>, vector<1x128xf32>
      %20 = vector.broadcast %19 : vector<1x128xf32> to vector<128x128xf32>
      %21 = arith.addf %18, %20 : vector<128x128xf32>
      %cst = arith.constant 0.000000e+00 : f32
      %22 = vector.broadcast %cst : f32 to vector<128x128xf32>
      %23 = arith.maximumf %21, %22 : vector<128x128xf32>
      %c0_10 = arith.constant 0 : index
      %c0_11 = arith.constant 0 : index
      %24 = vector.load %arg7[%c0_10, %c0_11] : memref<128x128xf32, #tpu.memory_space<vmem>>, vector<128x128xf32>
      tpu.vector_store %arg7[%c0_10, %c0_11], %23 {strides = array<i32>} : memref<128x128xf32, #tpu.memory_space<vmem>>, vector<128x128xf32>,
    } else {
    }
    return
  }
  func.func @transform_0(%arg0: i32, %arg1: i32) -> (i32, i32) {
    %c0_i32 = arith.constant 0 : i32
    %c0_i32_0 = arith.constant 0 : i32
    %c0_i32_1 = arith.constant 0 : i32
    return %c0_i32, %c0_i32_0 : i32, i32
  }
  func.func @transform_1(%arg0: i32, %arg1: i32) -> (i32, i32, i32) {
    %c0_i32 = arith.constant 0 : i32
    %c0_i32_0 = arith.constant 0 : i32
    %c0_i32_1 = arith.constant 0 : i32
    %c0_i32_2 = arith.constant 0 : i32
    return %c0_i32, %c0_i32_0, %c0_i32_1 : i32, i32, i32
  }
  func.func @transform_2(%arg0: i32, %arg1: i32) -> (i32, i32) {
    %c0_i32 = arith.constant 0 : i32
    %c0_i32_0 = arith.constant 0 : i32
    %c0_i32_1 = arith.constant 0 : i32
    return %c0_i32, %c0_i32_0 : i32, i32
  }
  func.func @transform_3(%arg0: i32, %arg1: i32) -> (i32, i32) {
    %c0_i32 = arith.constant 0 : i32
    %c0_i32_0 = arith.constant 0 : i32
    %c0_i32_1 = arith.constant 0 : i32
    return %c0_i32, %c0_i32_0 : i32, i32
  }
  func.func @transform_4(%arg0: i32, %arg1: i32) -> (i32, i32) {
    %c0_i32 = arith.constant 0 : i32
    %c0_i32_0 = arith.constant 0 : i32
    return %arg1, %c0_i32 : i32, i32
  }
  func.func @transform_5(%arg0: i32, %arg1: i32) -> (i32, i32) {
    %c0_i32 = arith.constant 0 : i32
    %c0_i32_0 = arith.constant 0 : i32
    return %arg1, %c0_i32 : i32, i32
  }
}

module attributes {stable_mosaic.version = 11 : i64} {
  func.func @kernel(%arg0: i32, %arg1: i32, %arg2: memref<808x128xf32, #tpu.memory_space<vmem>>, %arg3: memref<9x128x128xf32, #tpu.memory_space<vmem>>, %arg4: memref<1x128xf32, #tpu.memory_space<vmem>>, %arg5: memref<1x128xf32, #tpu.memory_space<vmem>>, %arg6: memref<128x1xf32, #tpu.memory_space<vmem>>, %arg7: memref<128x128xf32, #tpu.memory_space<vmem>>, %arg8: memref<128x128xf32, #tpu.memory_space<vmem>>, %arg9: memref<768x128xf32, #tpu.memory_space<vmem>>, %arg10: memref<1x128xf32, #tpu.memory_space<vmem>>, %arg11: memref<1x128xf32, #tpu.memory_space<vmem>>, %arg12: memref<1x128xf32, #tpu.memory_space<vmem>>, %arg13: memref<1x128xf32, #tpu.memory_space<vmem>>) attributes {dimension_semantics = [#tpu.dimension_semantics<arbitrary>, #tpu.dimension_semantics<arbitrary>], iteration_bounds = array<i64: 2, 6>, scalar_prefetch = 0 : i64, scratch_operands = 5 : i64, tpu.core_type = #tpu.core_type<tc>, window_params = [{pipeline_mode = #tpu.pipeline_mode<synchronous>, transform_indices = @transform_0, window_bounds = array<i64: 808, 128>}, {pipeline_mode = #tpu.pipeline_mode<synchronous>, transform_indices = @transform_1, window_bounds = array<i64: 9, 128, 128>}, {pipeline_mode = #tpu.pipeline_mode<synchronous>, transform_indices = @transform_2, window_bounds = array<i64: 1, 128>}, {pipeline_mode = #tpu.pipeline_mode<synchronous>, transform_indices = @transform_3, window_bounds = array<i64: 1, 128>}, {transform_indices = @transform_4, window_bounds = array<i64: 128, 1>}, {transform_indices = @transform_5, window_bounds = array<i64: 128, 128>}, {transform_indices = @transform_6, window_bounds = array<i64: 128, 128>}]} {
    %c128_i32 = arith.constant 128 : i32
    %0 = arith.muli %arg1, %c128_i32 : i32
    %1 = tpu.assume_multiple %0, 8 : i32
    %c0_i32 = arith.constant 0 : i32
    %2 = arith.cmpi eq, %arg0, %c0_i32 : i32
    %3 = arith.extui %2 : i1 to i32
    %c0_i32_0 = arith.constant 0 : i32
    %4 = arith.cmpi ne, %3, %c0_i32_0 : i32
    scf.if %4 {
      %c0_i32_2 = arith.constant 0 : i32
      %8 = arith.cmpi eq, %arg1, %c0_i32_2 : i32
      %9 = arith.extui %8 : i1 to i32
      %c0_i32_3 = arith.constant 0 : i32
      %10 = arith.cmpi ne, %9, %c0_i32_3 : i32
      scf.if %10 {
        %cst_47 = arith.constant 0.000000e+00 : f32
        %77 = vector.broadcast %cst_47 : f32 to vector<1x128xf32>
        %c0_48 = arith.constant 0 : index
        %c0_49 = arith.constant 0 : index
        %78 = vector.load %arg10[%c0_48, %c0_49] : memref<1x128xf32, #tpu.memory_space<vmem>>, vector<1x128xf32>
        tpu.vector_store %arg10[%c0_48, %c0_49], %77 {strides = array<i32>} : memref<1x128xf32, #tpu.memory_space<vmem>>, vector<1x128xf32>,
        %cst_50 = arith.constant 0.000000e+00 : f32
        %79 = vector.broadcast %cst_50 : f32 to vector<1x128xf32>
        %c0_51 = arith.constant 0 : index
        %c0_52 = arith.constant 0 : index
        %80 = vector.load %arg11[%c0_51, %c0_52] : memref<1x128xf32, #tpu.memory_space<vmem>>, vector<1x128xf32>
        tpu.vector_store %arg11[%c0_51, %c0_52], %79 {strides = array<i32>} : memref<1x128xf32, #tpu.memory_space<vmem>>, vector<1x128xf32>,
      } else {
      }
      %11 = arith.index_cast %1 : i32 to index
      %c0 = arith.constant 0 : index
      %12 = vector.load %arg2[%11, %c0] : memref<808x128xf32, #tpu.memory_space<vmem>>, vector<168x128xf32>
      %13 = vector.extract_strided_slice %12 {offsets = [0, 0], sizes = [128, 128], strides = [1, 1]} : vector<168x128xf32> to vector<128x128xf32>
      %c0_4 = arith.constant 0 : index
      %c0_5 = arith.constant 0 : index
      %c0_6 = arith.constant 0 : index
      %14 = vector.load %arg3[%c0_4, %c0_5, %c0_6] : memref<9x128x128xf32, #tpu.memory_space<vmem>>, vector<1x128x128xf32>
      %15 = vector.shape_cast %14 : vector<1x128x128xf32> to vector<128x128xf32>
      %cst = arith.constant dense<0.000000e+00> : vector<128x128xf32>
      %16 = tpu.matmul %13, %15, %cst {dimension_numbers = #tpu.dot_dimension_numbers<[1], [0], [0], [1], [0, 0, 1, 1], [], []>} : vector<128x128xf32>, vector<128x128xf32>, vector<128x128xf32> -> vector<128x128xf32>
      %17 = vector.extract_strided_slice %12 {offsets = [1, 0], sizes = [128, 128], strides = [1, 1]} : vector<168x128xf32> to vector<128x128xf32>
      %c1 = arith.constant 1 : index
      %c0_7 = arith.constant 0 : index
      %c0_8 = arith.constant 0 : index
      %18 = vector.load %arg3[%c1, %c0_7, %c0_8] : memref<9x128x128xf32, #tpu.memory_space<vmem>>, vector<1x128x128xf32>
      %19 = vector.shape_cast %18 : vector<1x128x128xf32> to vector<128x128xf32>
      %cst_9 = arith.constant dense<0.000000e+00> : vector<128x128xf32>
      %20 = tpu.matmul %17, %19, %cst_9 {dimension_numbers = #tpu.dot_dimension_numbers<[1], [0], [0], [1], [0, 0, 1, 1], [], []>} : vector<128x128xf32>, vector<128x128xf32>, vector<128x128xf32> -> vector<128x128xf32>
      %21 = arith.addf %16, %20 : vector<128x128xf32>
      %22 = vector.extract_strided_slice %12 {offsets = [2, 0], sizes = [128, 128], strides = [1, 1]} : vector<168x128xf32> to vector<128x128xf32>
      %c2 = arith.constant 2 : index
      %c0_10 = arith.constant 0 : index
      %c0_11 = arith.constant 0 : index
      %23 = vector.load %arg3[%c2, %c0_10, %c0_11] : memref<9x128x128xf32, #tpu.memory_space<vmem>>, vector<1x128x128xf32>
      %24 = vector.shape_cast %23 : vector<1x128x128xf32> to vector<128x128xf32>
      %cst_12 = arith.constant dense<0.000000e+00> : vector<128x128xf32>
      %25 = tpu.matmul %22, %24, %cst_12 {dimension_numbers = #tpu.dot_dimension_numbers<[1], [0], [0], [1], [0, 0, 1, 1], [], []>} : vector<128x128xf32>, vector<128x128xf32>, vector<128x128xf32> -> vector<128x128xf32>
      %26 = arith.addf %21, %25 : vector<128x128xf32>
      %27 = vector.extract_strided_slice %12 {offsets = [18, 0], sizes = [128, 128], strides = [1, 1]} : vector<168x128xf32> to vector<128x128xf32>
      %c3 = arith.constant 3 : index
      %c0_13 = arith.constant 0 : index
      %c0_14 = arith.constant 0 : index
      %28 = vector.load %arg3[%c3, %c0_13, %c0_14] : memref<9x128x128xf32, #tpu.memory_space<vmem>>, vector<1x128x128xf32>
      %29 = vector.shape_cast %28 : vector<1x128x128xf32> to vector<128x128xf32>
      %cst_15 = arith.constant dense<0.000000e+00> : vector<128x128xf32>
      %30 = tpu.matmul %27, %29, %cst_15 {dimension_numbers = #tpu.dot_dimension_numbers<[1], [0], [0], [1], [0, 0, 1, 1], [], []>} : vector<128x128xf32>, vector<128x128xf32>, vector<128x128xf32> -> vector<128x128xf32>
      %31 = arith.addf %26, %30 : vector<128x128xf32>
      %32 = vector.extract_strided_slice %12 {offsets = [19, 0], sizes = [128, 128], strides = [1, 1]} : vector<168x128xf32> to vector<128x128xf32>
      %c4 = arith.constant 4 : index
      %c0_16 = arith.constant 0 : index
      %c0_17 = arith.constant 0 : index
      %33 = vector.load %arg3[%c4, %c0_16, %c0_17] : memref<9x128x128xf32, #tpu.memory_space<vmem>>, vector<1x128x128xf32>
      %34 = vector.shape_cast %33 : vector<1x128x128xf32> to vector<128x128xf32>
      %cst_18 = arith.constant dense<0.000000e+00> : vector<128x128xf32>
      %35 = tpu.matmul %32, %34, %cst_18 {dimension_numbers = #tpu.dot_dimension_numbers<[1], [0], [0], [1], [0, 0, 1, 1], [], []>} : vector<128x128xf32>, vector<128x128xf32>, vector<128x128xf32> -> vector<128x128xf32>
      %36 = arith.addf %31, %35 : vector<128x128xf32>
      %37 = vector.extract_strided_slice %12 {offsets = [20, 0], sizes = [128, 128], strides = [1, 1]} : vector<168x128xf32> to vector<128x128xf32>
      %c5 = arith.constant 5 : index
      %c0_19 = arith.constant 0 : index
      %c0_20 = arith.constant 0 : index
      %38 = vector.load %arg3[%c5, %c0_19, %c0_20] : memref<9x128x128xf32, #tpu.memory_space<vmem>>, vector<1x128x128xf32>
      %39 = vector.shape_cast %38 : vector<1x128x128xf32> to vector<128x128xf32>
      %cst_21 = arith.constant dense<0.000000e+00> : vector<128x128xf32>
      %40 = tpu.matmul %37, %39, %cst_21 {dimension_numbers = #tpu.dot_dimension_numbers<[1], [0], [0], [1], [0, 0, 1, 1], [], []>} : vector<128x128xf32>, vector<128x128xf32>, vector<128x128xf32> -> vector<128x128xf32>
      %41 = arith.addf %36, %40 : vector<128x128xf32>
      %42 = vector.extract_strided_slice %12 {offsets = [36, 0], sizes = [128, 128], strides = [1, 1]} : vector<168x128xf32> to vector<128x128xf32>
      %c6 = arith.constant 6 : index
      %c0_22 = arith.constant 0 : index
      %c0_23 = arith.constant 0 : index
      %43 = vector.load %arg3[%c6, %c0_22, %c0_23] : memref<9x128x128xf32, #tpu.memory_space<vmem>>, vector<1x128x128xf32>
      %44 = vector.shape_cast %43 : vector<1x128x128xf32> to vector<128x128xf32>
      %cst_24 = arith.constant dense<0.000000e+00> : vector<128x128xf32>
      %45 = tpu.matmul %42, %44, %cst_24 {dimension_numbers = #tpu.dot_dimension_numbers<[1], [0], [0], [1], [0, 0, 1, 1], [], []>} : vector<128x128xf32>, vector<128x128xf32>, vector<128x128xf32> -> vector<128x128xf32>
      %46 = arith.addf %41, %45 : vector<128x128xf32>
      %47 = vector.extract_strided_slice %12 {offsets = [37, 0], sizes = [128, 128], strides = [1, 1]} : vector<168x128xf32> to vector<128x128xf32>
      %c7 = arith.constant 7 : index
      %c0_25 = arith.constant 0 : index
      %c0_26 = arith.constant 0 : index
      %48 = vector.load %arg3[%c7, %c0_25, %c0_26] : memref<9x128x128xf32, #tpu.memory_space<vmem>>, vector<1x128x128xf32>
      %49 = vector.shape_cast %48 : vector<1x128x128xf32> to vector<128x128xf32>
      %cst_27 = arith.constant dense<0.000000e+00> : vector<128x128xf32>
      %50 = tpu.matmul %47, %49, %cst_27 {dimension_numbers = #tpu.dot_dimension_numbers<[1], [0], [0], [1], [0, 0, 1, 1], [], []>} : vector<128x128xf32>, vector<128x128xf32>, vector<128x128xf32> -> vector<128x128xf32>
      %51 = arith.addf %46, %50 : vector<128x128xf32>
      %52 = vector.extract_strided_slice %12 {offsets = [38, 0], sizes = [128, 128], strides = [1, 1]} : vector<168x128xf32> to vector<128x128xf32>
      %c8 = arith.constant 8 : index
      %c0_28 = arith.constant 0 : index
      %c0_29 = arith.constant 0 : index
      %53 = vector.load %arg3[%c8, %c0_28, %c0_29] : memref<9x128x128xf32, #tpu.memory_space<vmem>>, vector<1x128x128xf32>
      %54 = vector.shape_cast %53 : vector<1x128x128xf32> to vector<128x128xf32>
      %cst_30 = arith.constant dense<0.000000e+00> : vector<128x128xf32>
      %55 = tpu.matmul %52, %54, %cst_30 {dimension_numbers = #tpu.dot_dimension_numbers<[1], [0], [0], [1], [0, 0, 1, 1], [], []>} : vector<128x128xf32>, vector<128x128xf32>, vector<128x128xf32> -> vector<128x128xf32>
      %56 = arith.addf %51, %55 : vector<128x128xf32>
      %57 = arith.index_cast %1 : i32 to index
      %c0_31 = arith.constant 0 : index
      %58 = vector.load %arg9[%57, %c0_31] : memref<768x128xf32, #tpu.memory_space<vmem>>, vector<128x128xf32>
      tpu.vector_store %arg9[%57, %c0_31], %56 {strides = array<i32>} : memref<768x128xf32, #tpu.memory_space<vmem>>, vector<128x128xf32>,
      %c0_32 = arith.constant 0 : index
      %c0_33 = arith.constant 0 : index
      %59 = vector.load %arg8[%c0_32, %c0_33] : memref<128x128xf32, #tpu.memory_space<vmem>>, vector<128x128xf32>
      tpu.vector_store %arg8[%c0_32, %c0_33], %56 {strides = array<i32>} : memref<128x128xf32, #tpu.memory_space<vmem>>, vector<128x128xf32>,
      %c0_34 = arith.constant 0 : index
      %c0_35 = arith.constant 0 : index
      %60 = vector.load %arg6[%c0_34, %c0_35] : memref<128x1xf32, #tpu.memory_space<vmem>>, vector<128x1xf32>
      %61 = vector.broadcast %60 : vector<128x1xf32> to vector<128x128xf32>
      %62 = arith.mulf %56, %61 : vector<128x128xf32>
      %c0_36 = arith.constant 0 : index
      %c0_37 = arith.constant 0 : index
      %63 = vector.load %arg10[%c0_36, %c0_37] : memref<1x128xf32, #tpu.memory_space<vmem>>, vector<1x128xf32>
      %cst_38 = arith.constant dense<0.000000e+00> : vector<128xf32>
      %64 = vector.multi_reduction <add>, %62, %cst_38 [0] : vector<128x128xf32> to vector<128xf32>
      %65 = vector.shape_cast %64 : vector<128xf32> to vector<1x128xf32>
      %66 = arith.addf %63, %65 : vector<1x128xf32>
      %c0_39 = arith.constant 0 : index
      %c0_40 = arith.constant 0 : index
      %67 = vector.load %arg10[%c0_39, %c0_40] : memref<1x128xf32, #tpu.memory_space<vmem>>, vector<1x128xf32>
      tpu.vector_store %arg10[%c0_39, %c0_40], %66 {strides = array<i32>} : memref<1x128xf32, #tpu.memory_space<vmem>>, vector<1x128xf32>,
      %c0_41 = arith.constant 0 : index
      %c0_42 = arith.constant 0 : index
      %68 = vector.load %arg11[%c0_41, %c0_42] : memref<1x128xf32, #tpu.memory_space<vmem>>, vector<1x128xf32>
      %69 = arith.mulf %62, %56 : vector<128x128xf32>
      %cst_43 = arith.constant dense<0.000000e+00> : vector<128xf32>
      %70 = vector.multi_reduction <add>, %69, %cst_43 [0] : vector<128x128xf32> to vector<128xf32>
      %71 = vector.shape_cast %70 : vector<128xf32> to vector<1x128xf32>
      %72 = arith.addf %68, %71 : vector<1x128xf32>
      %c0_44 = arith.constant 0 : index
      %c0_45 = arith.constant 0 : index
      %73 = vector.load %arg11[%c0_44, %c0_45] : memref<1x128xf32, #tpu.memory_space<vmem>>, vector<1x128xf32>
      tpu.vector_store %arg11[%c0_44, %c0_45], %72 {strides = array<i32>} : memref<1x128xf32, #tpu.memory_space<vmem>>, vector<1x128xf32>,
      %c5_i32 = arith.constant 5 : i32
      %74 = arith.cmpi eq, %arg1, %c5_i32 : i32
      %75 = arith.extui %74 : i1 to i32
      %c0_i32_46 = arith.constant 0 : i32
      %76 = arith.cmpi ne, %75, %c0_i32_46 : i32
      scf.if %76 {
        %c0_47 = arith.constant 0 : index
        %c0_48 = arith.constant 0 : index
        %77 = vector.load %arg10[%c0_47, %c0_48] : memref<1x128xf32, #tpu.memory_space<vmem>>, vector<1x128xf32>
        %cst_49 = arith.constant 0.001953125 : f32
        %78 = vector.broadcast %cst_49 : f32 to vector<1x128xf32>
        %79 = arith.mulf %77, %78 : vector<1x128xf32>
        %c0_50 = arith.constant 0 : index
        %c0_51 = arith.constant 0 : index
        %80 = vector.load %arg11[%c0_50, %c0_51] : memref<1x128xf32, #tpu.memory_space<vmem>>, vector<1x128xf32>
        %cst_52 = arith.constant 0.001953125 : f32
        %81 = vector.broadcast %cst_52 : f32 to vector<1x128xf32>
        %82 = arith.mulf %80, %81 : vector<1x128xf32>
        %83 = arith.mulf %79, %79 : vector<1x128xf32>
        %84 = arith.subf %82, %83 : vector<1x128xf32>
        %c0_53 = arith.constant 0 : index
        %c0_54 = arith.constant 0 : index
        %85 = vector.load %arg12[%c0_53, %c0_54] : memref<1x128xf32, #tpu.memory_space<vmem>>, vector<1x128xf32>
        tpu.vector_store %arg12[%c0_53, %c0_54], %79 {strides = array<i32>} : memref<1x128xf32, #tpu.memory_space<vmem>>, vector<1x128xf32>,
        %cst_55 = arith.constant 9.99999974E-6 : f32
        %86 = vector.broadcast %cst_55 : f32 to vector<1x128xf32>
        %87 = arith.addf %84, %86 : vector<1x128xf32>
        %88 = math.rsqrt %87 : vector<1x128xf32>
        %c0_56 = arith.constant 0 : index
        %c0_57 = arith.constant 0 : index
        %89 = vector.load %arg13[%c0_56, %c0_57] : memref<1x128xf32, #tpu.memory_space<vmem>>, vector<1x128xf32>
        tpu.vector_store %arg13[%c0_56, %c0_57], %88 {strides = array<i32>} : memref<1x128xf32, #tpu.memory_space<vmem>>, vector<1x128xf32>,
      } else {
      }
    } else {
    }
    %c1_i32 = arith.constant 1 : i32
    %5 = arith.cmpi eq, %arg0, %c1_i32 : i32
    %6 = arith.extui %5 : i1 to i32
    %c0_i32_1 = arith.constant 0 : i32
    %7 = arith.cmpi ne, %6, %c0_i32_1 : i32
    scf.if %7 {
      %8 = arith.index_cast %1 : i32 to index
      %c0 = arith.constant 0 : index
      %9 = vector.load %arg9[%8, %c0] : memref<768x128xf32, #tpu.memory_space<vmem>>, vector<128x128xf32>
      %c0_2 = arith.constant 0 : index
      %c0_3 = arith.constant 0 : index
      %10 = vector.load %arg12[%c0_2, %c0_3] : memref<1x128xf32, #tpu.memory_space<vmem>>, vector<1x128xf32>
      %11 = vector.broadcast %10 : vector<1x128xf32> to vector<128x128xf32>
      %12 = arith.subf %9, %11 : vector<128x128xf32>
      %c0_4 = arith.constant 0 : index
      %c0_5 = arith.constant 0 : index
      %13 = vector.load %arg13[%c0_4, %c0_5] : memref<1x128xf32, #tpu.memory_space<vmem>>, vector<1x128xf32>
      %14 = vector.broadcast %13 : vector<1x128xf32> to vector<128x128xf32>
      %15 = arith.mulf %12, %14 : vector<128x128xf32>
      %c0_6 = arith.constant 0 : index
      %c0_7 = arith.constant 0 : index
      %16 = vector.load %arg4[%c0_6, %c0_7] : memref<1x128xf32, #tpu.memory_space<vmem>>, vector<1x128xf32>
      %17 = vector.broadcast %16 : vector<1x128xf32> to vector<128x128xf32>
      %18 = arith.mulf %15, %17 : vector<128x128xf32>
      %c0_8 = arith.constant 0 : index
      %c0_9 = arith.constant 0 : index
      %19 = vector.load %arg5[%c0_8, %c0_9] : memref<1x128xf32, #tpu.memory_space<vmem>>, vector<1x128xf32>
      %20 = vector.broadcast %19 : vector<1x128xf32> to vector<128x128xf32>
      %21 = arith.addf %18, %20 : vector<128x128xf32>
      %c0_10 = arith.constant 0 : index
      %c0_11 = arith.constant 0 : index
      %22 = vector.load %arg7[%c0_10, %c0_11] : memref<128x128xf32, #tpu.memory_space<vmem>>, vector<128x128xf32>
      %23 = arith.addf %21, %22 : vector<128x128xf32>
      %cst = arith.constant 0.000000e+00 : f32
      %24 = vector.broadcast %cst : f32 to vector<128x128xf32>
      %25 = arith.maximumf %23, %24 : vector<128x128xf32>
      %c0_12 = arith.constant 0 : index
      %c0_13 = arith.constant 0 : index
      %26 = vector.load %arg8[%c0_12, %c0_13] : memref<128x128xf32, #tpu.memory_space<vmem>>, vector<128x128xf32>
      tpu.vector_store %arg8[%c0_12, %c0_13], %25 {strides = array<i32>} : memref<128x128xf32, #tpu.memory_space<vmem>>, vector<128x128xf32>,
    } else {
    }
    return
  }
  func.func @transform_0(%arg0: i32, %arg1: i32) -> (i32, i32) {
    %c0_i32 = arith.constant 0 : i32
    %c0_i32_0 = arith.constant 0 : i32
    %c0_i32_1 = arith.constant 0 : i32
    return %c0_i32, %c0_i32_0 : i32, i32
  }
  func.func @transform_1(%arg0: i32, %arg1: i32) -> (i32, i32, i32) {
    %c0_i32 = arith.constant 0 : i32
    %c0_i32_0 = arith.constant 0 : i32
    %c0_i32_1 = arith.constant 0 : i32
    %c0_i32_2 = arith.constant 0 : i32
    return %c0_i32, %c0_i32_0, %c0_i32_1 : i32, i32, i32
  }
  func.func @transform_2(%arg0: i32, %arg1: i32) -> (i32, i32) {
    %c0_i32 = arith.constant 0 : i32
    %c0_i32_0 = arith.constant 0 : i32
    %c0_i32_1 = arith.constant 0 : i32
    return %c0_i32, %c0_i32_0 : i32, i32
  }
  func.func @transform_3(%arg0: i32, %arg1: i32) -> (i32, i32) {
    %c0_i32 = arith.constant 0 : i32
    %c0_i32_0 = arith.constant 0 : i32
    %c0_i32_1 = arith.constant 0 : i32
    return %c0_i32, %c0_i32_0 : i32, i32
  }
  func.func @transform_4(%arg0: i32, %arg1: i32) -> (i32, i32) {
    %c0_i32 = arith.constant 0 : i32
    %c0_i32_0 = arith.constant 0 : i32
    return %arg1, %c0_i32 : i32, i32
  }
  func.func @transform_5(%arg0: i32, %arg1: i32) -> (i32, i32) {
    %c0_i32 = arith.constant 0 : i32
    %c0_i32_0 = arith.constant 0 : i32
    return %arg1, %c0_i32 : i32, i32
  }
  func.func @transform_6(%arg0: i32, %arg1: i32) -> (i32, i32) {
    %c0_i32 = arith.constant 0 : i32
    %c0_i32_0 = arith.constant 0 : i32
    return %arg1, %c0_i32 : i32, i32
  }
}

</mosaic_0001>

<bundles_post_ra>
// kernel: basic_block_forward.2
= control target key start
LH: loop header
LB: loop body
LE: loop exit
PB: predicated region body
PF: predicated region fallthrough
CT: control target
= control target key end

     0   :  { %s4110_s18 = smov 0   ;;  %s4112_s19 = smov 0   ;;  %s5364_s0 = inlined_call_operand.vmem [shape: f32[808,128], index: 0, kind: input, shape index: {}]   ;;  %s5365_s1 = inlined_call_operand.vmem [shape: f32[9,128,128], index: 1, kind: input, shape index: {}]   ;;  %s5366_s2 = inlined_call_operand.vmem [shape: f32[1,128], index: 2, kind: input, shape index: {}]   ;;  %s5367_s3 = inlined_call_operand.vmem [shape: f32[1,128], index: 3, kind: input, shape index: {}]   ;;  %s5368_s4 = inlined_call_operand.vmem [shape: f32[768,1], index: 4, kind: input, shape index: {}]   ;;  %s5369_s5 = inlined_call_operand.vmem [shape: f32[768,128], index: 5, kind: output, shape index: {}]  }
   0x1   :  { %s4114_s20 = smov 0   ;;  %s4116_s21 = smov 0  }
   0x2   :  { %s4118_s22 = smov 0  }
   0x3 LB: > { %s24_s23 = sadd.s32 1, %s4068_s20  ;;  %s27_s24 = sadd.s32 1, %s4072_s21  ;;  %s4076_s22 = sphi %s4118_s22, %s15_s22   ;;  %s4072_s21 = sphi %s4116_s21, %s5391_s21   ;;  %s4068_s20 = sphi %s4114_s20, %s5390_s20   ;;  %s4064_s19 = sphi %s4112_s19, %s5389_s19   ;;  %s4060_s18 = sphi %s4110_s18, %s5388_s18  }
   0x4   : > { %p25_p0 = scmp.ge.s32.totalorder %s24_s23, 6  ;;  %p2621_p1 = scmp.ge.s32.totalorder %s4076_s22, 1 }
   0x5   : > { %p200_p2 = scmp.lt.s32.totalorder %s4076_s22, 13 }
   0x6   : > { %s5393_s23 = smov (%p25_p0, %s24_s23), 0  ;;  %s5395_s24 = smov (!%p25_p0, %s27_s24), %s4072_s21 }
   0x7   : > { %p201_p3 = pnand %p2621_p1, %p200_p2  ;;  %p29_p4 = scmp.ge.s32.totalorder %s5395_s24, 2 }
   0x8   : > { %s2622_s25 = sshll.u32 (!%p201_p3), %s4060_s18, 4  ;;  %s4146_s26 = sshll.u32 (!%p201_p3), %s4060_s18, 7 }
   0x9   : > { %s5397_s24 = smov (%p29_p4, %s5395_s24), 0  ;;  %204 = sbr.rel (%p201_p3) target bundleno = 516 (0x204), region = 40 }
   0xa   : > { %p229_p5 = scmp.lt.s32.totalorder (!%p201_p3), %s2622_s25, 95  ;;  %p2627_p6 = scmp.ne.s32.totalorder (!%p201_p3), %s4064_s19, 0 }
  0x10   : > { %s5399_s25 = smov (!%p229_p5, %s2622_s25), 95  ;;  %244 = sbr.rel (%p2627_p6) target bundleno = 487 (0x1e7), region = 44 }
  0x11   : > { %s2623_s27 = sshll.u32 %s5399_s25, 3 }
  0x12   : > { %s4151_s30 = scalar_lea.vmem %s5368_s4, %s2623_s27  ;;  %s4156_s8 = scalar_lea.vmem %s5369_s5, %s2623_s27 }
  0x17   : > { %p2628_p7 = scmp.ne.s32.totalorder %s4060_s18, 0 }
  0x18   : > { %v4078_v0 = vmov (!%p2628_p7), 0.0  }
  0x19   : > { %248 = sbr.rel (%p2628_p7) target bundleno = 32 (0x20), region = 48  ;;  %249 = vst [vmem:[#allocation3] sm:$0x1] (!%p2628_p7), %v4078_v0  ;;  %250 = vst [vmem:[#allocation4] sm:$0x1] (!%p2628_p7), %v4078_v0 }
  0x20 PF: > { %v2629_v1 = vld [vmem:[%s5365_s1 + $0x80] sm:$0xff]  ;;  %v2630_v2 = vld [vmem:[%s5365_s1 + $0x88] sm:$0xff]  ;;  %v2631_v6 = vld [vmem:[%s5365_s1 + $0x90] sm:$0xff]  ;;  %s4212_s13 = scalar_lea.vmem %s5364_s0, %s4146_s26  ;;  %vm323_vm0 = vcmask 1046528   ;;  %vm1094_vm1 = vcmask 1044480   ;;  %vm680_vm2 = vcmask 1045504  }
  0x21   : > { %v2677_v3 = vld [vmem:[%s5365_s1 + $0x200] sm:$0xff]  ;;  %v3557_v4 = vpack.c.bf16 %v2630_v2, %v2629_v1  ;;  %v2678_v5 = vld [vmem:[%s5365_s1 + $0x208] sm:$0xff]  ;;  %v2632_v7 = vld [vmem:[%s5365_s1 + $0x98] sm:$0xff]  ;;  %vm1322_vm3 = vcmask 1043456   ;;  %vm1736_vm4 = vcmask 1042432   ;;  %vm1964_vm5 = vcmask 1041408  }
  0x22   : > { %v3685_v8 = vpack.c.bf16 %v2678_v5, %v2677_v3  ;;  %v3561_v9 = vpack.c.bf16 %v2632_v7, %v2631_v6  ;;  %v2679_v10 = vld [vmem:[%s5365_s1 + $0x210] sm:$0xff]  ;;  %v2680_v11 = vld [vmem:[%s5365_s1 + $0x218] sm:$0xff]  ;;  %v2633_v12 = vld [vmem:[%s5365_s1 + $0xa0] sm:$0xff]  ;;  %p2757_p8 = scmp.ne.s32.totalorder %s4060_s18, 5 }
  0x23   : > { %3558 = vmatprep.subr.bf16.mxu1 %v3557_v4  ;;  %v3689_v13 = vpack.c.bf16 %v2680_v11, %v2679_v10  ;;  %v2634_v14 = vld [vmem:[%s5365_s1 + $0xa8] sm:$0xff]  ;;  %v2681_v15 = vld [vmem:[%s5365_s1 + $0x220] sm:$0xff]  ;;  %v2635_v19 = vld [vmem:[%s5365_s1 + $0xb0] sm:$0xff] }
  0x24   : > { %v2682_v16 = vld [vmem:[%s5365_s1 + $0x228] sm:$0xff]  ;;  %3686 = vmatprep.subr.bf16.mxu0 %v3685_v8  ;;  %3560 = vmatpush3.bf16.msra.mxu1 %v3557_v4  ;;  %v3565_v17 = vpack.c.bf16 %v2634_v14, %v2633_v12  ;;  %v2636_v20 = vld [vmem:[%s5365_s1 + $0xb8] sm:$0xff]  ;;  %v2683_v21 = vld [vmem:[%s5365_s1 + $0x230] sm:$0xff] }
  0x25   : > { %3688 = vmatpush3.bf16.msra.mxu0 %v3685_v8  ;;  %3562 = vmatprep.subr.bf16.mxu1 %v3561_v9  ;;  %v3693_v18 = vpack.c.bf16 %v2682_v16, %v2681_v15  ;;  %v2684_v22 = vld [vmem:[%s5365_s1 + $0x238] sm:$0xff]  ;;  %v3569_v23 = vpack.c.bf16 %v2636_v20, %v2635_v19  ;;  %v2637_v24 = vld [vmem:[%s5365_s1 + $0xc0] sm:$0xff]  ;;  %v2638_v25 = vld [vmem:[%s5365_s1 + $0xc8] sm:$0xff] }
  0x26   : > { %3690 = vmatprep.subr.bf16.mxu0 %v3689_v13  ;;  %v3697_v26 = vpack.c.bf16 %v2684_v22, %v2683_v21  ;;  %v2685_v27 = vld [vmem:[%s5365_s1 + $0x240] sm:$0xff]  ;;  %v2686_v28 = vld [vmem:[%s5365_s1 + $0x248] sm:$0xff]  ;;  %v4234_v32 = vld [vmem:[%s4212_s13 + $0x10] sm:$0xff]  ;;  %v3573_v37 = vpack.c.bf16 %v2638_v25, %v2637_v24 }
  0x27   : > { %v4227_v29 = vld [vmem:[%s4212_s13] sm:$0xff]  ;;  %v4230_v30 = vld [vmem:[%s4212_s13 + $0x8] sm:$0xff]  ;;  %v4237_v33 = vld [vmem:[%s4212_s13 + $0x18] sm:$0xff]  ;;  %v1095_v35 = vrot.slane %v4234_v32, 3  ;;  %v3701_v38 = vpack.c.bf16 %v2686_v28, %v2685_v27  ;;  %v327_v0 = vrot.slane %v4234_v32, 1 }
  0x28   : > { %3564 = vmatpush3.bf16.msra.mxu1 %v3561_v9  ;;  %v324_v31 = vrot.slane %v4227_v29, 1  ;;  %v325_v34 = vrot.slane %v4230_v30, 1  ;;  %v1096_v36 = vrot.slane %v4237_v33, 3  ;;  %v2639_v39 = vld [vmem:[%s5365_s1 + $0xd0] sm:$0xff]  ;;  %v2640_v40 = vld [vmem:[%s5365_s1 + $0xd8] sm:$0xff]  ;;  %v2641_v47 = vld [vmem:[%s5365_s1 + $0xe0] sm:$0xff] }
  0x29   : > { %3692 = vmatpush3.bf16.msra.mxu0 %v3689_v13  ;;  %3566 = vmatprep.subr.bf16.mxu1 %v3565_v17  ;;  %v2687_v43 = vld [vmem:[%s5365_s1 + $0x250] sm:$0xff]  ;;  %v2688_v44 = vld [vmem:[%s5365_s1 + $0x258] sm:$0xff]  ;;  %v3577_v45 = vpack.c.bf16 %v2640_v40, %v2639_v39  ;;  %v2642_v48 = vld [vmem:[%s5365_s1 + $0xe8] sm:$0xff]  ;;  %v329_v5 = vrot.slane %v4237_v33, 1 }
  0x2a   : > { %3694 = vmatprep.subr.bf16.mxu0 %v3693_v18  ;;  %v326_v41 = vsel %vm323_vm0, %v324_v31, %v325_v34  ;;  %v1097_v42 = vsel %vm1094_vm1, %v1095_v35, %v1096_v36  ;;  %v3705_v46 = vpack.c.bf16 %v2688_v44, %v2687_v43  ;;  %v2689_v49 = vld [vmem:[%s5365_s1 + $0x260] sm:$0xff]  ;;  %v2690_v50 = vld [vmem:[%s5365_s1 + $0x268] sm:$0xff]  ;;  %v3581_v51 = vpack.c.bf16 %v2642_v48, %v2641_v47  ;;  %v2643_v53 = vld [vmem:[%s5365_s1 + $0xf0] sm:$0xff] }
  0x2b   : > { %3085 = vmatprep.mubr.f32.mxu1 %v326_v41  ;;  %3309 = vmatprep.mubr.f32.mxu0 %v1097_v42  ;;  %v3709_v52 = vpack.c.bf16 %v2690_v50, %v2689_v49  ;;  %v2644_v54 = vld [vmem:[%s5365_s1 + $0xf8] sm:$0xff]  ;;  %v2691_v55 = vld [vmem:[%s5365_s1 + $0x270] sm:$0xff]  ;;  %v273_v59 = vld [vmem:[%s5365_s1] sm:$0xff]  ;;  %v328_v10 = vsel %vm323_vm0, %v325_v34, %v327_v0 }
  0x2c   : > { %3568 = vmatpush3.bf16.msra.mxu1 %v3565_v17  ;;  %v2692_v56 = vld [vmem:[%s5365_s1 + $0x278] sm:$0xff]  ;;  %v3585_v57 = vpack.c.bf16 %v2644_v54, %v2643_v53  ;;  %v274_v60 = vld [vmem:[%s5365_s1 + $0x8] sm:$0xff]  ;;  %v4291_v61 = vld [vmem:[%s4212_s13 + $0x20] sm:$0xff] }
  0x2d   : > { %3696 = vmatpush3.bf16.msra.mxu0 %v3693_v18  ;;  %3570 = vmatprep.subr.bf16.mxu1 %v3569_v23  ;;  %v3713_v58 = vpack.c.bf16 %v2692_v56, %v2691_v55  ;;  %v2693_v62 = vld [vmem:[%s5365_s1 + $0x280] sm:$0xff]  ;;  %v2694_v63 = vld [vmem:[%s5365_s1 + $0x288] sm:$0xff]  ;;  %v3589_v2 = vpack.c.bf16 %v274_v60, %v273_v59  ;;  %v1098_v3 = vrot.slane %v4291_v61, 3  ;;  %v4306_v6 = vld [vmem:[%s4212_s13 + $0x30] sm:$0xff]  ;;  %v331_v11 = vrot.slane %v4291_v61, 1 }
  0x2e   : > { %3698 = vmatprep.subr.bf16.mxu0 %v3697_v26  ;;  %v4301_v1 = vld [vmem:[%s4212_s13 + $0x28] sm:$0xff]  ;;  %v3717_v4 = vpack.c.bf16 %v2694_v63, %v2693_v62  ;;  %v275_v8 = vld [vmem:[%s5365_s1 + $0x10] sm:$0xff]  ;;  %v276_v9 = vld [vmem:[%s5365_s1 + $0x18] sm:$0xff]  ;;  %v1102_v16 = vrot.slane %v4306_v6, 3  ;;  %v330_v18 = vsel %vm323_vm0, %v327_v0, %v329_v5  ;;  %v335_v31 = vrot.slane %v4306_v6, 1 }
  0x2f   : > { %v1100_v7 = vrot.slane %v4301_v1, 3  ;;  %v2695_v12 = vld [vmem:[%s5365_s1 + $0x290] sm:$0xff]  ;;  %v2696_v13 = vld [vmem:[%s5365_s1 + $0x298] sm:$0xff]  ;;  %v1099_v15 = vsel %vm1094_vm1, %v1096_v36, %v1098_v3  ;;  %v4333_v17 = vld [vmem:[%s4212_s13 + $0x40] sm:$0xff]  ;;  %v3593_v19 = vpack.c.bf16 %v276_v9, %v275_v8  ;;  %v333_v20 = vrot.slane %v4301_v1, 1 }
  0x30   : > { %3572 = vmatpush3.bf16.msra.mxu1 %v3569_v23  ;;  %v4326_v14 = vld [vmem:[%s4212_s13 + $0x38] sm:$0xff]  ;;  %v277_v21 = vld [vmem:[%s5365_s1 + $0x20] sm:$0xff]  ;;  %v278_v22 = vld [vmem:[%s5365_s1 + $0x28] sm:$0xff]  ;;  %v3721_v24 = vpack.c.bf16 %v2696_v13, %v2695_v12  ;;  %v332_v28 = vsel %vm323_vm0, %v329_v5, %v331_v11  ;;  %v1106_v34 = vrot.slane %v4333_v17, 3 }
  0x31   : > { %3700 = vmatpush3.bf16.msra.mxu0 %v3697_v26  ;;  %3574 = vmatprep.subr.bf16.mxu1 %v3573_v37  ;;  %v1101_v23 = vsel %vm1094_vm1, %v1098_v3, %v1100_v7  ;;  %v1104_v25 = vrot.slane %v4326_v14, 3  ;;  %v4346_v26 = vld [vmem:[%s4212_s13 + $0x48] sm:$0xff]  ;;  %v4349_v27 = vld [vmem:[%s4212_s13 + $0x50] sm:$0xff]  ;;  %v2697_v35 = vld [vmem:[%s5365_s1 + $0x2a0] sm:$0xff]  ;;  %v1103_v39 = vsel %vm1094_vm1, %v1100_v7, %v1102_v16  ;;  %v3597_v40 = vpack.c.bf16 %v278_v22, %v277_v21 }
  0x32   : > { %3702 = vmatprep.subr.bf16.mxu0 %v3701_v38  ;;  %v2698_v36 = vld [vmem:[%s5365_s1 + $0x2a8] sm:$0xff]  ;;  %v279_v41 = vld [vmem:[%s5365_s1 + $0x30] sm:$0xff]  ;;  %v280_v42 = vld [vmem:[%s5365_s1 + $0x38] sm:$0xff]  ;;  %v334_v43 = vsel %vm323_vm0, %v331_v11, %v333_v20  ;;  %v1108_v44 = vrot.slane %v4346_v26, 3  ;;  %v336_v54 = vsel %vm323_vm0, %v333_v20, %v335_v31  ;;  %v343_v62 = vrot.slane %v4349_v27, 1 }
  0x33   : > { %v2699_v47 = vld [vmem:[%s5365_s1 + $0x2b0] sm:$0xff]  ;;  %v2700_v48 = vld [vmem:[%s5365_s1 + $0x2b8] sm:$0xff]  ;;  %v4382_v49 = vld [vmem:[%s4212_s13 + $0x60] sm:$0xff]  ;;  %v1105_v50 = vsel %vm1094_vm1, %v1102_v16, %v1104_v25  ;;  %v1107_v55 = vsel %vm1094_vm1, %v1104_v25, %v1106_v34  ;;  %v3601_v59 = vpack.c.bf16 %v280_v42, %v279_v41  ;;  %v681_v7 = vrot.slane %v4227_v29, 2 }
  0x34   : > { %3576 = vmatpush3.bf16.msra.mxu1 %v3573_v37  ;;  %v337_v37 = vrot.slane %v4326_v14, 1  ;;  %v3729_v60 = vpack.c.bf16 %v2700_v48, %v2699_v47  ;;  %v1114_v63 = vrot.slane %v4382_v49, 3  ;;  %v2701_v0 = vld [vmem:[%s5365_s1 + $0x2c0] sm:$0xff]  ;;  %v1109_v3 = vsel %vm1094_vm1, %v1106_v34, %v1108_v44  ;;  %v4411_v11 = vld [vmem:[%s4212_s13 + $0x68] sm:$0xff]  ;;  %v283_v20 = vld [vmem:[%s5365_s1 + $0x50] sm:$0xff] }
  0x35   : > { %3704 = vmatpush3.bf16.msra.mxu0 %v3701_v38  ;;  %3578 = vmatprep.subr.bf16.mxu1 %v3577_v45  ;;  %v4362_v38 = vld [vmem:[%s4212_s13 + $0x58] sm:$0xff]  ;;  %v684_v16 = vrot.slane %v4234_v32, 2  ;;  %v686_v22 = vrot.slane %v4237_v33, 2  ;;  %v4432_v25 = vld [vmem:[%s4212_s13 + $0x70] sm:$0xff]  ;;  %v692_v41 = vrot.slane %v4306_v6, 2 }
  0x36   : > { %3706 = vmatprep.subr.bf16.mxu0 %v3705_v46  ;;  %v1112_v53 = vrot.slane %v4362_v38, 3  ;;  %v338_v56 = vsel %vm323_vm0, %v335_v31, %v337_v37  ;;  %v345_v13 = vrot.slane %v4362_v38, 1  ;;  %v284_v21 = vld [vmem:[%s5365_s1 + $0x58] sm:$0xff]  ;;  %v1118_v47 = vrot.slane %v4432_v25, 3 }
  0x37   : > { %v2704_v31 = vld [vmem:[%s5365_s1 + $0x2d8] sm:$0xff] }
  0x38   : > { %3580 = vmatpush3.bf16.msra.mxu1 %v3577_v45  ;;  %v339_v45 = vrot.slane %v4333_v17, 1  ;;  %v346_v42 = vsel %vm323_vm0, %v343_v62, %v345_v13 }
  0x39   : > { %3708 = vmatpush3.bf16.msra.mxu0 %v3705_v46  ;;  %3582 = vmatprep.subr.bf16.mxu1 %v3581_v51  ;;  %v1110_v46 = vrot.slane %v4349_v27, 3 }
  0x3a   : > { %3710 = vmatprep.subr.bf16.mxu0 %v3709_v52 }
  0x3b   : > { %v1111_v5 = vsel %vm1094_vm1, %v1108_v44, %v1110_v46  ;;  %v1113_v9 = vsel %vm1094_vm1, %v1110_v46, %v1112_v53  ;;  %v4457_v44 = vld [vmem:[%s4212_s13 + $0x78] sm:$0xff]  ;;  %v694_v46 = vrot.slane %v4326_v14, 2 }
  0x3c   : > { %3584 = vmatpush3.bf16.msra.mxu1 %v3581_v51  ;;  %v3725_v51 = vpack.c.bf16 %v2698_v36, %v2697_v35  ;;  %v690_v36 = vrot.slane %v4301_v1, 2 }
  0x3d   : > { %3712 = vmatpush3.bf16.msra.mxu0 %v3709_v52  ;;  %3586 = vmatprep.subr.bf16.mxu1 %v3585_v57  ;;  %v341_v52 = vrot.slane %v4346_v26, 1 }
  0x3e   : > { %3714 = vmatprep.subr.bf16.mxu0 %v3713_v58 }
  0x3f   : > { %v342_v8 = vsel %vm323_vm0, %v339_v45, %v341_v52 }
  0x40   : > { %3588 = vmatpush3.bf16.msra.mxu1 %v3585_v57  ;;  %v281_v57 = vld [vmem:[%s5365_s1 + $0x40] sm:$0xff] }
  0x41   : > { %3716 = vmatpush3.bf16.msra.mxu0 %v3713_v58  ;;  %3590 = vmatprep.subr.bf16.mxu1 %v3589_v2  ;;  %v282_v58 = vld [vmem:[%s5365_s1 + $0x48] sm:$0xff] }
  0x42   : > { %3718 = vmatprep.subr.bf16.mxu0 %v3717_v4 }
  0x43   : > { %3086 = vmatmul.mubr.f32.vlgmr.msra.gmra.mrb[0].mxu1 %v328_v10  ;;  %v3605_v10 = vpack.c.bf16 %v282_v58, %v281_v57 }
  0x44   : > { %3310 = vmatmul.mubr.f32.vlgmr.msra.gmra.mrb[0].mxu0 %v1099_v15  ;;  %3592 = vmatpush3.bf16.msra.mxu1 %v3589_v2  ;;  %v2702_v2 = vld [vmem:[%s5365_s1 + $0x2c8] sm:$0xff]  ;;  %v682_v15 = vrot.slane %v4230_v30, 2 }
  0x45   : > { %3720 = vmatpush3.bf16.msra.mxu0 %v3717_v4  ;;  %3088 = vmatprep.mubr.f32.mxu1 %v330_v18  ;;  %v340_v4 = vsel %vm323_vm0, %v337_v37, %v339_v45  ;;  %v4413_v12 = vpack.c.bf16 %v2702_v2, %v2701_v0  ;;  %v344_v18 = vsel %vm323_vm0, %v341_v52, %v343_v62  ;;  %v347_v37 = vrot.slane %v4382_v49, 1  ;;  %v286_v62 = vld [vmem:[%s5365_s1 + $0x68] sm:$0xff] }
  0x46   : > { %3312 = vmatprep.mubr.f32.mxu0 %v1101_v23  ;;  %3594 = vmatprep.subr.bf16.mxu1 %v3593_v19  ;;  %v688_v23 = vrot.slane %v4291_v61, 2  ;;  %v4441_v34 = vsel %vm680_vm2, %v681_v7, %v682_v15  ;;  %v4444_v35 = vsel %vm680_vm2, %v682_v15, %v684_v16  ;;  %v696_v52 = vrot.slane %v4333_v17, 2 }
  0x47   : > { %3089 = vmatmul.mubr.f32.gmra.mrb[2].mxu1 %v332_v28  ;;  %3722 = vmatprep.subr.bf16.mxu0 %v3721_v24  ;;  %v2703_v28 = vld [vmem:[%s5365_s1 + $0x2d0] sm:$0xff]  ;;  %v348_v58 = vsel %vm323_vm0, %v345_v13, %v347_v37  ;;  %v351_v2 = vrot.slane %v4432_v25, 1 }
  0x48   : > { %3313 = vmatmul.mubr.f32.gmra.mrb[2].mxu0 %v1103_v39  ;;  %3596 = vmatpush3.bf16.msra.mxu1 %v3593_v19  ;;  %v1115_v19 = vsel %vm1094_vm1, %v1112_v53, %v1114_v63  ;;  %v4449_v39 = vsel %vm680_vm2, %v684_v16, %v686_v22  ;;  %v4460_v45 = vsel %vm680_vm2, %v688_v23, %v690_v36  ;;  %v349_v53 = vrot.slane %v4411_v11, 1  ;;  %v287_v16 = vld [vmem:[%s5365_s1 + $0x70] sm:$0xff] }
  0x49   : > { %3724 = vmatpush3.bf16.msra.mxu0 %v3721_v24  ;;  %3091 = vmatprep.mubr.f32.mxu1 %v334_v43  ;;  %v1116_v24 = vrot.slane %v4411_v11, 3  ;;  %v3609_v43 = vpack.c.bf16 %v284_v21, %v283_v20  ;;  %v3737_v48 = vpack.c.bf16 %v2704_v31, %v2703_v28  ;;  %v4490_v0 = vsel %vm680_vm2, %v694_v46, %v696_v52 }
  0x4a   : > { %3315 = vmatprep.mubr.f32.mxu0 %v1105_v50  ;;  %3598 = vmatprep.subr.bf16.mxu1 %v3597_v40  ;;  %v4465_v50 = vld [vmem:[%s4212_s13 + $0x80] sm:$0xff]  ;;  %v350_v13 = vsel %vm323_vm0, %v347_v37, %v349_v53  ;;  %v1324_v28 = vrot.slane %v4237_v33, 4  ;;  %v352_v31 = vsel %vm323_vm0, %v349_v53, %v351_v2 }
  0x4b   : > { %3092 = vmatmul.mubr.f32.gmra.mrb[4].mxu1 %v336_v54  ;;  %3726 = vmatprep.subr.bf16.mxu0 %v3725_v51  ;;  %v4473_v54 = vsel %vm680_vm2, %v692_v41, %v694_v46  ;;  %v1117_v57 = vsel %vm1094_vm1, %v1114_v63, %v1116_v24  ;;  %v1122_v63 = vrot.slane %v4465_v50, 3  ;;  %v355_v37 = vrot.slane %v4465_v50, 1 }
  0x4c   : > { %3316 = vmatmul.mubr.f32.gmra.mrb[4].mxu0 %v1107_v55  ;;  %3600 = vmatpush3.bf16.msra.mxu1 %v3597_v40  ;;  %v4452_v40 = vsel %vm680_vm2, %v686_v22, %v688_v23  ;;  %v698_v55 = vrot.slane %v4346_v26, 2  ;;  %v288_v22 = vld [vmem:[%s5365_s1 + $0x78] sm:$0xff]  ;;  %v2707_v23 = vld [vmem:[%s5365_s1 + $0x2f0] sm:$0xff] }
  0x4d   : > { %3728 = vmatpush3.bf16.msra.mxu0 %v3725_v51  ;;  %3094 = vmatprep.mubr.f32.mxu1 %v338_v56  ;;  %v4468_v51 = vsel %vm680_vm2, %v690_v36, %v692_v41  ;;  %v5374_v56 = vrot.slane %v4349_v27, 2  ;;  %v1737_v41 = vrot.slane %v4291_v61, 5 }
  0x4e   : > { %3318 = vmatprep.mubr.f32.mxu0 %v1109_v3  ;;  %3602 = vmatprep.subr.bf16.mxu1 %v3601_v59  ;;  %v2705_v3 = vld [vmem:[%s5365_s1 + $0x2e0] sm:$0xff]  ;;  %v4504_v7 = vsel %vm680_vm2, %v696_v52, %v698_v55  ;;  %v1740_v52 = vrot.slane %v4306_v6, 5 }
  0x4f   : > { %3095 = vmatmul.mubr.f32.gmra.mrb[6].mxu1 %v340_v4  ;;  %3730 = vmatprep.subr.bf16.mxu0 %v3729_v60  ;;  %v2706_v4 = vld [vmem:[%s5365_s1 + $0x2e8] sm:$0xff] }
  0x50   : > { %3319 = vmatmul.mubr.f32.gmra.mrb[6].mxu0 %v1111_v5  ;;  %3604 = vmatpush3.bf16.msra.mxu1 %v3601_v59  ;;  %v1120_v59 = vrot.slane %v4457_v44, 3  ;;  %v4501_v5 = vld [vmem:[%s4212_s13 + $0x88] sm:$0xff]  ;;  %v3741_v20 = vpack.c.bf16 %v2706_v4, %v2705_v3 }
  0x51   : > { %3732 = vmatpush3.bf16.msra.mxu0 %v3729_v60  ;;  %3097 = vmatprep.mubr.f32.mxu1 %v342_v8  ;;  %v285_v60 = vld [vmem:[%s5365_s1 + $0x60] sm:$0xff]  ;;  %v4509_v8 = vsel %vm680_vm2, %v698_v55, %v5374_v56  ;;  %v1124_v21 = vrot.slane %v4501_v5, 3  ;;  %v1742_v55 = vrot.slane %v4326_v14, 5  ;;  %v2710_v4 = vld [vmem:[%s5365_s1 + $0x308] sm:$0xff] }
  0x52   : > { %3321 = vmatprep.mubr.f32.mxu0 %v1113_v9  ;;  %3606 = vmatprep.subr.bf16.mxu1 %v3605_v10  ;;  %v1119_v9 = vsel %vm1094_vm1, %v1116_v24, %v1118_v47  ;;  %v3613_v15 = vpack.c.bf16 %v286_v62, %v285_v60  ;;  %v2708_v24 = vld [vmem:[%s5365_s1 + $0x2f8] sm:$0xff]  ;;  %v1123_v36 = vsel %vm1094_vm1, %v1120_v59, %v1122_v63  ;;  %v2709_v60 = vld [vmem:[%s5365_s1 + $0x300] sm:$0xff] }
  0x53   : > { %3098 = vmatmul.mubr.f32.gmra.mrb[8].mxu1 %v344_v18  ;;  %3734 = vmatprep.subr.bf16.mxu0 %v4413_v12  ;;  %v4519_v18 = vld [vmem:[%s4212_s13 + $0x90] sm:$0xff]  ;;  %v3745_v53 = vpack.c.bf16 %v2708_v24, %v2707_v23  ;;  %v2712_v24 = vld [vmem:[%s5365_s1 + $0x318] sm:$0xff] }
  0x54   : > { %3322 = vmatmul.mubr.f32.gmra.mrb[8].mxu0 %v1115_v19  ;;  %3608 = vmatpush3.bf16.msra.mxu1 %v3605_v10  ;;  %v353_v10 = vrot.slane %v4457_v44, 1  ;;  %v1323_v19 = vrot.slane %v4234_v32, 4  ;;  %v1126_v46 = vrot.slane %v4519_v18, 3  ;;  %v2711_v23 = vld [vmem:[%s5365_s1 + $0x310] sm:$0xff] }
  0x55   : > { %3736 = vmatpush3.bf16.msra.mxu0 %v4413_v12  ;;  %3100 = vmatprep.mubr.f32.mxu1 %v346_v42  ;;  %v1121_v12 = vsel %vm1094_vm1, %v1118_v47, %v1120_v59  ;;  %v1738_v47 = vrot.slane %v4301_v1, 5  ;;  %v2646_v59 = vld [vmem:[%s5365_s1 + $0x108] sm:$0xff] }
  0x56   : > { %3324 = vmatprep.mubr.f32.mxu0 %v1117_v57  ;;  %3610 = vmatprep.subr.bf16.mxu1 %v3609_v43  ;;  %v354_v42 = vsel %vm323_vm0, %v351_v2, %v353_v10  ;;  %v1744_v57 = vrot.slane %v4333_v17, 5  ;;  %v356_v3 = vsel %vm323_vm0, %v353_v10, %v355_v37  ;;  %v5372_v10 = vrot.slane %v4349_v27, 5 }
  0x57   : > { %3101 = vmatmul.mubr.f32.gmra.mrb[10].mxu1 %v348_v58  ;;  %3738 = vmatprep.subr.bf16.mxu0 %v3737_v48  ;;  %v2645_v58 = vld [vmem:[%s5365_s1 + $0x100] sm:$0xff]  ;;  %v4555_v62 = vsel %vm1736_vm4, %v1737_v41, %v1738_v47  ;;  %v4558_v2 = vsel %vm1736_vm4, %v1738_v47, %v1740_v52  ;;  %v3749_v37 = vpack.c.bf16 %v2710_v4, %v2709_v60  ;;  %v1328_v41 = vrot.slane %v4301_v1, 4 }
  0x58   : > { %3325 = vmatmul.mubr.f32.gmra.mrb[10].mxu0 %v1119_v9  ;;  %3612 = vmatpush3.bf16.msra.mxu1 %v3609_v43  ;;  %v3617_v43 = vpack.c.bf16 %v288_v22, %v287_v16  ;;  %v2647_v9 = vld [vmem:[%s5365_s1 + $0x110] sm:$0xff]  ;;  %v4572_v16 = vsel %vm1736_vm4, %v1740_v52, %v1742_v55  ;;  %v1326_v22 = vrot.slane %v4291_v61, 4  ;;  %v3753_v47 = vpack.c.bf16 %v2712_v24, %v2711_v23 }
  0x59   : > { %3740 = vmatpush3.bf16.msra.mxu0 %v3737_v48  ;;  %3103 = vmatprep.mubr.f32.mxu1 %v350_v13  ;;  %v1125_v48 = vsel %vm1094_vm1, %v1122_v63, %v1124_v21  ;;  %v1746_v63 = vrot.slane %v4346_v26, 5  ;;  %v2648_v13 = vld [vmem:[%s5365_s1 + $0x118] sm:$0xff]  ;;  %v5371_v52 = vrot.slane %v4465_v50, 5  ;;  %v1334_v4 = vrot.slane %v4333_v17, 4 }
  0x5a   : > { %3327 = vmatprep.mubr.f32.mxu0 %v1121_v12  ;;  %3614 = vmatprep.subr.bf16.mxu1 %v3613_v15  ;;  %v4575_v12 = vsel %vm1736_vm4, %v1742_v55, %v1744_v57  ;;  %v1762_v55 = vrot.slane %v4501_v5, 5  ;;  %v1965_v24 = vrot.slane %v4291_v61, 6 }
  0x5b   : > { %3104 = vmatmul.mubr.f32.gmra.mrb[12].mxu1 %v352_v31  ;;  %3742 = vmatprep.subr.bf16.mxu0 %v3741_v20  ;;  %v4587_v31 = vsel %vm1736_vm4, %v1744_v57, %v1746_v63  ;;  %v1332_v57 = vrot.slane %v4326_v14, 4 }
  0x5c   : > { %3328 = vmatmul.mubr.f32.gmra.mrb[12].mxu0 %v1123_v36  ;;  %3616 = vmatpush3.bf16.msra.mxu1 %v3613_v15  ;;  %v1127_v15 = vsel %vm1094_vm1, %v1124_v21, %v1126_v46  ;;  %v3621_v36 = vpack.c.bf16 %v2646_v59, %v2645_v58  ;;  %v1325_v21 = vsel %vm1322_vm3, %v1323_v19, %v1324_v28  ;;  %v1330_v46 = vrot.slane %v4306_v6, 4 }
  0x5d   : > { %3744 = vmatpush3.bf16.msra.mxu0 %v3741_v20  ;;  %3106 = vmatprep.mubr.f32.mxu1 %v354_v42  ;;  %v4592_v20 = vsel %vm1736_vm4, %v1746_v63, %v5372_v10  ;;  %v3625_v42 = vpack.c.bf16 %v2648_v13, %v2647_v9  ;;  %v1327_v19 = vsel %vm1322_vm3, %v1324_v28, %v1326_v22  ;;  %v1764_v58 = vrot.slane %v4519_v18, 5  ;;  %v2713_v9 = vld [vmem:[%s5365_s1 + $0x320] sm:$0xff]  ;;  %v2714_v13 = vld [vmem:[%s5365_s1 + $0x328] sm:$0xff] }
  0x5e   : > { %3330 = vmatprep.mubr.f32.mxu0 %v1125_v48  ;;  %3618 = vmatprep.subr.bf16.mxu1 %v3617_v43  ;;  %v4607_v48 = vld [vmem:[%s4212_s13 + $0x98] sm:$0xff]  ;;  %v4620_v28 = vsel %vm1736_vm4, %v5371_v52, %v1762_v55  ;;  %v910_v59 = vrot.slane %v4501_v5, 2  ;;  %v912_v63 = vrot.slane %v4519_v18, 2  ;;  %v1974_v52 = vrot.slane %v4346_v26, 6 }
  0x5f   : > { %3107 = vmatmul.mubr.f32.gmra.mrb[14].mxu1 %v356_v3  ;;  %3746 = vmatprep.subr.bf16.mxu0 %v3745_v53  ;;  %v5370_v60 = vrot.slane %v4607_v48, 5  ;;  %v4627_v3 = vsel %vm1322_vm3, %v1326_v22, %v1328_v41 }
  0x60   : > { %3331 = vmatmul.mubr.f32.gmra.mrb[14].mxu0 %v1127_v15  ;;  %3620 = vmatpush3.bf16.msra.mxu1 %v3617_v43  ;;  %v5373_v43 = vrot.slane %v4465_v50, 2  ;;  %v4637_v15 = vsel %vm1736_vm4, %v1762_v55, %v1764_v58  ;;  %v4650_v23 = vsel %vm680_vm2, %v910_v59, %v912_v63  ;;  %v2651_v55 = vld [vmem:[%s5365_s1 + $0x130] sm:$0xff] }
  0x61   : > { %3748 = vmatpush3.bf16.msra.mxu0 %v3745_v53  ;;  %3141 = vmatprep.mubr.f32.mxu1 %v4227_v29  ;;  %v2649_v53 = vld [vmem:[%s5365_s1 + $0x120] sm:$0xff]  ;;  %v2650_v29 = vld [vmem:[%s5365_s1 + $0x128] sm:$0xff]  ;;  %v4647_v22 = vsel %vm1736_vm4, %v1764_v58, %v5370_v60  ;;  %v1966_v58 = vrot.slane %v4301_v1, 6  ;;  %v2715_v63 = vld [vmem:[%s5365_s1 + $0x330] sm:$0xff] }
  0x62   : > { %3365 = vmatprep.mubr.f32.mxu0 %v1325_v21  ;;  %3622 = vmatprep.subr.bf16.mxu1 %v3621_v36  ;;  %v3629_v21 = vpack.c.bf16 %v2650_v29, %v2649_v53  ;;  %v1970_v53 = vrot.slane %v4326_v14, 6  ;;  %v4672_v29 = vsel %vm1322_vm3, %v1332_v57, %v1334_v4 }
  0x63   : > { %3142 = vmatmul.mubr.f32.vlgmr.msra.gmra.mrb[0].mxu1 %v4230_v30  ;;  %3750 = vmatprep.subr.bf16.mxu0 %v3749_v37  ;;  %v4642_v30 = vsel %vm680_vm2, %v5373_v43, %v910_v59  ;;  %v1336_v59 = vrot.slane %v4346_v26, 4  ;;  %v5375_v43 = vrot.slane %v4465_v50, 6 }
  0x64   : > { %3366 = vmatmul.mubr.f32.vlgmr.msra.gmra.mrb[0].mxu0 %v1327_v19  ;;  %3624 = vmatpush3.bf16.msra.mxu1 %v3621_v36  ;;  %v4655_v36 = vsel %vm1322_vm3, %v1328_v41, %v1330_v46  ;;  %v2652_v19 = vld [vmem:[%s5365_s1 + $0x138] sm:$0xff]  ;;  %v1968_v41 = vrot.slane %v4306_v6, 6 }
  0x65   : > { %3752 = vmatpush3.bf16.msra.mxu0 %v3749_v37  ;;  %3144 = vmatprep.mubr.f32.mxu1 %v4234_v32  ;;  %v4666_v37 = vsel %vm1322_vm3, %v1330_v46, %v1332_v57  ;;  %v3757_v32 = vpack.c.bf16 %v2714_v13, %v2713_v9  ;;  %v2716_v46 = vld [vmem:[%s5365_s1 + $0x338] sm:$0xff]  ;;  %v4682_v9 = vsel %vm1964_vm5, %v1965_v24, %v1966_v58  ;;  %v1972_v13 = vrot.slane %v4333_v17, 6 }
  0x66   : > { %3368 = vmatprep.mubr.f32.mxu0 %v4627_v3  ;;  %3626 = vmatprep.subr.bf16.mxu1 %v3625_v42  ;;  %v4687_v57 = vsel %vm1964_vm5, %v1966_v58, %v1968_v41  ;;  %v4690_v60 = vsel %vm1964_vm5, %v1968_v41, %v1970_v53  ;;  %v1338_v24 = vrot.slane %v4349_v27, 4  ;;  %v4708_v58 = vsel %vm1322_vm3, %v1334_v4, %v1336_v59  ;;  %v2717_v4 = vld [vmem:[%s5365_s1 + $0x340] sm:$0xff] }
  0x67   : > { %3145 = vmatmul.mubr.f32.gmra.mrb[2].mxu1 %v4237_v33  ;;  %3754 = vmatprep.subr.bf16.mxu0 %v3753_v47  ;;  %v3633_v33 = vpack.c.bf16 %v2652_v19, %v2651_v55  ;;  %v4696_v10 = vsel %vm1964_vm5, %v1970_v53, %v1972_v13  ;;  %v3761_v55 = vpack.c.bf16 %v2716_v46, %v2715_v63  ;;  %v1340_v41 = vrot.slane %v4362_v38, 4  ;;  %v2653_v53 = vld [vmem:[%s5365_s1 + $0x140] sm:$0xff]  ;;  %v2654_v63 = vld [vmem:[%s5365_s1 + $0x148] sm:$0xff] }
  0x68   : > { %3369 = vmatmul.mubr.f32.gmra.mrb[2].mxu0 %v4655_v36  ;;  %3628 = vmatpush3.bf16.msra.mxu1 %v3625_v42  ;;  %v1990_v42 = vrot.slane %v4501_v5, 6  ;;  %v4702_v19 = vsel %vm1964_vm5, %v1972_v13, %v1974_v52  ;;  %v2718_v13 = vld [vmem:[%s5365_s1 + $0x348] sm:$0xff] }
  0x69   : > { %3756 = vmatpush3.bf16.msra.mxu0 %v3753_v47  ;;  %3147 = vmatprep.mubr.f32.mxu1 %v4291_v61  ;;  %5376 = vst [vmem:[#allocation7_spill] sm:$0xff] %v4702_v19  ;;  %v1976_v47 = vrot.slane %v4349_v27, 6  ;;  %v1992_v61 = vrot.slane %v4519_v18, 6  ;;  %v5378_v19 = vrot.slane %v4607_v48, 6 }
  0x6a   : > { %3371 = vmatprep.mubr.f32.mxu0 %v4666_v37  ;;  %3630 = vmatprep.subr.bf16.mxu1 %v3629_v21  ;;  %v4720_v46 = vsel %vm1964_vm5, %v5375_v43, %v1990_v42 }
  0x6b   : > { %3148 = vmatmul.mubr.f32.gmra.mrb[4].mxu1 %v4301_v1  ;;  %3758 = vmatprep.subr.bf16.mxu0 %v3757_v32  ;;  %5377 = vst [vmem:[#allocation8_spill] sm:$0xff] %v4720_v46  ;;  %v4733_v56 = vsel %vm1964_vm5, %v1974_v52, %v1976_v47  ;;  %v4736_v43 = vsel %vm1964_vm5, %v1990_v42, %v1992_v61  ;;  %v1342_v1 = vrot.slane %v4382_v49, 4  ;;  %v2655_v42 = vld [vmem:[%s5365_s1 + $0x150] sm:$0xff] }
  0x6c   : > { %3372 = vmatmul.mubr.f32.gmra.mrb[4].mxu0 %v4672_v29  ;;  %3632 = vmatpush3.bf16.msra.mxu1 %v3629_v21  ;;  %v4740_v21 = vsel %vm1322_vm3, %v1336_v59, %v1338_v24  ;;  %v4746_v46 = vsel %vm1964_vm5, %v1992_v61, %v5378_v19  ;;  %v3637_v52 = vpack.c.bf16 %v2654_v63, %v2653_v53  ;;  %v1344_v59 = vrot.slane %v4411_v11, 4  ;;  %v2656_v19 = vld [vmem:[%s5365_s1 + $0x158] sm:$0xff] }
  0x6d   : > { %3760 = vmatpush3.bf16.msra.mxu0 %v3757_v32  ;;  %3150 = vmatprep.mubr.f32.mxu1 %v4306_v6  ;;  %v4751_v32 = vsel %vm1322_vm3, %v1338_v24, %v1340_v41  ;;  %v3765_v6 = vpack.c.bf16 %v2718_v13, %v2717_v4  ;;  %v2720_v24 = vld [vmem:[%s5365_s1 + $0x358] sm:$0xff]  ;;  %v4769_v61 = vsel %vm1322_vm3, %v1340_v41, %v1342_v1  ;;  %v1346_v53 = vrot.slane %v4432_v25, 4  ;;  %v2658_v41 = vld [vmem:[%s5365_s1 + $0x168] sm:$0xff] }
  0x6e   : > { %3374 = vmatprep.mubr.f32.mxu0 %v4708_v58  ;;  %3634 = vmatprep.subr.bf16.mxu1 %v3633_v33  ;;  %v4775_v63 = vsel %vm1322_vm3, %v1342_v1, %v1344_v59  ;;  %v2722_v1 = vld [vmem:[%s5365_s1 + $0x368] sm:$0xff] }
  0x6f   : > { %3151 = vmatmul.mubr.f32.gmra.mrb[6].mxu1 %v4326_v14  ;;  %3762 = vmatprep.subr.bf16.mxu0 %v3761_v55  ;;  %v2719_v14 = vld [vmem:[%s5365_s1 + $0x350] sm:$0xff]  ;;  %v4793_v13 = vsel %vm1322_vm3, %v1344_v59, %v1346_v53 }
  0x70   : > { %3375 = vmatmul.mubr.f32.gmra.mrb[6].mxu0 %v4740_v21  ;;  %3636 = vmatpush3.bf16.msra.mxu1 %v3633_v33  ;;  %v3641_v33 = vpack.c.bf16 %v2656_v19, %v2655_v42  ;;  %v3769_v4 = vpack.c.bf16 %v2720_v24, %v2719_v14  ;;  %v1350_v42 = vrot.slane %v4465_v50, 4  ;;  %v2659_v59 = vld [vmem:[%s5365_s1 + $0x170] sm:$0xff]  ;;  %v2660_v24 = vld [vmem:[%s5365_s1 + $0x178] sm:$0xff] }
  0x71   : > { %3764 = vmatpush3.bf16.msra.mxu0 %v3761_v55  ;;  %3153 = vmatprep.mubr.f32.mxu1 %v4333_v17  ;;  %v1348_v55 = vrot.slane %v4457_v44, 4  ;;  %v2657_v17 = vld [vmem:[%s5365_s1 + $0x160] sm:$0xff] }
  0x72   : > { %3377 = vmatprep.mubr.f32.mxu0 %v4751_v32  ;;  %3638 = vmatprep.subr.bf16.mxu1 %v3637_v52 }
  0x73   : > { %3154 = vmatmul.mubr.f32.gmra.mrb[8].mxu1 %v4346_v26  ;;  %3766 = vmatprep.subr.bf16.mxu0 %v3765_v6  ;;  %v2721_v26 = vld [vmem:[%s5365_s1 + $0x360] sm:$0xff]  ;;  %v4799_v19 = vsel %vm1322_vm3, %v1346_v53, %v1348_v55  ;;  %v2724_v53 = vld [vmem:[%s5365_s1 + $0x378] sm:$0xff] }
  0x74   : > { %3378 = vmatmul.mubr.f32.gmra.mrb[8].mxu0 %v4769_v61  ;;  %3640 = vmatpush3.bf16.msra.mxu1 %v3637_v52  ;;  %v3645_v52 = vpack.c.bf16 %v2658_v41, %v2657_v17  ;;  %v3773_v14 = vpack.c.bf16 %v2722_v1, %v2721_v26  ;;  %v2723_v17 = vld [vmem:[%s5365_s1 + $0x370] sm:$0xff]  ;;  %v1354_v41 = vrot.slane %v4519_v18, 4 }
  0x75   : > { %3768 = vmatpush3.bf16.msra.mxu0 %v3765_v6  ;;  %3156 = vmatprep.mubr.f32.mxu1 %v4349_v27  ;;  %v1352_v6 = vrot.slane %v4501_v5, 4  ;;  %v4817_v5 = vsel %vm1322_vm3, %v1348_v55, %v1350_v42  ;;  %v3777_v1 = vpack.c.bf16 %v2724_v53, %v2723_v17  ;;  %v2662_v55 = vld [vmem:[%s5365_s1 + $0x188] sm:$0xff]  ;;  %v2663_v53 = vld [vmem:[%s5365_s1 + $0x190] sm:$0xff] }
  0x76   : > { %3380 = vmatprep.mubr.f32.mxu0 %v4775_v63  ;;  %3642 = vmatprep.subr.bf16.mxu1 %v3641_v33 }
  0x77   : > { %3157 = vmatmul.mubr.f32.gmra.mrb[10].mxu1 %v4362_v38  ;;  %3770 = vmatprep.subr.bf16.mxu0 %v3769_v4  ;;  %v4823_v26 = vsel %vm1322_vm3, %v1350_v42, %v1352_v6  ;;  %v2726_v42 = vld [vmem:[%s5365_s1 + $0x388] sm:$0xff] }
  0x78   : > { %3381 = vmatmul.mubr.f32.gmra.mrb[10].mxu0 %v4793_v13  ;;  %3644 = vmatpush3.bf16.msra.mxu1 %v3641_v33  ;;  %v3649_v33 = vpack.c.bf16 %v2660_v24, %v2659_v59  ;;  %v2725_v59 = vld [vmem:[%s5365_s1 + $0x380] sm:$0xff]  ;;  %v4842_v24 = vsel %vm1322_vm3, %v1352_v6, %v1354_v41  ;;  %v2727_v6 = vld [vmem:[%s5365_s1 + $0x390] sm:$0xff] }
  0x79   : > { %3772 = vmatpush3.bf16.msra.mxu0 %v3769_v4  ;;  %3159 = vmatprep.mubr.f32.mxu1 %v4382_v49  ;;  %v2661_v4 = vld [vmem:[%s5365_s1 + $0x180] sm:$0xff]  ;;  %v3781_v17 = vpack.c.bf16 %v2726_v42, %v2725_v59  ;;  %v2666_v42 = vld [vmem:[%s5365_s1 + $0x1a8] sm:$0xff] }
  0x7a   : > { %3383 = vmatprep.mubr.f32.mxu0 %v4799_v19  ;;  %3646 = vmatprep.subr.bf16.mxu1 %v3645_v52 }
  0x7b   : > { %3160 = vmatmul.mubr.f32.gmra.mrb[12].mxu1 %v4411_v11  ;;  %3774 = vmatprep.subr.bf16.mxu0 %v3773_v14 }
  0x7c   : > { %3384 = vmatmul.mubr.f32.gmra.mrb[12].mxu0 %v4817_v5  ;;  %3648 = vmatpush3.bf16.msra.mxu1 %v3645_v52  ;;  %v3653_v52 = vpack.c.bf16 %v2662_v55, %v2661_v4  ;;  %v2728_v4 = vld [vmem:[%s5365_s1 + $0x398] sm:$0xff] }
  0x7d   : > { %3776 = vmatpush3.bf16.msra.mxu0 %v3773_v14  ;;  %3162 = vmatprep.mubr.f32.mxu1 %v4432_v25  ;;  %v2664_v14 = vld [vmem:[%s5365_s1 + $0x198] sm:$0xff]  ;;  %v3785_v59 = vpack.c.bf16 %v2728_v4, %v2727_v6  ;;  %v2670_v6 = vld [vmem:[%s5365_s1 + $0x1c8] sm:$0xff] }
  0x7e   : > { %3386 = vmatprep.mubr.f32.mxu0 %v4823_v26  ;;  %3650 = vmatprep.subr.bf16.mxu1 %v3649_v33  ;;  %v3657_v55 = vpack.c.bf16 %v2664_v14, %v2663_v53  ;;  %v2669_v14 = vld [vmem:[%s5365_s1 + $0x1c0] sm:$0xff]  ;;  %v2734_v4 = vld [vmem:[%s5365_s1 + $0x3c8] sm:$0xff] }
  0x7f   : > { %3163 = vmatmul.mubr.f32.gmra.mrb[14].mxu1 %v4457_v44  ;;  %3778 = vmatprep.subr.bf16.mxu0 %v3777_v1 }
  0x80   : > { %3387 = vmatmul.mubr.f32.gmra.mrb[14].mxu0 %v4842_v24  ;;  %3652 = vmatpush3.bf16.msra.mxu1 %v3649_v33  ;;  %v2665_v33 = vld [vmem:[%s5365_s1 + $0x1a0] sm:$0xff] }
  0x81   : > { %3780 = vmatpush3.bf16.msra.mxu0 %v3777_v1  ;;  %3197 = vmatprep.mubr.f32.mxu1 %v4441_v34  ;;  %v2729_v34 = vld [vmem:[%s5365_s1 + $0x3a0] sm:$0xff]  ;;  %v2667_v1 = vld [vmem:[%s5365_s1 + $0x1b0] sm:$0xff] }
  0x82   : > { %3421 = vmatprep.mubr.f32.mxu0 %v4627_v3  ;;  %3654 = vmatprep.subr.bf16.mxu1 %v3653_v52  ;;  %v3661_v3 = vpack.c.bf16 %v2666_v42, %v2665_v33  ;;  %v2671_v33 = vld [vmem:[%s5365_s1 + $0x1d0] sm:$0xff]  ;;  %v2672_v42 = vld [vmem:[%s5365_s1 + $0x1d8] sm:$0xff] }
  0x83   : > { %3198 = vmatmul.mubr.f32.vlgmr.msra.gmra.mrb[0].mxu1 %v4444_v35  ;;  %3782 = vmatprep.subr.bf16.mxu0 %v3781_v17  ;;  %v2730_v35 = vld [vmem:[%s5365_s1 + $0x3a8] sm:$0xff] }
  0x84   : > { %3422 = vmatmul.mubr.f32.vlgmr.msra.gmra.mrb[0].mxu0 %v4655_v36  ;;  %3656 = vmatpush3.bf16.msra.mxu1 %v3653_v52  ;;  %v3789_v36 = vpack.c.bf16 %v2730_v35, %v2729_v34  ;;  %v2668_v52 = vld [vmem:[%s5365_s1 + $0x1b8] sm:$0xff]  ;;  %v2735_v34 = vld [vmem:[%s5365_s1 + $0x3d0] sm:$0xff] }
  0x85   : > { %3784 = vmatpush3.bf16.msra.mxu0 %v3781_v17  ;;  %3200 = vmatprep.mubr.f32.mxu1 %v4449_v39  ;;  %v2732_v17 = vld [vmem:[%s5365_s1 + $0x3b8] sm:$0xff]  ;;  %v3665_v53 = vpack.c.bf16 %v2668_v52, %v2667_v1  ;;  %v706_v1 = vrot.slane %v4411_v11, 2 }
  0x86   : > { %3424 = vmatprep.mubr.f32.mxu0 %v4666_v37  ;;  %3658 = vmatprep.subr.bf16.mxu1 %v3657_v55  ;;  %v2731_v37 = vld [vmem:[%s5365_s1 + $0x3b0] sm:$0xff]  ;;  %v2736_v35 = vld [vmem:[%s5365_s1 + $0x3d8] sm:$0xff] }
  0x87   : > { %3201 = vmatmul.mubr.f32.gmra.mrb[2].mxu1 %v4452_v40  ;;  %3786 = vmatprep.subr.bf16.mxu0 %v3785_v59  ;;  %v3801_v52 = vpack.c.bf16 %v2736_v35, %v2735_v34 }
  0x88   : > { %3425 = vmatmul.mubr.f32.gmra.mrb[2].mxu0 %v4672_v29  ;;  %3660 = vmatpush3.bf16.msra.mxu1 %v3657_v55  ;;  %v3793_v29 = vpack.c.bf16 %v2732_v17, %v2731_v37  ;;  %v3669_v55 = vpack.c.bf16 %v2670_v6, %v2669_v14  ;;  %v2673_v37 = vld [vmem:[%s5365_s1 + $0x1e0] sm:$0xff]  ;;  %v2738_v14 = vld [vmem:[%s5365_s1 + $0x3e8] sm:$0xff] }
  0x89   : > { %3788 = vmatpush3.bf16.msra.mxu0 %v3785_v59  ;;  %3203 = vmatprep.mubr.f32.mxu1 %v4460_v45  ;;  %v702_v59 = vrot.slane %v4362_v38, 2 }
  0x8a   : > { %3427 = vmatprep.mubr.f32.mxu0 %v4708_v58  ;;  %3662 = vmatprep.subr.bf16.mxu1 %v3661_v3  ;;  %v2733_v58 = vld [vmem:[%s5365_s1 + $0x3c0] sm:$0xff] }
  0x8b   : > { %3204 = vmatmul.mubr.f32.gmra.mrb[4].mxu1 %v4468_v51  ;;  %3790 = vmatprep.subr.bf16.mxu0 %v3789_v36 }
  0x8c   : > { %3428 = vmatmul.mubr.f32.gmra.mrb[4].mxu0 %v4740_v21  ;;  %3664 = vmatpush3.bf16.msra.mxu1 %v3661_v3  ;;  %v3797_v21 = vpack.c.bf16 %v2734_v4, %v2733_v58  ;;  %v5379_v3 = vrot.slane %v4349_v27, 2  ;;  %v710_v58 = vrot.slane %v4457_v44, 2  ;;  %v4958_v4 = vld [vmem:[%s4212_s13 + $0xa0] sm:$0xff] }
  0x8d   : > { %3792 = vmatpush3.bf16.msra.mxu0 %v3789_v36  ;;  %3206 = vmatprep.mubr.f32.mxu1 %v4473_v54  ;;  %v3673_v36 = vpack.c.bf16 %v2672_v42, %v2671_v33  ;;  %v2739_v42 = vld [vmem:[%s5365_s1 + $0x3f0] sm:$0xff]  ;;  %v1554_v34 = vrot.slane %v4958_v4, 4 }
  0x8e   : > { %3430 = vmatprep.mubr.f32.mxu0 %v4751_v32  ;;  %3666 = vmatprep.subr.bf16.mxu1 %v3665_v53  ;;  %v704_v32 = vrot.slane %v4382_v49, 2 }
  0x8f   : > { %3207 = vmatmul.mubr.f32.gmra.mrb[6].mxu1 %v4490_v0  ;;  %3794 = vmatprep.subr.bf16.mxu0 %v3793_v29 }
  0x90   : > { %3431 = vmatmul.mubr.f32.gmra.mrb[6].mxu0 %v4769_v61  ;;  %3668 = vmatpush3.bf16.msra.mxu1 %v3665_v53  ;;  %v4930_v61 = vsel %vm680_vm2, %v5379_v3, %v702_v59  ;;  %v4942_v17 = vsel %vm680_vm2, %v702_v59, %v704_v32  ;;  %v708_v53 = vrot.slane %v4432_v25, 2  ;;  %v1552_v59 = vrot.slane %v4607_v48, 4 }
  0x91   : > { %3796 = vmatpush3.bf16.msra.mxu0 %v3793_v29  ;;  %3209 = vmatprep.mubr.f32.mxu1 %v4504_v7  ;;  %v2737_v29 = vld [vmem:[%s5365_s1 + $0x3e0] sm:$0xff] }
  0x92   : > { %3433 = vmatprep.mubr.f32.mxu0 %v4775_v63  ;;  %3670 = vmatprep.subr.bf16.mxu1 %v3669_v55  ;;  %v2674_v63 = vld [vmem:[%s5365_s1 + $0x1e8] sm:$0xff]  ;;  %v4970_v33 = vsel %vm680_vm2, %v706_v1, %v708_v53  ;;  %v1553_v3 = vsel %vm1322_vm3, %v1354_v41, %v1552_v59  ;;  %v1555_v18 = vsel %vm1322_vm3, %v1552_v59, %v1554_v34  ;;  %v1768_v34 = vrot.slane %v4958_v4, 5 }
  0x93   : > { %3210 = vmatmul.mubr.f32.gmra.mrb[8].mxu1 %v4509_v8  ;;  %3798 = vmatprep.subr.bf16.mxu0 %v3797_v21  ;;  %v3677_v6 = vpack.c.bf16 %v2674_v63, %v2673_v37  ;;  %v2744_v63 = vld [vmem:[%s5365_s1 + $0x418] sm:$0xff] }
  0x94   : > { %3434 = vmatmul.mubr.f32.gmra.mrb[8].mxu0 %v4793_v13  ;;  %3672 = vmatpush3.bf16.msra.mxu1 %v3669_v55  ;;  %v4954_v13 = vsel %vm680_vm2, %v704_v32, %v706_v1  ;;  %v3805_v55 = vpack.c.bf16 %v2738_v14, %v2737_v29  ;;  %v2740_v32 = vld [vmem:[%s5365_s1 + $0x3f8] sm:$0xff]  ;;  %v2741_v1 = vld [vmem:[%s5365_s1 + $0x400] sm:$0xff]  ;;  %v2746_v14 = vld [vmem:[%s5365_s1 + $0x428] sm:$0xff] }
  0x95   : > { %3800 = vmatpush3.bf16.msra.mxu0 %v3797_v21  ;;  %3212 = vmatprep.mubr.f32.mxu1 %v4930_v61  ;;  %v2675_v21 = vld [vmem:[%s5365_s1 + $0x1f0] sm:$0xff]  ;;  %v2745_v29 = vld [vmem:[%s5365_s1 + $0x420] sm:$0xff] }
  0x96   : > { %3436 = vmatprep.mubr.f32.mxu0 %v4799_v19  ;;  %3674 = vmatprep.subr.bf16.mxu1 %v3673_v36  ;;  %v2676_v19 = vld [vmem:[%s5365_s1 + $0x1f8] sm:$0xff] }
  0x97   : > { %3213 = vmatmul.mubr.f32.gmra.mrb[10].mxu1 %v4942_v17  ;;  %3802 = vmatprep.subr.bf16.mxu0 %v3801_v52  ;;  %v3681_v35 = vpack.c.bf16 %v2676_v19, %v2675_v21  ;;  %v2753_v21 = vld [vmem:[%s5365_s1 + $0x460] sm:$0xff]  ;;  %v2754_v19 = vld [vmem:[%s5365_s1 + $0x468] sm:$0xff] }
  0x98   : > { %3437 = vmatmul.mubr.f32.gmra.mrb[10].mxu0 %v4817_v5  ;;  %3676 = vmatpush3.bf16.msra.mxu1 %v3673_v36  ;;  %v4982_v5 = vsel %vm680_vm2, %v708_v53, %v710_v58  ;;  %v3809_v36 = vpack.c.bf16 %v2740_v32, %v2739_v42  ;;  %v3837_v42 = vpack.c.bf16 %v2754_v19, %v2753_v21  ;;  %v2755_v32 = vld [vmem:[%s5365_s1 + $0x470] sm:$0xff] }
  0x99   : > { %3804 = vmatpush3.bf16.msra.mxu0 %v3801_v52  ;;  %3215 = vmatprep.mubr.f32.mxu1 %v4954_v13  ;;  %v5380_v52 = vrot.slane %v4465_v50, 2 }
  0x9a   : > { %3439 = vmatprep.mubr.f32.mxu0 %v4823_v26  ;;  %3678 = vmatprep.subr.bf16.mxu1 %v3677_v6  ;;  %v2742_v26 = vld [vmem:[%s5365_s1 + $0x408] sm:$0xff] }
  0x9b   : > { %3216 = vmatmul.mubr.f32.gmra.mrb[12].mxu1 %v4970_v33  ;;  %3806 = vmatprep.subr.bf16.mxu0 %v3805_v55  ;;  %v4998_v37 = vsel %vm680_vm2, %v710_v58, %v5380_v52  ;;  %v3813_v41 = vpack.c.bf16 %v2742_v26, %v2741_v1  ;;  %v1758_v58 = vrot.slane %v4457_v44, 5  ;;  %v1984_v26 = vrot.slane %v4432_v25, 6 }
  0x9c   : > { %3440 = vmatmul.mubr.f32.gmra.mrb[12].mxu0 %v4842_v24  ;;  %3680 = vmatpush3.bf16.msra.mxu1 %v3677_v6  ;;  %v2743_v24 = vld [vmem:[%s5365_s1 + $0x410] sm:$0xff]  ;;  %v1754_v6 = vrot.slane %v4411_v11, 5  ;;  %v1986_v52 = vrot.slane %v4457_v44, 6 }
  0x9d   : > { %3808 = vmatpush3.bf16.msra.mxu0 %v3805_v55  ;;  %3218 = vmatprep.mubr.f32.mxu1 %v4982_v5  ;;  %v3817_v53 = vpack.c.bf16 %v2744_v63, %v2743_v24  ;;  %v2211_v63 = vld [vmem:[%s4151_s30 + $0x18] sm:$0xff] }
  0x9e   : > { %3442 = vmatprep.mubr.f32.mxu0 %v1553_v3  ;;  %3682 = vmatprep.subr.bf16.mxu1 %v3681_v35  ;;  %v1987_v44 = vsel %vm1964_vm5, %v1984_v26, %v1986_v52 }
  0x9f   : > { %3219 = vmatmul.mubr.f32.gmra.mrb[14].mxu1 %v4998_v37  ;;  %3810 = vmatprep.subr.bf16.mxu0 %v3809_v36 }
  0xa0   : > { %3443 = vmatmul.mubr.f32.gmra.mrb[14].mxu0 %v1555_v18  ;;  %3684 = vmatpush3.bf16.msra.mxu1 %v3681_v35  ;;  %v4033_v35 = vld [vmem:[%s4212_s13 + $0x60] sm:$0xff] }
  0xa1   : > { %3812 = vmatpush3.bf16.msra.mxu0 %v3809_v36  ;;  %3253 = vmatprep.mubr.f32.mxu1 %v4449_v39  ;;  %v3821_v39 = vpack.c.bf16 %v2746_v14, %v2745_v29  ;;  %v1980_v3 = vrot.slane %v4033_v35, 6  ;;  %v4034_v36 = vld [vmem:[%s4212_s13 + $0x68] sm:$0xff] }
  0xa2   : > { %3477 = vmatprep.mubr.f32.mxu0 %v4555_v62  ;;  %3814 = vmatprep.subr.bf16.mxu0 %v3813_v41  ;;  %v2747_v62 = vld [vmem:[%s5365_s1 + $0x430] sm:$0xff]  ;;  %v1982_v1 = vrot.slane %v4034_v36, 6  ;;  %v5386_v29 = vld [vmem:[#allocation7_spill] sm:$0xff] }
  0xa3   : > { %3254 = vmatmul.mubr.f32.vlgmr.msra.gmra.mrb[0].mxu1 %v4452_v40  ;;  %3845 = vmatprep.subr.bf16.mxu1 %v3813_v41  ;;  %v1750_v40 = vrot.slane %v4362_v38, 5  ;;  %v2213_v14 = vld [vmem:[%s4151_s30 + $0x28] sm:$0xff] }
  0xa4   : > { %3478 = vmatmul.mubr.f32.vlgmr.msra.gmra.mrb[0].mxu0 %v4558_v2  ;;  %3853 = vmatpush3.bf16.msra.mxu1 %v3813_v41  ;;  %v2748_v2 = vld [vmem:[%s5365_s1 + $0x438] sm:$0xff] }
  0xa5   : > { %3816 = vmatpush3.bf16.msra.mxu0 %v3813_v41  ;;  %3256 = vmatprep.mubr.f32.mxu1 %v4460_v45  ;;  %v1752_v45 = vrot.slane %v4382_v49, 5  ;;  %v3825_v38 = vpack.c.bf16 %v2748_v2, %v2747_v62  ;;  %v2750_v49 = vld [vmem:[%s5365_s1 + $0x448] sm:$0xff]  ;;  %v2222_v2 = vld [vmem:[%s4151_s30 + $0x70] sm:$0xff] }
  0xa6   : > { %3480 = vmatprep.mubr.f32.mxu0 %v4572_v16  ;;  %3818 = vmatprep.subr.bf16.mxu0 %v3817_v53  ;;  %v2209_v41 = vld [vmem:[%s4151_s30 + $0x8] sm:$0xff] }
  0xa7   : > { %3257 = vmatmul.mubr.f32.gmra.mrb[2].mxu1 %v4468_v51  ;;  %3846 = vmatprep.subr.bf16.mxu1 %v3817_v53  ;;  %v5381_v51 = vrot.slane %v4349_v27, 5  ;;  %v2214_v27 = vld [vmem:[%s4151_s30 + $0x30] sm:$0xff]  ;;  %v2221_v62 = vld [vmem:[%s4151_s30 + $0x68] sm:$0xff] }
  0xa8   : > { %3481 = vmatmul.mubr.f32.gmra.mrb[2].mxu0 %v4575_v12  ;;  %3854 = vmatpush3.bf16.msra.mxu1 %v3817_v53  ;;  %v2749_v12 = vld [vmem:[%s5365_s1 + $0x440] sm:$0xff] }
  0xa9   : > { %3820 = vmatpush3.bf16.msra.mxu0 %v3817_v53  ;;  %3259 = vmatprep.mubr.f32.mxu1 %v4473_v54  ;;  %v1751_v16 = vsel %vm1736_vm4, %v5381_v51, %v1750_v40  ;;  %v1753_v54 = vsel %vm1736_vm4, %v1750_v40, %v1752_v45  ;;  %v3829_v11 = vpack.c.bf16 %v2750_v49, %v2749_v12  ;;  %v2212_v53 = vld [vmem:[%s4151_s30 + $0x20] sm:$0xff] }
  0xaa   : > { %3483 = vmatprep.mubr.f32.mxu0 %v4587_v31  ;;  %3822 = vmatprep.subr.bf16.mxu0 %v3821_v39  ;;  %v1755_v31 = vsel %vm1736_vm4, %v1752_v45, %v1754_v6  ;;  %v2220_v40 = vld [vmem:[%s4151_s30 + $0x60] sm:$0xff]  ;;  %v2223_v45 = vld [vmem:[%s4151_s30 + $0x78] sm:$0xff] }
  0xab   : > { %3260 = vmatmul.mubr.f32.gmra.mrb[4].mxu1 %v4490_v0  ;;  %3847 = vmatprep.subr.bf16.mxu1 %v3821_v39  ;;  %v1756_v0 = vrot.slane %v4432_v25, 5  ;;  %v1985_v25 = vsel %vm1964_vm5, %v1982_v1, %v1984_v26 }
  0xac   : > { %3484 = vmatmul.mubr.f32.gmra.mrb[4].mxu0 %v4592_v20  ;;  %3855 = vmatpush3.bf16.msra.mxu1 %v3821_v39  ;;  %v2751_v20 = vld [vmem:[%s5365_s1 + $0x450] sm:$0xff] }
  0xad   : > { %3824 = vmatpush3.bf16.msra.mxu0 %v3821_v39  ;;  %3262 = vmatprep.mubr.f32.mxu1 %v4504_v7  ;;  %v2752_v7 = vld [vmem:[%s5365_s1 + $0x458] sm:$0xff]  ;;  %v1759_v59 = vsel %vm1736_vm4, %v1756_v0, %v1758_v58 }
  0xae   : > { %3486 = vmatprep.mubr.f32.mxu0 %v1751_v16  ;;  %3826 = vmatprep.subr.bf16.mxu0 %v3825_v38  ;;  %v3833_v55 = vpack.c.bf16 %v2752_v7, %v2751_v20  ;;  %v2219_v39 = vld [vmem:[%s4151_s30 + $0x58] sm:$0xff] }
  0xaf   : > { %3263 = vmatmul.mubr.f32.gmra.mrb[6].mxu1 %v4509_v8  ;;  %3848 = vmatprep.subr.bf16.mxu1 %v3825_v38  ;;  %v1757_v8 = vsel %vm1736_vm4, %v1754_v6, %v1756_v0 }
  0xb0   : > { %3487 = vmatmul.mubr.f32.gmra.mrb[6].mxu0 %v1753_v54  ;;  %3856 = vmatpush3.bf16.msra.mxu1 %v3825_v38 }
  0xb1   : > { %3828 = vmatpush3.bf16.msra.mxu0 %v3825_v38  ;;  %3265 = vmatprep.mubr.f32.mxu1 %v4930_v61  ;;  %v5382_v61 = vrot.slane %v4465_v50, 5 }
  0xb2   : > { %3489 = vmatprep.mubr.f32.mxu0 %v1755_v31  ;;  %3830 = vmatprep.subr.bf16.mxu0 %v3829_v11 }
  0xb3   : > { %3266 = vmatmul.mubr.f32.gmra.mrb[8].mxu1 %v4942_v17  ;;  %3849 = vmatprep.subr.bf16.mxu1 %v3829_v11  ;;  %v1761_v17 = vsel %vm1736_vm4, %v1758_v58, %v5382_v61 }
  0xb4   : > { %3490 = vmatmul.mubr.f32.gmra.mrb[8].mxu0 %v1757_v8  ;;  %3857 = vmatpush3.bf16.msra.mxu1 %v3829_v11 }
  0xb5   : > { %3832 = vmatpush3.bf16.msra.mxu0 %v3829_v11  ;;  %3268 = vmatprep.mubr.f32.mxu1 %v4954_v13  ;;  %v2756_v13 = vld [vmem:[%s5365_s1 + $0x478] sm:$0xff] }
  0xb6   : > { %3492 = vmatprep.mubr.f32.mxu0 %v1759_v59  ;;  %3834 = vmatprep.subr.bf16.mxu0 %v3833_v55 }
  0xb7   : > { %3269 = vmatmul.mubr.f32.gmra.mrb[10].mxu1 %v4970_v33  ;;  %3850 = vmatprep.subr.bf16.mxu1 %v3833_v55  ;;  %v3841_v33 = vpack.c.bf16 %v2756_v13, %v2755_v32 }
  0xb8   : > { %3493 = vmatmul.mubr.f32.gmra.mrb[10].mxu0 %v1761_v17  ;;  %3858 = vmatpush3.bf16.msra.mxu1 %v3833_v55 }
  0xb9   : > { %3836 = vmatpush3.bf16.msra.mxu0 %v3833_v55  ;;  %3271 = vmatprep.mubr.f32.mxu1 %v4982_v5 }
  0xba   : > { %3495 = vmatprep.mubr.f32.mxu0 %v4620_v28  ;;  %3838 = vmatprep.subr.bf16.mxu0 %v3837_v42  ;;  %v5383_v28 = vrot.slane %v4607_v48, 5 }
  0xbb   : > { %3272 = vmatmul.mubr.f32.gmra.mrb[12].mxu1 %v4998_v37  ;;  %3851 = vmatprep.subr.bf16.mxu1 %v3837_v42  ;;  %v5384_v37 = vrot.slane %v4465_v50, 6  ;;  %v1996_v50 = vrot.slane %v4958_v4, 6 }
  0xbc   : > { %3496 = vmatmul.mubr.f32.gmra.mrb[12].mxu0 %v4637_v15  ;;  %3859 = vmatpush3.bf16.msra.mxu1 %v3837_v42  ;;  %v1769_v5 = vsel %vm1736_vm4, %v5383_v28, %v1768_v34  ;;  %v1983_v15 = vsel %vm1964_vm5, %v1980_v3, %v1982_v1 }
  0xbd   : > { %3840 = vmatpush3.bf16.msra.mxu0 %v3837_v42  ;;  %3274 = vmatprep.mubr.f32.mxu1 %v4642_v30  ;;  %v2208_v30 = vld [vmem:[%s4151_s30] sm:$0xff]  ;;  %v1989_v18 = vsel %vm1964_vm5, %v1986_v52, %v5384_v37 }
  0xbe   : > { %3498 = vmatprep.mubr.f32.mxu0 %v4647_v22  ;;  %3842 = vmatprep.subr.bf16.mxu0 %v3841_v33  ;;  %v4079_v22 = vmov 0  }
  0xbf   : > { %3275 = vmatmul.mubr.f32.gmra.mrb[14].mxu1 %v4650_v23  ;;  %3852 = vmatprep.subr.bf16.mxu1 %v3841_v33  ;;  %v2210_v23 = vld [vmem:[%s4151_s30 + $0x10] sm:$0xff] }
  0xc0   : > { %3499 = vmatmul.mubr.f32.gmra.mrb[14].mxu0 %v1769_v5  ;;  %3860 = vmatpush3.bf16.msra.mxu1 %v3841_v33 }
  0xc1   : > { %3844 = vmatpush3.bf16.msra.mxu0 %v3841_v33  ;;  %3533 = vmatprep.mubr.f32.mxu0 %v4682_v9  ;;  %v4035_v9 = vld [vmem:[%s4212_s13 + $0x58] sm:$0xff] }
  0xc2   : > { %3545 = vmatprep.mubr.f32.mxu1 %v1983_v15  ;;  %4031 = vset.pattern.permute.xlu0 %v4079_v22  ;;  %v1978_v24 = vrot.slane %v4035_v9, 6 }
  0xc3   : > { %3546 = vmatmul.mubr.f32.vlgmr.msra.gmra.mrb[16].mxu1 %v1985_v25  ;;  %2226 = vperm.xlu0 %4031, %v2208_v30  }
  0xc4   : > { %3534 = vmatmul.mubr.f32.vlgmr.msra.gmra.mrb[0].mxu0 %v4687_v57  ;;  %3548 = vmatprep.mubr.f32.mxu1 %v1987_v44  ;;  %v5385_v57 = vld [vmem:[#allocation8_spill] sm:$0xff] }
  0xc5   : > { %3536 = vmatprep.mubr.f32.mxu0 %v4690_v60  ;;  %4032 = vset.pattern.permute.xlu1 %v4079_v22  ;;  %v1979_v60 = vsel %vm1964_vm5, %v1976_v47, %v1978_v24  ;;  %v1981_v47 = vsel %vm1964_vm5, %v1978_v24, %v1980_v3 }
  0xc6   : > { %2236 = vperm.xlu1 %4032, %v2210_v23  }
  0xc7   : > { %3549 = vmatmul.mubr.f32.gmra.mrb[18].mxu1 %v1989_v18  ;;  %2231 = vperm.xlu0 %4031, %v2209_v41  }
  0xc8   : > { %3537 = vmatmul.mubr.f32.gmra.mrb[2].mxu0 %v4696_v10  ;;  %3551 = vmatprep.mubr.f32.mxu1 %v5385_v57  ;;  %v5387_v10 = vrot.slane %v4607_v48, 6  ;;  %v2217_v48 = vld [vmem:[%s4151_s30 + $0x48] sm:$0xff] }
  0xc9   : > { %3539 = vmatprep.mubr.f32.mxu0 %v5386_v29 }
  0xca   : > { %2241 = vperm.xlu1 %4032, %v2211_v63   ;;  %v1997_v4 = vsel %vm1964_vm5, %v5387_v10, %v1996_v50 }
  0xcb   : > { %3552 = vmatmul.mubr.f32.gmra.mrb[20].mxu1 %v4736_v43  ;;  %2246 = vperm.xlu0 %4031, %v2212_v53   ;;  %v2215_v43 = vld [vmem:[%s4151_s30 + $0x38] sm:$0xff] }
  0xcc   : > { %3540 = vmatmul.mubr.f32.gmra.mrb[4].mxu0 %v4733_v56  ;;  %3554 = vmatprep.mubr.f32.mxu1 %v4746_v46  ;;  %v2216_v56 = vld [vmem:[%s4151_s30 + $0x40] sm:$0xff]  ;;  %v2218_v46 = vld [vmem:[%s4151_s30 + $0x50] sm:$0xff]  ;;  %s5156_s30 = scalar_lea.vmem [#allocation2], %s4146_s26 }
  0xcd   : > { %3542 = vmatprep.mubr.f32.mxu0 %v1979_v60 }
  0xce   : > { %2251 = vperm.xlu1 %4032, %v2213_v14  }
  0xcf   : > { %3555 = vmatmul.mubr.f32.gmra.mrb[22].mxu1 %v1997_v4  ;;  %2256 = vperm.xlu0 %4031, %v2214_v27  }
  0xd0   : > { %3543 = vmatmul.mubr.f32.gmra.mrb[6].mxu0 %v1981_v47 }
  0xd2   : > { %2261 = vperm.xlu1 %4032, %v2215_v43  }
  0xd3   : > { %2266 = vperm.xlu0 %4031, %v2216_v56  }
  0xd6   : > { %2271 = vperm.xlu1 %4032, %v2217_v48  }
  0xd7   : > { %2276 = vperm.xlu0 %4031, %v2218_v46  }
  0xda   : > { %2281 = vperm.xlu1 %4032, %v2219_v39  }
  0xdb   : > { %2286 = vperm.xlu0 %4031, %v2220_v40  }
  0xde   : > { %2291 = vperm.xlu1 %4032, %v2221_v62  }
  0xdf   : > { %2296 = vperm.xlu0 %4031, %v2222_v2  }
  0xe2   : > { %2301 = vperm.xlu1 %4032, %v2223_v45  }
 0x142   : > { %v2227_v55 = vpop.permute.xlu0 %2226 }
 0x145   : > { %v5143_v61 = vpop.permute.xlu1 %2236 }
 0x146   : > { %v2232_v35 = vpop.permute.xlu0 %2231 }
 0x149   : > { %v2242_v26 = vpop.permute.xlu1 %2241 }
 0x14a   : > { %v5149_v44 = vpop.permute.xlu0 %2246 }
 0x14d   : > { %v2252_v41 = vpop.permute.xlu1 %2251 }
 0x14e   : > { %v5172_v4 = vpop.permute.xlu0 %2256 }
 0x151   : > { %v2262_v40 = vpop.permute.xlu1 %2261 }
 0x176   : > { %v3255_v38 = vpop.f32.mrb[0].mxu1 }
 0x177   : > { %v982_v51 = vpop.f32.mrb[1].mxu1 }
 0x17a   : > { %v3258_v16 = vpop.f32.mrb[2].mxu1 }
 0x17b   : > { %v5133_v6 = vpop.f32.mrb[3].mxu1 }
 0x17e   : > { %v5135_v12 = vpop.f32.mrb[4].mxu1 }
 0x17f   : > { %v5137_v49 = vpop.f32.mrb[5].mxu1 }
 0x182   : > { %v5139_v54 = vpop.f32.mrb[6].mxu1 }
 0x183   : > { %v5141_v0 = vpop.f32.mrb[7].mxu1 }
 0x186   : > { %v3267_v11 = vpop.f32.mrb[8].mxu1 }
 0x187   : > { %v3491_v31 = vpop.f32.mrb[8].mxu0  ;;  %v1022_v58 = vpop.f32.mrb[9].mxu1 }
 0x188   : > { %v3869_v20 = vadd.f32 %v3491_v31, %v3267_v11  ;;  %v1892_v7 = vpop.f32.mrb[9].mxu0 }
 0x189   : > { %v3871_v8 = vadd.f32 %v1892_v7, %v1022_v58 }
 0x18a   : > { %v3270_v59 = vpop.f32.mrb[10].mxu1 }
 0x18b   : > { %v3494_v21 = vpop.f32.mrb[10].mxu0  ;;  %v1032_v19 = vpop.f32.mrb[11].mxu1 }
 0x18c   : > { %v3873_v17 = vadd.f32 %v3494_v21, %v3270_v59  ;;  %v1902_v42 = vpop.f32.mrb[11].mxu0 }
 0x18d   : > { %v3875_v32 = vadd.f32 %v1902_v42, %v1032_v19 }
 0x18e   : > { %v3273_v13 = vpop.f32.mrb[12].mxu1 }
 0x18f   : > { %v3497_v34 = vpop.f32.mrb[12].mxu0  ;;  %v1042_v33 = vpop.f32.mrb[13].mxu1 }
 0x190   : > { %v3877_v3 = vadd.f32 %v3497_v34, %v3273_v13  ;;  %v1912_v36 = vpop.f32.mrb[13].mxu0 }
 0x191   : > { %v3879_v1 = vadd.f32 %v1912_v36, %v1042_v33 }
 0x192   : > { %v3276_v28 = vpop.f32.mrb[14].mxu1 }
 0x193   : > { %v3500_v5 = vpop.f32.mrb[14].mxu0  ;;  %v1052_v52 = vpop.f32.mrb[15].mxu1 }
 0x194   : > { %v5145_v15 = vadd.f32 %v3500_v5, %v3276_v28  ;;  %v1922_v25 = vpop.f32.mrb[15].mxu0 }
 0x195   : > { %v5147_v30 = vadd.f32 %v1922_v25, %v1052_v52 }
 0x196   : > { %v3547_v22 = vpop.f32.mrb[16].mxu1 }
 0x197   : > { %v3535_v23 = vpop.f32.mrb[0].mxu0  ;;  %v5151_v37 = vadd.f32 %v3869_v20, %v3547_v22  ;;  %v2120_v18 = vpop.f32.mrb[17].mxu1 }
 0x198   : > { %v3861_v9 = vadd.f32 %v3535_v23, %v3255_v38  ;;  %v2080_v24 = vpop.f32.mrb[1].mxu0  ;;  %v5153_v63 = vadd.f32 %v3871_v8, %v2120_v18 }
 0x199   : > { %2185 = vst [vmem:[%s5156_s30 + $0x48] sm:$0xff] %v5151_v37  ;;  %2201 = vst [vmem:[%s4156_s8 + $0x48] sm:$0xff] %v5151_v37  ;;  %v3862_v57 = vadd.f32 %v2080_v24, %v982_v51 }
 0x19a   : > { %2177 = vst [vmem:[%s5156_s30 + $0x8] sm:$0xff] %v3861_v9  ;;  %2193 = vst [vmem:[%s4156_s8 + $0x8] sm:$0xff] %v3861_v9  ;;  %v2305_v50 = vmul.f32 %v3861_v9, %v2232_v35  ;;  %v3550_v53 = vpop.f32.mrb[18].mxu1 }
 0x19b   : > { %2184 = vst [vmem:[%s5156_s30 + $0x40] sm:$0xff] %v5153_v63  ;;  %2200 = vst [vmem:[%s4156_s8 + $0x40] sm:$0xff] %v5153_v63  ;;  %v2304_v29 = vmul.f32 %v3862_v57, %v2227_v55  ;;  %v3538_v60 = vpop.f32.mrb[2].mxu0  ;;  %v5170_v14 = vadd.f32 %v3873_v17, %v3550_v53  ;;  %v2130_v10 = vpop.f32.mrb[19].mxu1 }
 0x19c   : > { %2176 = vst [vmem:[%s5156_s30] sm:$0xff] %v3862_v57  ;;  %2192 = vst [vmem:[%s4156_s8] sm:$0xff] %v3862_v57  ;;  %v2346_v27 = vmul.f32 %v3861_v9, %v2305_v50  ;;  %v3863_v47 = vadd.f32 %v3538_v60, %v3258_v16  ;;  %v2090_v43 = vpop.f32.mrb[3].mxu0  ;;  %v5174_v56 = vadd.f32 %v3875_v32, %v2130_v10  ;;  %v2267_v55 = vpop.permute.xlu0 %2266 }
 0x19d   : > { %v2321_v48 = vadd.f32 %v2305_v50, %v2304_v29  ;;  %v2345_v46 = vmul.f32 %v3862_v57, %v2304_v29  ;;  %2187 = vst [vmem:[%s5156_s30 + $0x58] sm:$0xff] %v5170_v14  ;;  %2203 = vst [vmem:[%s4156_s8 + $0x58] sm:$0xff] %v5170_v14  ;;  %v3864_v39 = vadd.f32 %v2090_v43, %v5133_v6  ;;  %v2272_v32 = vpop.permute.xlu1 %2271 }
 0x19e   : > { %2179 = vst [vmem:[%s5156_s30 + $0x18] sm:$0xff] %v3863_v47  ;;  %2195 = vst [vmem:[%s4156_s8 + $0x18] sm:$0xff] %v3863_v47  ;;  %v3553_v62 = vpop.f32.mrb[20].mxu1  ;;  %v2307_v45 = vmul.f32 %v3863_v47, %v2242_v26 }
 0x19f   : > { %2186 = vst [vmem:[%s5156_s30 + $0x50] sm:$0xff] %v5174_v56  ;;  %2202 = vst [vmem:[%s4156_s8 + $0x50] sm:$0xff] %v5174_v56  ;;  %v2361_v2 = vadd.f32 %v2346_v27, %v2345_v46  ;;  %v2306_v38 = vmul.f32 %v3864_v39, %v5143_v61  ;;  %v3541_v51 = vpop.f32.mrb[4].mxu0  ;;  %v5190_v16 = vadd.f32 %v3877_v3, %v3553_v62  ;;  %v2140_v6 = vpop.f32.mrb[21].mxu1 }
 0x1a0   : > { %2178 = vst [vmem:[%s5156_s30 + $0x10] sm:$0xff] %v3864_v39  ;;  %2194 = vst [vmem:[%s4156_s8 + $0x10] sm:$0xff] %v3864_v39  ;;  %v3865_v11 = vadd.f32 %v3541_v51, %v5135_v12  ;;  %v2100_v31 = vpop.f32.mrb[5].mxu0  ;;  %v5193_v58 = vadd.f32 %v3879_v1, %v2140_v6  ;;  %v2348_v21 = vmul.f32 %v3863_v47, %v2307_v45  ;;  %v2277_v25 = vpop.permute.xlu0 %2276 }
 0x1a1   : > { %v2322_v20 = vadd.f32 %v2321_v48, %v2306_v38  ;;  %v2347_v7 = vmul.f32 %v3864_v39, %v2306_v38  ;;  %2189 = vst [vmem:[%s5156_s30 + $0x68] sm:$0xff] %v5190_v16  ;;  %2205 = vst [vmem:[%s4156_s8 + $0x68] sm:$0xff] %v5190_v16  ;;  %v3866_v8 = vadd.f32 %v2100_v31, %v5137_v49  ;;  %v2282_v18 = vpop.permute.xlu1 %2281 }
 0x1a2   : > { %2181 = vst [vmem:[%s5156_s30 + $0x28] sm:$0xff] %v3865_v11  ;;  %2197 = vst [vmem:[%s4156_s8 + $0x28] sm:$0xff] %v3865_v11  ;;  %v2309_v59 = vmul.f32 %v3865_v11, %v2252_v41  ;;  %v3556_v12 = vpop.f32.mrb[22].mxu1  ;;  %v2313_v41 = vmul.f32 %v5151_v37, %v2272_v32  ;;  %v2314_v50 = vmul.f32 %v5174_v56, %v2277_v25 }
 0x1a3   : > { %2188 = vst [vmem:[%s5156_s30 + $0x60] sm:$0xff] %v5193_v58  ;;  %2204 = vst [vmem:[%s4156_s8 + $0x60] sm:$0xff] %v5193_v58  ;;  %v2362_v19 = vadd.f32 %v2361_v2, %v2347_v7  ;;  %v2308_v61 = vmul.f32 %v3866_v8, %v5149_v44  ;;  %v2323_v49 = vadd.f32 %v2322_v20, %v2307_v45  ;;  %v3544_v17 = vpop.f32.mrb[6].mxu0  ;;  %v2150_v42 = vpop.f32.mrb[23].mxu1 }
 0x1a4   : > { %2180 = vst [vmem:[%s5156_s30 + $0x20] sm:$0xff] %v3866_v8  ;;  %2196 = vst [vmem:[%s4156_s8 + $0x20] sm:$0xff] %v3866_v8  ;;  %v3867_v13 = vadd.f32 %v3544_v17, %v5139_v54  ;;  %v3882_v34 = vadd.f32 %v5145_v15, %v3556_v12  ;;  %v2110_v33 = vpop.f32.mrb[7].mxu0  ;;  %v2350_v26 = vmul.f32 %v3865_v11, %v2309_v59  ;;  %v2287_v60 = vpop.permute.xlu0 %2286 }
 0x1a5   : > { %v2324_v35 = vadd.f32 %v2323_v49, %v2308_v61  ;;  %v2349_v3 = vmul.f32 %v3866_v8, %v2308_v61  ;;  %v2363_v36 = vadd.f32 %v2362_v19, %v2348_v21  ;;  %v3868_v1 = vadd.f32 %v2110_v33, %v5141_v0  ;;  %v2292_v43 = vpop.permute.xlu1 %2291 }
 0x1a6   : > { %2183 = vst [vmem:[%s5156_s30 + $0x38] sm:$0xff] %v3867_v13  ;;  %2199 = vst [vmem:[%s4156_s8 + $0x38] sm:$0xff] %v3867_v13  ;;  %v3884_v28 = vadd.f32 %v5147_v30, %v2150_v42  ;;  %v2311_v54 = vmul.f32 %v3867_v13, %v2262_v40  ;;  %v2312_v44 = vmul.f32 %v5153_v63, %v2267_v55 }
 0x1a7   : > { %2191 = vst [vmem:[%s5156_s30 + $0x78] sm:$0xff] %v3882_v34  ;;  %2207 = vst [vmem:[%s4156_s8 + $0x78] sm:$0xff] %v3882_v34  ;;  %v2364_v5 = vadd.f32 %v2363_v36, %v2349_v3  ;;  %v2310_v52 = vmul.f32 %v3868_v1, %v5172_v4  ;;  %v2325_v15 = vadd.f32 %v2324_v35, %v2309_v59 }
 0x1a8   : > { %2182 = vst [vmem:[%s5156_s30 + $0x30] sm:$0xff] %v3868_v1  ;;  %2198 = vst [vmem:[%s4156_s8 + $0x30] sm:$0xff] %v3868_v1  ;;  %v2352_v9 = vmul.f32 %v3867_v13, %v2311_v54  ;;  %v2353_v57 = vmul.f32 %v5153_v63, %v2312_v44  ;;  %v2354_v10 = vmul.f32 %v5151_v37, %v2313_v41  ;;  %v2297_v38 = vpop.permute.xlu0 %2296 }
 0x1a9   : > { %2190 = vst [vmem:[%s5156_s30 + $0x70] sm:$0xff] %v3884_v28  ;;  %2206 = vst [vmem:[%s4156_s8 + $0x70] sm:$0xff] %v3884_v28  ;;  %v2326_v0 = vadd.f32 %v2325_v15, %v2310_v52  ;;  %v2351_v22 = vmul.f32 %v3868_v1, %v2310_v52  ;;  %v2365_v23 = vadd.f32 %v2364_v5, %v2350_v26  ;;  %v2302_v31 = vpop.permute.xlu1 %2301  ;;  %v2344_v26 = vld [vmem:[#allocation4] sm:$0x1] }
 0x1aa   : > { %v2315_v4 = vmul.f32 %v5170_v14, %v2282_v18  ;;  %v2355_v48 = vmul.f32 %v5174_v56, %v2314_v50  ;;  %v2316_v46 = vmul.f32 %v5193_v58, %v2287_v60  ;;  %v2317_v62 = vmul.f32 %v5190_v16, %v2292_v43 }
 0x1ab   : > { %v2327_v30 = vadd.f32 %v2326_v0, %v2311_v54  ;;  %v2366_v24 = vadd.f32 %v2365_v23, %v2351_v22  ;;  %v2318_v51 = vmul.f32 %v3884_v28, %v2297_v38  ;;  %v2319_v56 = vmul.f32 %v3882_v34, %v2302_v31 }
 0x1ac   : > { %v2356_v63 = vmul.f32 %v5170_v14, %v2315_v4  ;;  %v2357_v37 = vmul.f32 %v5193_v58, %v2316_v46  ;;  %v2358_v20 = vmul.f32 %v5190_v16, %v2317_v62  ;;  %v2320_v16 = vld [vmem:[#allocation3] sm:$0x1] }
 0x1ad   : > { %v2328_v53 = vadd.f32 %v2327_v30, %v2312_v44  ;;  %v2367_v29 = vadd.f32 %v2366_v24, %v2352_v9  ;;  %v2359_v59 = vmul.f32 %v3884_v28, %v2318_v51  ;;  %v2360_v14 = vmul.f32 %v3882_v34, %v2319_v56 }
 0x1af   : > { %v2329_v27 = vadd.f32 %v2328_v53, %v2313_v41  ;;  %v2368_v47 = vadd.f32 %v2367_v29, %v2353_v57 }
 0x1b1   : > { %v2369_v39 = vadd.f32 %v2368_v47, %v2354_v10  ;;  %v2330_v40 = vadd.f32 %v2329_v27, %v2314_v50 }
 0x1b3   : > { %v2331_v2 = vadd.f32 %v2330_v40, %v2315_v4  ;;  %v2370_v45 = vadd.f32 %v2369_v39, %v2355_v48 }
 0x1b5   : > { %v2332_v6 = vadd.f32 %v2331_v2, %v2316_v46  ;;  %v2371_v11 = vadd.f32 %v2370_v45, %v2356_v63 }
 0x1b7   : > { %v2333_v7 = vadd.f32 %v2332_v6, %v2317_v62  ;;  %v2372_v8 = vadd.f32 %v2371_v11, %v2357_v37 }
 0x1b9   : > { %v2334_v55 = vadd.f32 %v2333_v7, %v2318_v51  ;;  %v2373_v12 = vadd.f32 %v2372_v8, %v2358_v20 }
 0x1bb   : > { %v2335_v21 = vadd.f32 %v2334_v55, %v2319_v56  ;;  %v2374_v19 = vadd.f32 %v2373_v12, %v2359_v59 }
 0x1bd   : > { %v2336_v61 = vrot.slane %v2335_v21, 4  ;;  %v2375_v49 = vadd.f32 %v2374_v19, %v2360_v14 }
 0x1bf   : > { %v2337_v17 = vadd.f32 %v2336_v61, %v2335_v21  ;;  %v2376_v42 = vrot.slane %v2375_v49, 4 }
 0x1c1   : > { %v2338_v58 = vrot.slane %v2337_v17, 2  ;;  %v2377_v32 = vadd.f32 %v2376_v42, %v2375_v49 }
 0x1c3   : > { %v2339_v13 = vadd.f32 %v2338_v58, %v2337_v17  ;;  %v2378_v33 = vrot.slane %v2377_v32, 2 }
 0x1c5   : > { %v2340_v35 = vrot.slane %v2339_v13, 1  ;;  %v2379_v3 = vadd.f32 %v2378_v33, %v2377_v32 }
 0x1c7   : > { %v2341_v36 = vadd.f32 %v2340_v35, %v2339_v13  ;;  %v2380_v1 = vrot.slane %v2379_v3, 1  ;;  %2387 = sbr.rel (%p2757_p8) target bundleno = 487 (0x1e7), region = 52 }
 0x1c9   : > { %v2342_v5 = vadd.f32 %v2341_v36, %v2320_v16  ;;  %v2381_v28 = vadd.f32 %v2380_v1, %v2379_v3 }
 0x1cb   : > { %2343 = vst [vmem:[#allocation3] sm:$0x1] %v2342_v5  ;;  %v2382_v34 = vadd.f32 %v2381_v28, %v2344_v26 }
 0x1cd   : > { %2383 = vst [vmem:[#allocation4] sm:$0x1] %v2382_v34 }
 0x1d2   : > { %v2388_v54 = vld [vmem:[#allocation3] sm:$0x1] }
 0x1d3   : > { %v2389_v15 = vmul.f32 0.001953125, %v2388_v54 }
 0x1d4   : > { %v2390_v52 = vld [vmem:[#allocation4] sm:$0x1] }
 0x1d5   : > { %v2391_v25 = vmul.f32 0.001953125, %v2390_v52  ;;  %v2392_v44 = vmul.f32 %v2389_v15, %v2389_v15  ;;  %2394 = vst [vmem:[#allocation5] sm:$0x1] %v2389_v15 }
 0x1d7   : > { %v2393_v0 = vsub.f32 %v2391_v25, %v2392_v44 }
 0x1d9   : > { %v2395_v22 = vadd.f32 1e-05, %v2393_v0 }
 0x1db   : > { %4036 = vrsqrt.f32 %v2395_v22 }
 0x1e5   : > { %v4037_v23 = vpop.eup %4036 }
 0x1e6   : > { %2397 = vst [vmem:[#allocation6] sm:$0x1] %v4037_v23 }
 0x1e7 PF: > { %p2758_p9 = scmp.ne.s32.totalorder %s4064_s19, 1 }
 0x1e8   : > { %v5236_v18 = vld [vmem:[#allocation5] ss:$0 sm:$0xff] (!%p2758_p9)  ;;  %s5239_s18 = scalar_lea.vmem (!%p2758_p9), [#allocation2], %s4146_s26  ;;  %v5247_v30 = vld [vmem:[%s5366_s2] ss:$0 sm:$0xff] (!%p2758_p9) }
 0x1e9   : > { %2401 = sbr.rel (%p2758_p9) target bundleno = 516 (0x204), region = 56  ;;  %v2403_v41 = vld [vmem:[%s5239_s18] sm:$0xff] (!%p2758_p9)  ;;  %v2404_v57 = vld [vmem:[%s5239_s18 + $0x8] sm:$0xff] (!%p2758_p9)  ;;  %v2405_v50 = vld [vmem:[%s5239_s18 + $0x10] sm:$0xff] (!%p2758_p9) }
 0x1ea   : > { %v2426_v24 = vsub.f32 (!%p2758_p9), %v2403_v41, %v5236_v18  ;;  %v2406_v53 = vld [vmem:[%s5239_s18 + $0x18] sm:$0xff] (!%p2758_p9)  ;;  %v2427_v29 = vsub.f32 (!%p2758_p9), %v2404_v57, %v5236_v18  ;;  %v2428_v60 = vsub.f32 (!%p2758_p9), %v2405_v50, %v5236_v18  ;;  %v2407_v4 = vld [vmem:[%s5239_s18 + $0x20] sm:$0xff] (!%p2758_p9)  ;;  %v2408_v27 = vld [vmem:[%s5239_s18 + $0x28] sm:$0xff] (!%p2758_p9) }
 0x1eb   : > { %v2429_v10 = vsub.f32 (!%p2758_p9), %v2406_v53, %v5236_v18  ;;  %v2409_v47 = vld [vmem:[%s5239_s18 + $0x30] sm:$0xff] (!%p2758_p9)  ;;  %v2430_v48 = vsub.f32 (!%p2758_p9), %v2407_v4, %v5236_v18  ;;  %v2431_v46 = vsub.f32 (!%p2758_p9), %v2408_v27, %v5236_v18  ;;  %v2410_v40 = vld [vmem:[%s5239_s18 + $0x38] sm:$0xff] (!%p2758_p9)  ;;  %v5267_v63 = vld [vmem:[%s5367_s3] ss:$0 sm:$0xff] (!%p2758_p9) }
 0x1ec   : > { %v2432_v39 = vsub.f32 (!%p2758_p9), %v2409_v47, %v5236_v18  ;;  %v2433_v38 = vsub.f32 (!%p2758_p9), %v2410_v40, %v5236_v18  ;;  %v2411_v49 = vld [vmem:[%s5239_s18 + $0x40] sm:$0xff] (!%p2758_p9)  ;;  %v2412_v13 = vld [vmem:[%s5239_s18 + $0x48] sm:$0xff] (!%p2758_p9)  ;;  %v2413_v33 = vld [vmem:[%s5239_s18 + $0x50] sm:$0xff] (!%p2758_p9) }
 0x1ed   : > { %v5242_v9 = vld [vmem:[#allocation6] ss:$0 sm:$0xff] (!%p2758_p9)  ;;  %v2414_v35 = vld [vmem:[%s5239_s18 + $0x58] sm:$0xff] (!%p2758_p9)  ;;  %v2416_v5 = vld [vmem:[%s5239_s18 + $0x68] sm:$0xff] (!%p2758_p9)  ;;  %v2434_v15 = vsub.f32 (!%p2758_p9), %v2411_v49, %v5236_v18  ;;  %v2435_v0 = vsub.f32 (!%p2758_p9), %v2412_v13, %v5236_v18  ;;  %v2436_v22 = vsub.f32 (!%p2758_p9), %v2413_v33, %v5236_v18 }
 0x1ee   : > { %v2449_v43 = vmul.f32 (!%p2758_p9), %v5242_v9, %v2426_v24  ;;  %v2450_v62 = vmul.f32 (!%p2758_p9), %v5242_v9, %v2427_v29  ;;  %v2451_v2 = vmul.f32 (!%p2758_p9), %v5242_v9, %v2428_v60  ;;  %v2452_v45 = vmul.f32 (!%p2758_p9), %v5242_v9, %v2429_v10  ;;  %v2415_v26 = vld [vmem:[%s5239_s18 + $0x60] sm:$0xff] (!%p2758_p9)  ;;  %v2417_v28 = vld [vmem:[%s5239_s18 + $0x70] sm:$0xff] (!%p2758_p9)  ;;  %v2418_v25 = vld [vmem:[%s5239_s18 + $0x78] sm:$0xff] (!%p2758_p9) }
 0x1ef   : > { %v2453_v51 = vmul.f32 (!%p2758_p9), %v5242_v9, %v2430_v48  ;;  %v2454_v6 = vmul.f32 (!%p2758_p9), %v5242_v9, %v2431_v46  ;;  %v2455_v11 = vmul.f32 (!%p2758_p9), %v5242_v9, %v2432_v39  ;;  %v2456_v7 = vmul.f32 (!%p2758_p9), %v5242_v9, %v2433_v38 }
 0x1f0   : > { %v2472_v37 = vmul.f32 %v5247_v30, %v2449_v43  ;;  %v2473_v31 = vmul.f32 %v5247_v30, %v2450_v62  ;;  %v2474_v20 = vmul.f32 %v5247_v30, %v2451_v2  ;;  %v2475_v56 = vmul.f32 %v5247_v30, %v2452_v45 }
 0x1f1   : > { %v2476_v55 = vmul.f32 %v5247_v30, %v2453_v51  ;;  %v2477_v59 = vmul.f32 %v5247_v30, %v2454_v6  ;;  %v2478_v12 = vmul.f32 %v5247_v30, %v2455_v11  ;;  %v2479_v61 = vmul.f32 %v5247_v30, %v2456_v7 }
 0x1f2   : > { %v2495_v8 = vadd.f32 %v5267_v63, %v2472_v37  ;;  %v2496_v14 = vadd.f32 %v5267_v63, %v2473_v31  ;;  %v2497_v21 = vadd.f32 %v5267_v63, %v2474_v20  ;;  %v2498_v19 = vadd.f32 %v5267_v63, %v2475_v56 }
 0x1f3   : > { %v2499_v42 = vadd.f32 %v5267_v63, %v2476_v55  ;;  %v2500_v58 = vadd.f32 %v5267_v63, %v2477_v59  ;;  %v2501_v32 = vadd.f32 %v5267_v63, %v2478_v12  ;;  %v2502_v1 = vadd.f32 %v5267_v63, %v2479_v61 }
 0x1f4   : > { %v2511_v17 = vmax.f32 %v2495_v8, 0.0  ;;  %v2512_v3 = vmax.f32 %v2496_v14, 0.0  ;;  %v2513_v16 = vmax.f32 %v2497_v21, 0.0  ;;  %v2514_v36 = vmax.f32 %v2498_v19, 0.0 }
 0x1f5   : > { %v2515_v34 = vmax.f32 %v2499_v42, 0.0  ;;  %v2516_v54 = vmax.f32 %v2500_v58, 0.0  ;;  %v2517_v52 = vmax.f32 %v2501_v32, 0.0  ;;  %v2518_v44 = vmax.f32 %v2502_v1, 0.0 }
 0x1f6   : > { %2527 = vst [vmem:[%s4156_s8] sm:$0xff] %v2511_v17  ;;  %2528 = vst [vmem:[%s4156_s8 + $0x8] sm:$0xff] %v2512_v3  ;;  %v2437_v23 = vsub.f32 %v2414_v35, %v5236_v18  ;;  %v2457_v41 = vmul.f32 %v5242_v9, %v2434_v15  ;;  %v2438_v24 = vsub.f32 %v2415_v26, %v5236_v18 }
 0x1f7   : > { %2529 = vst [vmem:[%s4156_s8 + $0x10] sm:$0xff] %v2513_v16  ;;  %2530 = vst [vmem:[%s4156_s8 + $0x18] sm:$0xff] %v2514_v36  ;;  %v2439_v57 = vsub.f32 %v2416_v5, %v5236_v18  ;;  %v2440_v50 = vsub.f32 %v2417_v28, %v5236_v18  ;;  %v2458_v53 = vmul.f32 %v5242_v9, %v2435_v0 }
 0x1f8   : > { %2531 = vst [vmem:[%s4156_s8 + $0x20] sm:$0xff] %v2515_v34  ;;  %2532 = vst [vmem:[%s4156_s8 + $0x28] sm:$0xff] %v2516_v54  ;;  %v2459_v29 = vmul.f32 %v5242_v9, %v2436_v22  ;;  %v2460_v60 = vmul.f32 %v5242_v9, %v2437_v23  ;;  %v2441_v10 = vsub.f32 %v2418_v25, %v5236_v18 }
 0x1f9   : > { %2533 = vst [vmem:[%s4156_s8 + $0x30] sm:$0xff] %v2517_v52  ;;  %2534 = vst [vmem:[%s4156_s8 + $0x38] sm:$0xff] %v2518_v44  ;;  %v2480_v4 = vmul.f32 %v5247_v30, %v2457_v41  ;;  %v2461_v27 = vmul.f32 %v5242_v9, %v2438_v24  ;;  %v2462_v47 = vmul.f32 %v5242_v9, %v2439_v57 }
 0x1fa   : > { %v2463_v43 = vmul.f32 %v5242_v9, %v2440_v50  ;;  %v2481_v48 = vmul.f32 %v5247_v30, %v2458_v53  ;;  %v2482_v46 = vmul.f32 %v5247_v30, %v2459_v29  ;;  %v2483_v39 = vmul.f32 %v5247_v30, %v2460_v60 }
 0x1fb   : > { %v2464_v40 = vmul.f32 %v5242_v9, %v2441_v10  ;;  %v2503_v62 = vadd.f32 %v5267_v63, %v2480_v4  ;;  %v2484_v18 = vmul.f32 %v5247_v30, %v2461_v27  ;;  %v2485_v2 = vmul.f32 %v5247_v30, %v2462_v47 }
 0x1fc   : > { %v2486_v45 = vmul.f32 %v5247_v30, %v2463_v43  ;;  %v2504_v38 = vadd.f32 %v5267_v63, %v2481_v48  ;;  %v2505_v37 = vadd.f32 %v5267_v63, %v2482_v46  ;;  %v2506_v51 = vadd.f32 %v5267_v63, %v2483_v39 }
 0x1fd   : > { %v2487_v9 = vmul.f32 %v5247_v30, %v2464_v40  ;;  %v2519_v6 = vmax.f32 %v2503_v62, 0.0  ;;  %v2507_v11 = vadd.f32 %v5267_v63, %v2484_v18  ;;  %v2508_v31 = vadd.f32 %v5267_v63, %v2485_v2 }
 0x1fe   : > { %v2509_v20 = vadd.f32 %v5267_v63, %v2486_v45  ;;  %v2520_v56 = vmax.f32 %v2504_v38, 0.0  ;;  %v2521_v7 = vmax.f32 %v2505_v37, 0.0  ;;  %v2522_v8 = vmax.f32 %v2506_v51, 0.0 }
 0x1ff   : > { %v2510_v55 = vadd.f32 %v5267_v63, %v2487_v9  ;;  %2535 = vst [vmem:[%s4156_s8 + $0x40] sm:$0xff] %v2519_v6  ;;  %v2523_v59 = vmax.f32 %v2507_v11, 0.0  ;;  %v2524_v12 = vmax.f32 %v2508_v31, 0.0 }
 0x200   : > { %v2525_v30 = vmax.f32 %v2509_v20, 0.0  ;;  %2536 = vst [vmem:[%s4156_s8 + $0x48] sm:$0xff] %v2520_v56  ;;  %2537 = vst [vmem:[%s4156_s8 + $0x50] sm:$0xff] %v2521_v7 }
 0x201   : > { %2538 = vst [vmem:[%s4156_s8 + $0x58] sm:$0xff] %v2522_v8  ;;  %v2526_v14 = vmax.f32 %v2510_v55, 0.0  ;;  %2539 = vst [vmem:[%s4156_s8 + $0x60] sm:$0xff] %v2523_v59 }
 0x202   : > { %2540 = vst [vmem:[%s4156_s8 + $0x68] sm:$0xff] %v2524_v12  ;;  %2541 = vst [vmem:[%s4156_s8 + $0x70] sm:$0xff] %v2525_v30 }
 0x203   : > { %2542 = vst [vmem:[%s4156_s8 + $0x78] sm:$0xff] %v2526_v14 }
 0x204 PF: > { %s15_s22 = sadd.s32 1, %s4076_s22   ;;  %s5388_s18 = smov %s4068_s20 }
 0x205   : > { %p12_p10 = scmp.ge.s32.totalorder %s15_s22, 14   ;;  %s5389_s19 = smov %s4072_s21 }
 0x206   : > { %s5390_s20 = smov %s5393_s23  ;;  %s5391_s21 = smov %s5397_s24 }
 0x207   :  { %14 = sbr.rel (!%p12_p10) target bundleno = 3 (0x3), region = 97 }

// kernel: basic_block_forward.3
= control target key start
LH: loop header
LB: loop body
LE: loop exit
PB: predicated region body
PF: predicated region fallthrough
CT: control target
= control target key end

     0   :  { %s4210_s21 = smov 0   ;;  %s4212_s22 = smov 0   ;;  %s5485_s0 = inlined_call_operand.vmem [shape: f32[808,128], index: 0, kind: input, shape index: {}]   ;;  %s5486_s1 = inlined_call_operand.vmem [shape: f32[9,128,128], index: 1, kind: input, shape index: {}]   ;;  %s5487_s2 = inlined_call_operand.vmem [shape: f32[1,128], index: 2, kind: input, shape index: {}]   ;;  %s5488_s3 = inlined_call_operand.vmem [shape: f32[1,128], index: 3, kind: input, shape index: {}]   ;;  %s5489_s4 = inlined_call_operand.vmem [shape: f32[768,1], index: 4, kind: input, shape index: {}]   ;;  %s5490_s5 = inlined_call_operand.vmem [shape: f32[768,128], index: 5, kind: input, shape index: {}]   ;;  %s5491_s6 = inlined_call_operand.vmem [shape: f32[768,128], index: 6, kind: output, shape index: {}]  }
   0x1   :  { %s4214_s23 = smov 0   ;;  %s4216_s24 = smov 0  }
   0x2   :  { %s4218_s25 = smov 0  }
   0x3 LB: > { %s25_s26 = sadd.s32 1, %s4163_s23  ;;  %s28_s27 = sadd.s32 1, %s4167_s24  ;;  %s4171_s25 = sphi %s4218_s25, %s16_s25   ;;  %s4167_s24 = sphi %s4216_s24, %s5513_s24   ;;  %s4163_s23 = sphi %s4214_s23, %s5512_s23   ;;  %s4159_s22 = sphi %s4212_s22, %s5511_s22   ;;  %s4155_s21 = sphi %s4210_s21, %s5510_s21  }
   0x4   : > { %p26_p0 = scmp.ge.s32.totalorder %s25_s26, 6  ;;  %p2714_p1 = scmp.ge.s32.totalorder %s4171_s25, 1 }
   0x5   : > { %p236_p2 = scmp.lt.s32.totalorder %s4171_s25, 13 }
   0x6   : > { %s5515_s26 = smov (%p26_p0, %s25_s26), 0  ;;  %s5517_s27 = smov (!%p26_p0, %s28_s27), %s4167_s24 }
   0x7   : > { %p237_p3 = pnand %p2714_p1, %p236_p2  ;;  %p30_p4 = scmp.ge.s32.totalorder %s5517_s27, 2 }
   0x8   : > { %s2715_s28 = sshll.u32 (!%p237_p3), %s4155_s21, 4  ;;  %s4246_s29 = sshll.u32 (!%p237_p3), %s4155_s21, 7 }
   0x9   : > { %s5519_s27 = smov (%p30_p4, %s5517_s27), 0  ;;  %240 = sbr.rel (%p237_p3) target bundleno = 521 (0x209), region = 44 }
   0xa   : > { %p272_p5 = scmp.lt.s32.totalorder (!%p237_p3), %s2715_s28, 95  ;;  %p2722_p6 = scmp.ne.s32.totalorder (!%p237_p3), %s4159_s22, 0 }
  0x10   : > { %s5521_s28 = smov (!%p272_p5, %s2715_s28), 95  ;;  %293 = sbr.rel (%p2722_p6) target bundleno = 487 (0x1e7), region = 48 }
  0x11   : > { %s2716_s30 = sshll.u32 %s5521_s28, 3 }
  0x12   : > { %s4251_s9 = scalar_lea.vmem %s5489_s4, %s2716_s30  ;;  %s4256_s12 = scalar_lea.vmem %s5490_s5, %s2716_s30 }
  0x13   : > { %s4261_s15 = scalar_lea.vmem %s5491_s6, %s2716_s30 }
  0x17   : > { %p2723_p7 = scmp.ne.s32.totalorder %s4155_s21, 0 }
  0x18   : > { %v4173_v0 = vmov (!%p2723_p7), 0.0  }
  0x19   : > { %297 = sbr.rel (%p2723_p7) target bundleno = 32 (0x20), region = 52  ;;  %298 = vst [vmem:[#allocation3] sm:$0x1] (!%p2723_p7), %v4173_v0  ;;  %299 = vst [vmem:[#allocation4] sm:$0x1] (!%p2723_p7), %v4173_v0 }
  0x20 PF: > { %v2724_v1 = vld [vmem:[%s5486_s1 + $0x80] sm:$0xff]  ;;  %v2725_v2 = vld [vmem:[%s5486_s1 + $0x88] sm:$0xff]  ;;  %v2726_v6 = vld [vmem:[%s5486_s1 + $0x90] sm:$0xff]  ;;  %s4317_s8 = scalar_lea.vmem %s5485_s0, %s4246_s29  ;;  %vm372_vm0 = vcmask 1046528   ;;  %vm1143_vm1 = vcmask 1044480   ;;  %vm729_vm2 = vcmask 1045504  }
  0x21   : > { %v2772_v3 = vld [vmem:[%s5486_s1 + $0x200] sm:$0xff]  ;;  %v3652_v4 = vpack.c.bf16 %v2725_v2, %v2724_v1  ;;  %v2773_v5 = vld [vmem:[%s5486_s1 + $0x208] sm:$0xff]  ;;  %v2727_v7 = vld [vmem:[%s5486_s1 + $0x98] sm:$0xff]  ;;  %vm1371_vm3 = vcmask 1043456   ;;  %vm1785_vm4 = vcmask 1042432   ;;  %vm2013_vm5 = vcmask 1041408  }
  0x22   : > { %v3780_v8 = vpack.c.bf16 %v2773_v5, %v2772_v3  ;;  %v3656_v9 = vpack.c.bf16 %v2727_v7, %v2726_v6  ;;  %v2774_v10 = vld [vmem:[%s5486_s1 + $0x210] sm:$0xff]  ;;  %v2775_v11 = vld [vmem:[%s5486_s1 + $0x218] sm:$0xff]  ;;  %v2728_v12 = vld [vmem:[%s5486_s1 + $0xa0] sm:$0xff]  ;;  %p2852_p8 = scmp.ne.s32.totalorder %s4155_s21, 5 }
  0x23   : > { %3653 = vmatprep.subr.bf16.mxu1 %v3652_v4  ;;  %v3784_v13 = vpack.c.bf16 %v2775_v11, %v2774_v10  ;;  %v2729_v14 = vld [vmem:[%s5486_s1 + $0xa8] sm:$0xff]  ;;  %v2776_v15 = vld [vmem:[%s5486_s1 + $0x220] sm:$0xff]  ;;  %v2730_v19 = vld [vmem:[%s5486_s1 + $0xb0] sm:$0xff] }
  0x24   : > { %v2777_v16 = vld [vmem:[%s5486_s1 + $0x228] sm:$0xff]  ;;  %3781 = vmatprep.subr.bf16.mxu0 %v3780_v8  ;;  %3655 = vmatpush3.bf16.msra.mxu1 %v3652_v4  ;;  %v3660_v17 = vpack.c.bf16 %v2729_v14, %v2728_v12  ;;  %v2731_v20 = vld [vmem:[%s5486_s1 + $0xb8] sm:$0xff]  ;;  %v2778_v21 = vld [vmem:[%s5486_s1 + $0x230] sm:$0xff] }
  0x25   : > { %3783 = vmatpush3.bf16.msra.mxu0 %v3780_v8  ;;  %3657 = vmatprep.subr.bf16.mxu1 %v3656_v9  ;;  %v3788_v18 = vpack.c.bf16 %v2777_v16, %v2776_v15  ;;  %v2779_v22 = vld [vmem:[%s5486_s1 + $0x238] sm:$0xff]  ;;  %v3664_v23 = vpack.c.bf16 %v2731_v20, %v2730_v19  ;;  %v2732_v24 = vld [vmem:[%s5486_s1 + $0xc0] sm:$0xff]  ;;  %v2733_v25 = vld [vmem:[%s5486_s1 + $0xc8] sm:$0xff] }
  0x26   : > { %3785 = vmatprep.subr.bf16.mxu0 %v3784_v13  ;;  %v3792_v26 = vpack.c.bf16 %v2779_v22, %v2778_v21  ;;  %v2780_v27 = vld [vmem:[%s5486_s1 + $0x240] sm:$0xff]  ;;  %v2781_v28 = vld [vmem:[%s5486_s1 + $0x248] sm:$0xff]  ;;  %v4339_v32 = vld [vmem:[%s4317_s8 + $0x10] sm:$0xff]  ;;  %v3668_v37 = vpack.c.bf16 %v2733_v25, %v2732_v24 }
  0x27   : > { %v4332_v29 = vld [vmem:[%s4317_s8] sm:$0xff]  ;;  %v4335_v30 = vld [vmem:[%s4317_s8 + $0x8] sm:$0xff]  ;;  %v4342_v33 = vld [vmem:[%s4317_s8 + $0x18] sm:$0xff]  ;;  %v1144_v35 = vrot.slane %v4339_v32, 3  ;;  %v3796_v38 = vpack.c.bf16 %v2781_v28, %v2780_v27  ;;  %v376_v0 = vrot.slane %v4339_v32, 1 }
  0x28   : > { %3659 = vmatpush3.bf16.msra.mxu1 %v3656_v9  ;;  %v373_v31 = vrot.slane %v4332_v29, 1  ;;  %v374_v34 = vrot.slane %v4335_v30, 1  ;;  %v1145_v36 = vrot.slane %v4342_v33, 3  ;;  %v2734_v39 = vld [vmem:[%s5486_s1 + $0xd0] sm:$0xff]  ;;  %v2735_v40 = vld [vmem:[%s5486_s1 + $0xd8] sm:$0xff]  ;;  %v2736_v47 = vld [vmem:[%s5486_s1 + $0xe0] sm:$0xff] }
  0x29   : > { %3787 = vmatpush3.bf16.msra.mxu0 %v3784_v13  ;;  %3661 = vmatprep.subr.bf16.mxu1 %v3660_v17  ;;  %v2782_v43 = vld [vmem:[%s5486_s1 + $0x250] sm:$0xff]  ;;  %v2783_v44 = vld [vmem:[%s5486_s1 + $0x258] sm:$0xff]  ;;  %v3672_v45 = vpack.c.bf16 %v2735_v40, %v2734_v39  ;;  %v2737_v48 = vld [vmem:[%s5486_s1 + $0xe8] sm:$0xff]  ;;  %v378_v5 = vrot.slane %v4342_v33, 1 }
  0x2a   : > { %3789 = vmatprep.subr.bf16.mxu0 %v3788_v18  ;;  %v375_v41 = vsel %vm372_vm0, %v373_v31, %v374_v34  ;;  %v1146_v42 = vsel %vm1143_vm1, %v1144_v35, %v1145_v36  ;;  %v3800_v46 = vpack.c.bf16 %v2783_v44, %v2782_v43  ;;  %v2784_v49 = vld [vmem:[%s5486_s1 + $0x260] sm:$0xff]  ;;  %v2785_v50 = vld [vmem:[%s5486_s1 + $0x268] sm:$0xff]  ;;  %v3676_v51 = vpack.c.bf16 %v2737_v48, %v2736_v47  ;;  %v2738_v53 = vld [vmem:[%s5486_s1 + $0xf0] sm:$0xff] }
  0x2b   : > { %3180 = vmatprep.mubr.f32.mxu1 %v375_v41  ;;  %3404 = vmatprep.mubr.f32.mxu0 %v1146_v42  ;;  %v3804_v52 = vpack.c.bf16 %v2785_v50, %v2784_v49  ;;  %v2739_v54 = vld [vmem:[%s5486_s1 + $0xf8] sm:$0xff]  ;;  %v2786_v55 = vld [vmem:[%s5486_s1 + $0x270] sm:$0xff]  ;;  %v322_v59 = vld [vmem:[%s5486_s1] sm:$0xff]  ;;  %v377_v10 = vsel %vm372_vm0, %v374_v34, %v376_v0 }
  0x2c   : > { %3663 = vmatpush3.bf16.msra.mxu1 %v3660_v17  ;;  %v2787_v56 = vld [vmem:[%s5486_s1 + $0x278] sm:$0xff]  ;;  %v3680_v57 = vpack.c.bf16 %v2739_v54, %v2738_v53  ;;  %v323_v60 = vld [vmem:[%s5486_s1 + $0x8] sm:$0xff]  ;;  %v4396_v61 = vld [vmem:[%s4317_s8 + $0x20] sm:$0xff] }
  0x2d   : > { %3791 = vmatpush3.bf16.msra.mxu0 %v3788_v18  ;;  %3665 = vmatprep.subr.bf16.mxu1 %v3664_v23  ;;  %v3808_v58 = vpack.c.bf16 %v2787_v56, %v2786_v55  ;;  %v2788_v62 = vld [vmem:[%s5486_s1 + $0x280] sm:$0xff]  ;;  %v2789_v63 = vld [vmem:[%s5486_s1 + $0x288] sm:$0xff]  ;;  %v3684_v2 = vpack.c.bf16 %v323_v60, %v322_v59  ;;  %v1147_v3 = vrot.slane %v4396_v61, 3  ;;  %v4411_v6 = vld [vmem:[%s4317_s8 + $0x30] sm:$0xff]  ;;  %v380_v11 = vrot.slane %v4396_v61, 1 }
  0x2e   : > { %3793 = vmatprep.subr.bf16.mxu0 %v3792_v26  ;;  %v4406_v1 = vld [vmem:[%s4317_s8 + $0x28] sm:$0xff]  ;;  %v3812_v4 = vpack.c.bf16 %v2789_v63, %v2788_v62  ;;  %v324_v8 = vld [vmem:[%s5486_s1 + $0x10] sm:$0xff]  ;;  %v325_v9 = vld [vmem:[%s5486_s1 + $0x18] sm:$0xff]  ;;  %v1151_v16 = vrot.slane %v4411_v6, 3  ;;  %v379_v18 = vsel %vm372_vm0, %v376_v0, %v378_v5  ;;  %v384_v31 = vrot.slane %v4411_v6, 1 }
  0x2f   : > { %v1149_v7 = vrot.slane %v4406_v1, 3  ;;  %v2790_v12 = vld [vmem:[%s5486_s1 + $0x290] sm:$0xff]  ;;  %v2791_v13 = vld [vmem:[%s5486_s1 + $0x298] sm:$0xff]  ;;  %v1148_v15 = vsel %vm1143_vm1, %v1145_v36, %v1147_v3  ;;  %v4438_v17 = vld [vmem:[%s4317_s8 + $0x40] sm:$0xff]  ;;  %v3688_v19 = vpack.c.bf16 %v325_v9, %v324_v8  ;;  %v382_v20 = vrot.slane %v4406_v1, 1 }
  0x30   : > { %3667 = vmatpush3.bf16.msra.mxu1 %v3664_v23  ;;  %v4431_v14 = vld [vmem:[%s4317_s8 + $0x38] sm:$0xff]  ;;  %v326_v21 = vld [vmem:[%s5486_s1 + $0x20] sm:$0xff]  ;;  %v327_v22 = vld [vmem:[%s5486_s1 + $0x28] sm:$0xff]  ;;  %v3816_v24 = vpack.c.bf16 %v2791_v13, %v2790_v12  ;;  %v381_v28 = vsel %vm372_vm0, %v378_v5, %v380_v11  ;;  %v1155_v34 = vrot.slane %v4438_v17, 3 }
  0x31   : > { %3795 = vmatpush3.bf16.msra.mxu0 %v3792_v26  ;;  %3669 = vmatprep.subr.bf16.mxu1 %v3668_v37  ;;  %v1150_v23 = vsel %vm1143_vm1, %v1147_v3, %v1149_v7  ;;  %v1153_v25 = vrot.slane %v4431_v14, 3  ;;  %v4451_v26 = vld [vmem:[%s4317_s8 + $0x48] sm:$0xff]  ;;  %v4454_v27 = vld [vmem:[%s4317_s8 + $0x50] sm:$0xff]  ;;  %v2792_v35 = vld [vmem:[%s5486_s1 + $0x2a0] sm:$0xff]  ;;  %v1152_v39 = vsel %vm1143_vm1, %v1149_v7, %v1151_v16  ;;  %v3692_v40 = vpack.c.bf16 %v327_v22, %v326_v21 }
  0x32   : > { %3797 = vmatprep.subr.bf16.mxu0 %v3796_v38  ;;  %v2793_v36 = vld [vmem:[%s5486_s1 + $0x2a8] sm:$0xff]  ;;  %v328_v41 = vld [vmem:[%s5486_s1 + $0x30] sm:$0xff]  ;;  %v329_v42 = vld [vmem:[%s5486_s1 + $0x38] sm:$0xff]  ;;  %v383_v43 = vsel %vm372_vm0, %v380_v11, %v382_v20  ;;  %v1157_v44 = vrot.slane %v4451_v26, 3  ;;  %v385_v54 = vsel %vm372_vm0, %v382_v20, %v384_v31  ;;  %v392_v62 = vrot.slane %v4454_v27, 1 }
  0x33   : > { %v2794_v47 = vld [vmem:[%s5486_s1 + $0x2b0] sm:$0xff]  ;;  %v2795_v48 = vld [vmem:[%s5486_s1 + $0x2b8] sm:$0xff]  ;;  %v4487_v49 = vld [vmem:[%s4317_s8 + $0x60] sm:$0xff]  ;;  %v1154_v50 = vsel %vm1143_vm1, %v1151_v16, %v1153_v25  ;;  %v1156_v55 = vsel %vm1143_vm1, %v1153_v25, %v1155_v34  ;;  %v3696_v59 = vpack.c.bf16 %v329_v42, %v328_v41  ;;  %v730_v7 = vrot.slane %v4332_v29, 2 }
  0x34   : > { %3671 = vmatpush3.bf16.msra.mxu1 %v3668_v37  ;;  %v386_v37 = vrot.slane %v4431_v14, 1  ;;  %v3824_v60 = vpack.c.bf16 %v2795_v48, %v2794_v47  ;;  %v1163_v63 = vrot.slane %v4487_v49, 3  ;;  %v2796_v0 = vld [vmem:[%s5486_s1 + $0x2c0] sm:$0xff]  ;;  %v1158_v3 = vsel %vm1143_vm1, %v1155_v34, %v1157_v44  ;;  %v4516_v11 = vld [vmem:[%s4317_s8 + $0x68] sm:$0xff]  ;;  %v332_v20 = vld [vmem:[%s5486_s1 + $0x50] sm:$0xff] }
  0x35   : > { %3799 = vmatpush3.bf16.msra.mxu0 %v3796_v38  ;;  %3673 = vmatprep.subr.bf16.mxu1 %v3672_v45  ;;  %v4467_v38 = vld [vmem:[%s4317_s8 + $0x58] sm:$0xff]  ;;  %v733_v16 = vrot.slane %v4339_v32, 2  ;;  %v735_v22 = vrot.slane %v4342_v33, 2  ;;  %v4537_v25 = vld [vmem:[%s4317_s8 + $0x70] sm:$0xff]  ;;  %v741_v41 = vrot.slane %v4411_v6, 2 }
  0x36   : > { %3801 = vmatprep.subr.bf16.mxu0 %v3800_v46  ;;  %v1161_v53 = vrot.slane %v4467_v38, 3  ;;  %v387_v56 = vsel %vm372_vm0, %v384_v31, %v386_v37  ;;  %v394_v13 = vrot.slane %v4467_v38, 1  ;;  %v333_v21 = vld [vmem:[%s5486_s1 + $0x58] sm:$0xff]  ;;  %v1167_v47 = vrot.slane %v4537_v25, 3 }
  0x37   : > { %v2799_v31 = vld [vmem:[%s5486_s1 + $0x2d8] sm:$0xff] }
  0x38   : > { %3675 = vmatpush3.bf16.msra.mxu1 %v3672_v45  ;;  %v388_v45 = vrot.slane %v4438_v17, 1  ;;  %v395_v42 = vsel %vm372_vm0, %v392_v62, %v394_v13 }
  0x39   : > { %3803 = vmatpush3.bf16.msra.mxu0 %v3800_v46  ;;  %3677 = vmatprep.subr.bf16.mxu1 %v3676_v51  ;;  %v1159_v46 = vrot.slane %v4454_v27, 3 }
  0x3a   : > { %3805 = vmatprep.subr.bf16.mxu0 %v3804_v52 }
  0x3b   : > { %v1160_v5 = vsel %vm1143_vm1, %v1157_v44, %v1159_v46  ;;  %v1162_v9 = vsel %vm1143_vm1, %v1159_v46, %v1161_v53  ;;  %v4562_v44 = vld [vmem:[%s4317_s8 + $0x78] sm:$0xff]  ;;  %v743_v46 = vrot.slane %v4431_v14, 2 }
  0x3c   : > { %3679 = vmatpush3.bf16.msra.mxu1 %v3676_v51  ;;  %v3820_v51 = vpack.c.bf16 %v2793_v36, %v2792_v35  ;;  %v739_v36 = vrot.slane %v4406_v1, 2 }
  0x3d   : > { %3807 = vmatpush3.bf16.msra.mxu0 %v3804_v52  ;;  %3681 = vmatprep.subr.bf16.mxu1 %v3680_v57  ;;  %v390_v52 = vrot.slane %v4451_v26, 1 }
  0x3e   : > { %3809 = vmatprep.subr.bf16.mxu0 %v3808_v58 }
  0x3f   : > { %v391_v8 = vsel %vm372_vm0, %v388_v45, %v390_v52 }
  0x40   : > { %3683 = vmatpush3.bf16.msra.mxu1 %v3680_v57  ;;  %v330_v57 = vld [vmem:[%s5486_s1 + $0x40] sm:$0xff] }
  0x41   : > { %3811 = vmatpush3.bf16.msra.mxu0 %v3808_v58  ;;  %3685 = vmatprep.subr.bf16.mxu1 %v3684_v2  ;;  %v331_v58 = vld [vmem:[%s5486_s1 + $0x48] sm:$0xff] }
  0x42   : > { %3813 = vmatprep.subr.bf16.mxu0 %v3812_v4 }
  0x43   : > { %3181 = vmatmul.mubr.f32.vlgmr.msra.gmra.mrb[0].mxu1 %v377_v10  ;;  %v3700_v10 = vpack.c.bf16 %v331_v58, %v330_v57 }
  0x44   : > { %3405 = vmatmul.mubr.f32.vlgmr.msra.gmra.mrb[0].mxu0 %v1148_v15  ;;  %3687 = vmatpush3.bf16.msra.mxu1 %v3684_v2  ;;  %v2797_v2 = vld [vmem:[%s5486_s1 + $0x2c8] sm:$0xff]  ;;  %v731_v15 = vrot.slane %v4335_v30, 2 }
  0x45   : > { %3815 = vmatpush3.bf16.msra.mxu0 %v3812_v4  ;;  %3183 = vmatprep.mubr.f32.mxu1 %v379_v18  ;;  %v389_v4 = vsel %vm372_vm0, %v386_v37, %v388_v45  ;;  %v4518_v12 = vpack.c.bf16 %v2797_v2, %v2796_v0  ;;  %v393_v18 = vsel %vm372_vm0, %v390_v52, %v392_v62  ;;  %v396_v37 = vrot.slane %v4487_v49, 1  ;;  %v335_v62 = vld [vmem:[%s5486_s1 + $0x68] sm:$0xff] }
  0x46   : > { %3407 = vmatprep.mubr.f32.mxu0 %v1150_v23  ;;  %3689 = vmatprep.subr.bf16.mxu1 %v3688_v19  ;;  %v737_v23 = vrot.slane %v4396_v61, 2  ;;  %v4546_v34 = vsel %vm729_vm2, %v730_v7, %v731_v15  ;;  %v4549_v35 = vsel %vm729_vm2, %v731_v15, %v733_v16  ;;  %v745_v52 = vrot.slane %v4438_v17, 2 }
  0x47   : > { %3184 = vmatmul.mubr.f32.gmra.mrb[2].mxu1 %v381_v28  ;;  %3817 = vmatprep.subr.bf16.mxu0 %v3816_v24  ;;  %v2798_v28 = vld [vmem:[%s5486_s1 + $0x2d0] sm:$0xff]  ;;  %v397_v58 = vsel %vm372_vm0, %v394_v13, %v396_v37  ;;  %v400_v2 = vrot.slane %v4537_v25, 1 }
  0x48   : > { %3408 = vmatmul.mubr.f32.gmra.mrb[2].mxu0 %v1152_v39  ;;  %3691 = vmatpush3.bf16.msra.mxu1 %v3688_v19  ;;  %v1164_v19 = vsel %vm1143_vm1, %v1161_v53, %v1163_v63  ;;  %v4554_v39 = vsel %vm729_vm2, %v733_v16, %v735_v22  ;;  %v4565_v45 = vsel %vm729_vm2, %v737_v23, %v739_v36  ;;  %v398_v53 = vrot.slane %v4516_v11, 1  ;;  %v336_v16 = vld [vmem:[%s5486_s1 + $0x70] sm:$0xff] }
  0x49   : > { %3819 = vmatpush3.bf16.msra.mxu0 %v3816_v24  ;;  %3186 = vmatprep.mubr.f32.mxu1 %v383_v43  ;;  %v1165_v24 = vrot.slane %v4516_v11, 3  ;;  %v3704_v43 = vpack.c.bf16 %v333_v21, %v332_v20  ;;  %v3832_v48 = vpack.c.bf16 %v2799_v31, %v2798_v28  ;;  %v4595_v0 = vsel %vm729_vm2, %v743_v46, %v745_v52 }
  0x4a   : > { %3410 = vmatprep.mubr.f32.mxu0 %v1154_v50  ;;  %3693 = vmatprep.subr.bf16.mxu1 %v3692_v40  ;;  %v4570_v50 = vld [vmem:[%s4317_s8 + $0x80] sm:$0xff]  ;;  %v399_v13 = vsel %vm372_vm0, %v396_v37, %v398_v53  ;;  %v1373_v28 = vrot.slane %v4342_v33, 4  ;;  %v401_v31 = vsel %vm372_vm0, %v398_v53, %v400_v2 }
  0x4b   : > { %3187 = vmatmul.mubr.f32.gmra.mrb[4].mxu1 %v385_v54  ;;  %3821 = vmatprep.subr.bf16.mxu0 %v3820_v51  ;;  %v4578_v54 = vsel %vm729_vm2, %v741_v41, %v743_v46  ;;  %v1166_v57 = vsel %vm1143_vm1, %v1163_v63, %v1165_v24  ;;  %v1171_v63 = vrot.slane %v4570_v50, 3  ;;  %v404_v37 = vrot.slane %v4570_v50, 1 }
  0x4c   : > { %3411 = vmatmul.mubr.f32.gmra.mrb[4].mxu0 %v1156_v55  ;;  %3695 = vmatpush3.bf16.msra.mxu1 %v3692_v40  ;;  %v4557_v40 = vsel %vm729_vm2, %v735_v22, %v737_v23  ;;  %v747_v55 = vrot.slane %v4451_v26, 2  ;;  %v337_v22 = vld [vmem:[%s5486_s1 + $0x78] sm:$0xff]  ;;  %v2802_v23 = vld [vmem:[%s5486_s1 + $0x2f0] sm:$0xff] }
  0x4d   : > { %3823 = vmatpush3.bf16.msra.mxu0 %v3820_v51  ;;  %3189 = vmatprep.mubr.f32.mxu1 %v387_v56  ;;  %v4573_v51 = vsel %vm729_vm2, %v739_v36, %v741_v41  ;;  %v5496_v56 = vrot.slane %v4454_v27, 2  ;;  %v1786_v41 = vrot.slane %v4396_v61, 5 }
  0x4e   : > { %3413 = vmatprep.mubr.f32.mxu0 %v1158_v3  ;;  %3697 = vmatprep.subr.bf16.mxu1 %v3696_v59  ;;  %v2800_v3 = vld [vmem:[%s5486_s1 + $0x2e0] sm:$0xff]  ;;  %v4609_v7 = vsel %vm729_vm2, %v745_v52, %v747_v55  ;;  %v1789_v52 = vrot.slane %v4411_v6, 5 }
  0x4f   : > { %3190 = vmatmul.mubr.f32.gmra.mrb[6].mxu1 %v389_v4  ;;  %3825 = vmatprep.subr.bf16.mxu0 %v3824_v60  ;;  %v2801_v4 = vld [vmem:[%s5486_s1 + $0x2e8] sm:$0xff] }
  0x50   : > { %3414 = vmatmul.mubr.f32.gmra.mrb[6].mxu0 %v1160_v5  ;;  %3699 = vmatpush3.bf16.msra.mxu1 %v3696_v59  ;;  %v1169_v59 = vrot.slane %v4562_v44, 3  ;;  %v4606_v5 = vld [vmem:[%s4317_s8 + $0x88] sm:$0xff]  ;;  %v3836_v20 = vpack.c.bf16 %v2801_v4, %v2800_v3 }
  0x51   : > { %3827 = vmatpush3.bf16.msra.mxu0 %v3824_v60  ;;  %3192 = vmatprep.mubr.f32.mxu1 %v391_v8  ;;  %v334_v60 = vld [vmem:[%s5486_s1 + $0x60] sm:$0xff]  ;;  %v4614_v8 = vsel %vm729_vm2, %v747_v55, %v5496_v56  ;;  %v1173_v21 = vrot.slane %v4606_v5, 3  ;;  %v1791_v55 = vrot.slane %v4431_v14, 5  ;;  %v2805_v4 = vld [vmem:[%s5486_s1 + $0x308] sm:$0xff] }
  0x52   : > { %3416 = vmatprep.mubr.f32.mxu0 %v1162_v9  ;;  %3701 = vmatprep.subr.bf16.mxu1 %v3700_v10  ;;  %v1168_v9 = vsel %vm1143_vm1, %v1165_v24, %v1167_v47  ;;  %v3708_v15 = vpack.c.bf16 %v335_v62, %v334_v60  ;;  %v2803_v24 = vld [vmem:[%s5486_s1 + $0x2f8] sm:$0xff]  ;;  %v1172_v36 = vsel %vm1143_vm1, %v1169_v59, %v1171_v63  ;;  %v2804_v60 = vld [vmem:[%s5486_s1 + $0x300] sm:$0xff] }
  0x53   : > { %3193 = vmatmul.mubr.f32.gmra.mrb[8].mxu1 %v393_v18  ;;  %3829 = vmatprep.subr.bf16.mxu0 %v4518_v12  ;;  %v4624_v18 = vld [vmem:[%s4317_s8 + $0x90] sm:$0xff]  ;;  %v3840_v53 = vpack.c.bf16 %v2803_v24, %v2802_v23  ;;  %v2807_v24 = vld [vmem:[%s5486_s1 + $0x318] sm:$0xff] }
  0x54   : > { %3417 = vmatmul.mubr.f32.gmra.mrb[8].mxu0 %v1164_v19  ;;  %3703 = vmatpush3.bf16.msra.mxu1 %v3700_v10  ;;  %v402_v10 = vrot.slane %v4562_v44, 1  ;;  %v1372_v19 = vrot.slane %v4339_v32, 4  ;;  %v1175_v46 = vrot.slane %v4624_v18, 3  ;;  %v2806_v23 = vld [vmem:[%s5486_s1 + $0x310] sm:$0xff] }
  0x55   : > { %3831 = vmatpush3.bf16.msra.mxu0 %v4518_v12  ;;  %3195 = vmatprep.mubr.f32.mxu1 %v395_v42  ;;  %v1170_v12 = vsel %vm1143_vm1, %v1167_v47, %v1169_v59  ;;  %v1787_v47 = vrot.slane %v4406_v1, 5  ;;  %v2741_v59 = vld [vmem:[%s5486_s1 + $0x108] sm:$0xff] }
  0x56   : > { %3419 = vmatprep.mubr.f32.mxu0 %v1166_v57  ;;  %3705 = vmatprep.subr.bf16.mxu1 %v3704_v43  ;;  %v403_v42 = vsel %vm372_vm0, %v400_v2, %v402_v10  ;;  %v1793_v57 = vrot.slane %v4438_v17, 5  ;;  %v405_v3 = vsel %vm372_vm0, %v402_v10, %v404_v37  ;;  %v5494_v10 = vrot.slane %v4454_v27, 5 }
  0x57   : > { %3196 = vmatmul.mubr.f32.gmra.mrb[10].mxu1 %v397_v58  ;;  %3833 = vmatprep.subr.bf16.mxu0 %v3832_v48  ;;  %v2740_v58 = vld [vmem:[%s5486_s1 + $0x100] sm:$0xff]  ;;  %v4660_v62 = vsel %vm1785_vm4, %v1786_v41, %v1787_v47  ;;  %v4663_v2 = vsel %vm1785_vm4, %v1787_v47, %v1789_v52  ;;  %v3844_v37 = vpack.c.bf16 %v2805_v4, %v2804_v60  ;;  %v1377_v41 = vrot.slane %v4406_v1, 4 }
  0x58   : > { %3420 = vmatmul.mubr.f32.gmra.mrb[10].mxu0 %v1168_v9  ;;  %3707 = vmatpush3.bf16.msra.mxu1 %v3704_v43  ;;  %v3712_v43 = vpack.c.bf16 %v337_v22, %v336_v16  ;;  %v2742_v9 = vld [vmem:[%s5486_s1 + $0x110] sm:$0xff]  ;;  %v4677_v16 = vsel %vm1785_vm4, %v1789_v52, %v1791_v55  ;;  %v1375_v22 = vrot.slane %v4396_v61, 4  ;;  %v3848_v47 = vpack.c.bf16 %v2807_v24, %v2806_v23 }
  0x59   : > { %3835 = vmatpush3.bf16.msra.mxu0 %v3832_v48  ;;  %3198 = vmatprep.mubr.f32.mxu1 %v399_v13  ;;  %v1174_v48 = vsel %vm1143_vm1, %v1171_v63, %v1173_v21  ;;  %v1795_v63 = vrot.slane %v4451_v26, 5  ;;  %v2743_v13 = vld [vmem:[%s5486_s1 + $0x118] sm:$0xff]  ;;  %v5493_v52 = vrot.slane %v4570_v50, 5  ;;  %v1383_v4 = vrot.slane %v4438_v17, 4 }
  0x5a   : > { %3422 = vmatprep.mubr.f32.mxu0 %v1170_v12  ;;  %3709 = vmatprep.subr.bf16.mxu1 %v3708_v15  ;;  %v4680_v12 = vsel %vm1785_vm4, %v1791_v55, %v1793_v57  ;;  %v1811_v55 = vrot.slane %v4606_v5, 5  ;;  %v2014_v24 = vrot.slane %v4396_v61, 6 }
  0x5b   : > { %3199 = vmatmul.mubr.f32.gmra.mrb[12].mxu1 %v401_v31  ;;  %3837 = vmatprep.subr.bf16.mxu0 %v3836_v20  ;;  %v4692_v31 = vsel %vm1785_vm4, %v1793_v57, %v1795_v63  ;;  %v1381_v57 = vrot.slane %v4431_v14, 4 }
  0x5c   : > { %3423 = vmatmul.mubr.f32.gmra.mrb[12].mxu0 %v1172_v36  ;;  %3711 = vmatpush3.bf16.msra.mxu1 %v3708_v15  ;;  %v1176_v15 = vsel %vm1143_vm1, %v1173_v21, %v1175_v46  ;;  %v3716_v36 = vpack.c.bf16 %v2741_v59, %v2740_v58  ;;  %v1374_v21 = vsel %vm1371_vm3, %v1372_v19, %v1373_v28  ;;  %v1379_v46 = vrot.slane %v4411_v6, 4 }
  0x5d   : > { %3839 = vmatpush3.bf16.msra.mxu0 %v3836_v20  ;;  %3201 = vmatprep.mubr.f32.mxu1 %v403_v42  ;;  %v4697_v20 = vsel %vm1785_vm4, %v1795_v63, %v5494_v10  ;;  %v3720_v42 = vpack.c.bf16 %v2743_v13, %v2742_v9  ;;  %v1376_v19 = vsel %vm1371_vm3, %v1373_v28, %v1375_v22  ;;  %v1813_v58 = vrot.slane %v4624_v18, 5  ;;  %v2808_v9 = vld [vmem:[%s5486_s1 + $0x320] sm:$0xff]  ;;  %v2809_v13 = vld [vmem:[%s5486_s1 + $0x328] sm:$0xff] }
  0x5e   : > { %3425 = vmatprep.mubr.f32.mxu0 %v1174_v48  ;;  %3713 = vmatprep.subr.bf16.mxu1 %v3712_v43  ;;  %v4712_v48 = vld [vmem:[%s4317_s8 + $0x98] sm:$0xff]  ;;  %v4725_v28 = vsel %vm1785_vm4, %v5493_v52, %v1811_v55  ;;  %v959_v59 = vrot.slane %v4606_v5, 2  ;;  %v961_v63 = vrot.slane %v4624_v18, 2  ;;  %v2023_v52 = vrot.slane %v4451_v26, 6 }
  0x5f   : > { %3202 = vmatmul.mubr.f32.gmra.mrb[14].mxu1 %v405_v3  ;;  %3841 = vmatprep.subr.bf16.mxu0 %v3840_v53  ;;  %v5492_v60 = vrot.slane %v4712_v48, 5  ;;  %v4732_v3 = vsel %vm1371_vm3, %v1375_v22, %v1377_v41 }
  0x60   : > { %3426 = vmatmul.mubr.f32.gmra.mrb[14].mxu0 %v1176_v15  ;;  %3715 = vmatpush3.bf16.msra.mxu1 %v3712_v43  ;;  %v5495_v43 = vrot.slane %v4570_v50, 2  ;;  %v4742_v15 = vsel %vm1785_vm4, %v1811_v55, %v1813_v58  ;;  %v4755_v23 = vsel %vm729_vm2, %v959_v59, %v961_v63  ;;  %v2746_v55 = vld [vmem:[%s5486_s1 + $0x130] sm:$0xff] }
  0x61   : > { %3843 = vmatpush3.bf16.msra.mxu0 %v3840_v53  ;;  %3236 = vmatprep.mubr.f32.mxu1 %v4332_v29  ;;  %v2744_v53 = vld [vmem:[%s5486_s1 + $0x120] sm:$0xff]  ;;  %v2745_v29 = vld [vmem:[%s5486_s1 + $0x128] sm:$0xff]  ;;  %v4752_v22 = vsel %vm1785_vm4, %v1813_v58, %v5492_v60  ;;  %v2015_v58 = vrot.slane %v4406_v1, 6  ;;  %v2810_v63 = vld [vmem:[%s5486_s1 + $0x330] sm:$0xff] }
  0x62   : > { %3460 = vmatprep.mubr.f32.mxu0 %v1374_v21  ;;  %3717 = vmatprep.subr.bf16.mxu1 %v3716_v36  ;;  %v3724_v21 = vpack.c.bf16 %v2745_v29, %v2744_v53  ;;  %v2019_v53 = vrot.slane %v4431_v14, 6  ;;  %v4777_v29 = vsel %vm1371_vm3, %v1381_v57, %v1383_v4 }
  0x63   : > { %3237 = vmatmul.mubr.f32.vlgmr.msra.gmra.mrb[0].mxu1 %v4335_v30  ;;  %3845 = vmatprep.subr.bf16.mxu0 %v3844_v37  ;;  %v4747_v30 = vsel %vm729_vm2, %v5495_v43, %v959_v59  ;;  %v1385_v59 = vrot.slane %v4451_v26, 4  ;;  %v5497_v43 = vrot.slane %v4570_v50, 6 }
  0x64   : > { %3461 = vmatmul.mubr.f32.vlgmr.msra.gmra.mrb[0].mxu0 %v1376_v19  ;;  %3719 = vmatpush3.bf16.msra.mxu1 %v3716_v36  ;;  %v4760_v36 = vsel %vm1371_vm3, %v1377_v41, %v1379_v46  ;;  %v2747_v19 = vld [vmem:[%s5486_s1 + $0x138] sm:$0xff]  ;;  %v2017_v41 = vrot.slane %v4411_v6, 6 }
  0x65   : > { %3847 = vmatpush3.bf16.msra.mxu0 %v3844_v37  ;;  %3239 = vmatprep.mubr.f32.mxu1 %v4339_v32  ;;  %v4771_v37 = vsel %vm1371_vm3, %v1379_v46, %v1381_v57  ;;  %v3852_v32 = vpack.c.bf16 %v2809_v13, %v2808_v9  ;;  %v2811_v46 = vld [vmem:[%s5486_s1 + $0x338] sm:$0xff]  ;;  %v4787_v9 = vsel %vm2013_vm5, %v2014_v24, %v2015_v58  ;;  %v2021_v13 = vrot.slane %v4438_v17, 6 }
  0x66   : > { %3463 = vmatprep.mubr.f32.mxu0 %v4732_v3  ;;  %3721 = vmatprep.subr.bf16.mxu1 %v3720_v42  ;;  %v4792_v57 = vsel %vm2013_vm5, %v2015_v58, %v2017_v41  ;;  %v4795_v60 = vsel %vm2013_vm5, %v2017_v41, %v2019_v53  ;;  %v1387_v24 = vrot.slane %v4454_v27, 4  ;;  %v4813_v58 = vsel %vm1371_vm3, %v1383_v4, %v1385_v59  ;;  %v2812_v4 = vld [vmem:[%s5486_s1 + $0x340] sm:$0xff] }
  0x67   : > { %3240 = vmatmul.mubr.f32.gmra.mrb[2].mxu1 %v4342_v33  ;;  %3849 = vmatprep.subr.bf16.mxu0 %v3848_v47  ;;  %v3728_v33 = vpack.c.bf16 %v2747_v19, %v2746_v55  ;;  %v4801_v10 = vsel %vm2013_vm5, %v2019_v53, %v2021_v13  ;;  %v3856_v55 = vpack.c.bf16 %v2811_v46, %v2810_v63  ;;  %v1389_v41 = vrot.slane %v4467_v38, 4  ;;  %v2748_v53 = vld [vmem:[%s5486_s1 + $0x140] sm:$0xff]  ;;  %v2749_v63 = vld [vmem:[%s5486_s1 + $0x148] sm:$0xff] }
  0x68   : > { %3464 = vmatmul.mubr.f32.gmra.mrb[2].mxu0 %v4760_v36  ;;  %3723 = vmatpush3.bf16.msra.mxu1 %v3720_v42  ;;  %v2039_v42 = vrot.slane %v4606_v5, 6  ;;  %v4807_v19 = vsel %vm2013_vm5, %v2021_v13, %v2023_v52  ;;  %v2813_v13 = vld [vmem:[%s5486_s1 + $0x348] sm:$0xff] }
  0x69   : > { %3851 = vmatpush3.bf16.msra.mxu0 %v3848_v47  ;;  %3242 = vmatprep.mubr.f32.mxu1 %v4396_v61  ;;  %5498 = vst [vmem:[#allocation7_spill] sm:$0xff] %v4807_v19  ;;  %v2025_v47 = vrot.slane %v4454_v27, 6  ;;  %v2041_v61 = vrot.slane %v4624_v18, 6  ;;  %v5500_v19 = vrot.slane %v4712_v48, 6 }
  0x6a   : > { %3466 = vmatprep.mubr.f32.mxu0 %v4771_v37  ;;  %3725 = vmatprep.subr.bf16.mxu1 %v3724_v21  ;;  %v4825_v46 = vsel %vm2013_vm5, %v5497_v43, %v2039_v42 }
  0x6b   : > { %3243 = vmatmul.mubr.f32.gmra.mrb[4].mxu1 %v4406_v1  ;;  %3853 = vmatprep.subr.bf16.mxu0 %v3852_v32  ;;  %5499 = vst [vmem:[#allocation8_spill] sm:$0xff] %v4825_v46  ;;  %v4838_v56 = vsel %vm2013_vm5, %v2023_v52, %v2025_v47  ;;  %v4841_v43 = vsel %vm2013_vm5, %v2039_v42, %v2041_v61  ;;  %v1391_v1 = vrot.slane %v4487_v49, 4  ;;  %v2750_v42 = vld [vmem:[%s5486_s1 + $0x150] sm:$0xff] }
  0x6c   : > { %3467 = vmatmul.mubr.f32.gmra.mrb[4].mxu0 %v4777_v29  ;;  %3727 = vmatpush3.bf16.msra.mxu1 %v3724_v21  ;;  %v4845_v21 = vsel %vm1371_vm3, %v1385_v59, %v1387_v24  ;;  %v4851_v46 = vsel %vm2013_vm5, %v2041_v61, %v5500_v19  ;;  %v3732_v52 = vpack.c.bf16 %v2749_v63, %v2748_v53  ;;  %v1393_v59 = vrot.slane %v4516_v11, 4  ;;  %v2751_v19 = vld [vmem:[%s5486_s1 + $0x158] sm:$0xff] }
  0x6d   : > { %3855 = vmatpush3.bf16.msra.mxu0 %v3852_v32  ;;  %3245 = vmatprep.mubr.f32.mxu1 %v4411_v6  ;;  %v4856_v32 = vsel %vm1371_vm3, %v1387_v24, %v1389_v41  ;;  %v3860_v6 = vpack.c.bf16 %v2813_v13, %v2812_v4  ;;  %v2815_v24 = vld [vmem:[%s5486_s1 + $0x358] sm:$0xff]  ;;  %v4874_v61 = vsel %vm1371_vm3, %v1389_v41, %v1391_v1  ;;  %v1395_v53 = vrot.slane %v4537_v25, 4  ;;  %v2753_v41 = vld [vmem:[%s5486_s1 + $0x168] sm:$0xff] }
  0x6e   : > { %3469 = vmatprep.mubr.f32.mxu0 %v4813_v58  ;;  %3729 = vmatprep.subr.bf16.mxu1 %v3728_v33  ;;  %v4880_v63 = vsel %vm1371_vm3, %v1391_v1, %v1393_v59  ;;  %v2817_v1 = vld [vmem:[%s5486_s1 + $0x368] sm:$0xff] }
  0x6f   : > { %3246 = vmatmul.mubr.f32.gmra.mrb[6].mxu1 %v4431_v14  ;;  %3857 = vmatprep.subr.bf16.mxu0 %v3856_v55  ;;  %v2814_v14 = vld [vmem:[%s5486_s1 + $0x350] sm:$0xff]  ;;  %v4898_v13 = vsel %vm1371_vm3, %v1393_v59, %v1395_v53 }
  0x70   : > { %3470 = vmatmul.mubr.f32.gmra.mrb[6].mxu0 %v4845_v21  ;;  %3731 = vmatpush3.bf16.msra.mxu1 %v3728_v33  ;;  %v3736_v33 = vpack.c.bf16 %v2751_v19, %v2750_v42  ;;  %v3864_v4 = vpack.c.bf16 %v2815_v24, %v2814_v14  ;;  %v1399_v42 = vrot.slane %v4570_v50, 4  ;;  %v2754_v59 = vld [vmem:[%s5486_s1 + $0x170] sm:$0xff]  ;;  %v2755_v24 = vld [vmem:[%s5486_s1 + $0x178] sm:$0xff] }
  0x71   : > { %3859 = vmatpush3.bf16.msra.mxu0 %v3856_v55  ;;  %3248 = vmatprep.mubr.f32.mxu1 %v4438_v17  ;;  %v1397_v55 = vrot.slane %v4562_v44, 4  ;;  %v2752_v17 = vld [vmem:[%s5486_s1 + $0x160] sm:$0xff] }
  0x72   : > { %3472 = vmatprep.mubr.f32.mxu0 %v4856_v32  ;;  %3733 = vmatprep.subr.bf16.mxu1 %v3732_v52 }
  0x73   : > { %3249 = vmatmul.mubr.f32.gmra.mrb[8].mxu1 %v4451_v26  ;;  %3861 = vmatprep.subr.bf16.mxu0 %v3860_v6  ;;  %v2816_v26 = vld [vmem:[%s5486_s1 + $0x360] sm:$0xff]  ;;  %v4904_v19 = vsel %vm1371_vm3, %v1395_v53, %v1397_v55  ;;  %v2819_v53 = vld [vmem:[%s5486_s1 + $0x378] sm:$0xff] }
  0x74   : > { %3473 = vmatmul.mubr.f32.gmra.mrb[8].mxu0 %v4874_v61  ;;  %3735 = vmatpush3.bf16.msra.mxu1 %v3732_v52  ;;  %v3740_v52 = vpack.c.bf16 %v2753_v41, %v2752_v17  ;;  %v3868_v14 = vpack.c.bf16 %v2817_v1, %v2816_v26  ;;  %v2818_v17 = vld [vmem:[%s5486_s1 + $0x370] sm:$0xff]  ;;  %v1403_v41 = vrot.slane %v4624_v18, 4 }
  0x75   : > { %3863 = vmatpush3.bf16.msra.mxu0 %v3860_v6  ;;  %3251 = vmatprep.mubr.f32.mxu1 %v4454_v27  ;;  %v1401_v6 = vrot.slane %v4606_v5, 4  ;;  %v4922_v5 = vsel %vm1371_vm3, %v1397_v55, %v1399_v42  ;;  %v3872_v1 = vpack.c.bf16 %v2819_v53, %v2818_v17  ;;  %v2757_v55 = vld [vmem:[%s5486_s1 + $0x188] sm:$0xff]  ;;  %v2758_v53 = vld [vmem:[%s5486_s1 + $0x190] sm:$0xff] }
  0x76   : > { %3475 = vmatprep.mubr.f32.mxu0 %v4880_v63  ;;  %3737 = vmatprep.subr.bf16.mxu1 %v3736_v33 }
  0x77   : > { %3252 = vmatmul.mubr.f32.gmra.mrb[10].mxu1 %v4467_v38  ;;  %3865 = vmatprep.subr.bf16.mxu0 %v3864_v4  ;;  %v4928_v26 = vsel %vm1371_vm3, %v1399_v42, %v1401_v6  ;;  %v2821_v42 = vld [vmem:[%s5486_s1 + $0x388] sm:$0xff] }
  0x78   : > { %3476 = vmatmul.mubr.f32.gmra.mrb[10].mxu0 %v4898_v13  ;;  %3739 = vmatpush3.bf16.msra.mxu1 %v3736_v33  ;;  %v3744_v33 = vpack.c.bf16 %v2755_v24, %v2754_v59  ;;  %v2820_v59 = vld [vmem:[%s5486_s1 + $0x380] sm:$0xff]  ;;  %v4947_v24 = vsel %vm1371_vm3, %v1401_v6, %v1403_v41  ;;  %v2822_v6 = vld [vmem:[%s5486_s1 + $0x390] sm:$0xff] }
  0x79   : > { %3867 = vmatpush3.bf16.msra.mxu0 %v3864_v4  ;;  %3254 = vmatprep.mubr.f32.mxu1 %v4487_v49  ;;  %v2756_v4 = vld [vmem:[%s5486_s1 + $0x180] sm:$0xff]  ;;  %v3876_v17 = vpack.c.bf16 %v2821_v42, %v2820_v59  ;;  %v2761_v42 = vld [vmem:[%s5486_s1 + $0x1a8] sm:$0xff] }
  0x7a   : > { %3478 = vmatprep.mubr.f32.mxu0 %v4904_v19  ;;  %3741 = vmatprep.subr.bf16.mxu1 %v3740_v52 }
  0x7b   : > { %3255 = vmatmul.mubr.f32.gmra.mrb[12].mxu1 %v4516_v11  ;;  %3869 = vmatprep.subr.bf16.mxu0 %v3868_v14 }
  0x7c   : > { %3479 = vmatmul.mubr.f32.gmra.mrb[12].mxu0 %v4922_v5  ;;  %3743 = vmatpush3.bf16.msra.mxu1 %v3740_v52  ;;  %v3748_v52 = vpack.c.bf16 %v2757_v55, %v2756_v4  ;;  %v2823_v4 = vld [vmem:[%s5486_s1 + $0x398] sm:$0xff] }
  0x7d   : > { %3871 = vmatpush3.bf16.msra.mxu0 %v3868_v14  ;;  %3257 = vmatprep.mubr.f32.mxu1 %v4537_v25  ;;  %v2759_v14 = vld [vmem:[%s5486_s1 + $0x198] sm:$0xff]  ;;  %v3880_v59 = vpack.c.bf16 %v2823_v4, %v2822_v6  ;;  %v2765_v6 = vld [vmem:[%s5486_s1 + $0x1c8] sm:$0xff] }
  0x7e   : > { %3481 = vmatprep.mubr.f32.mxu0 %v4928_v26  ;;  %3745 = vmatprep.subr.bf16.mxu1 %v3744_v33  ;;  %v3752_v55 = vpack.c.bf16 %v2759_v14, %v2758_v53  ;;  %v2764_v14 = vld [vmem:[%s5486_s1 + $0x1c0] sm:$0xff]  ;;  %v2829_v4 = vld [vmem:[%s5486_s1 + $0x3c8] sm:$0xff] }
  0x7f   : > { %3258 = vmatmul.mubr.f32.gmra.mrb[14].mxu1 %v4562_v44  ;;  %3873 = vmatprep.subr.bf16.mxu0 %v3872_v1 }
  0x80   : > { %3482 = vmatmul.mubr.f32.gmra.mrb[14].mxu0 %v4947_v24  ;;  %3747 = vmatpush3.bf16.msra.mxu1 %v3744_v33  ;;  %v2760_v33 = vld [vmem:[%s5486_s1 + $0x1a0] sm:$0xff] }
  0x81   : > { %3875 = vmatpush3.bf16.msra.mxu0 %v3872_v1  ;;  %3292 = vmatprep.mubr.f32.mxu1 %v4546_v34  ;;  %v2824_v34 = vld [vmem:[%s5486_s1 + $0x3a0] sm:$0xff]  ;;  %v2762_v1 = vld [vmem:[%s5486_s1 + $0x1b0] sm:$0xff] }
  0x82   : > { %3516 = vmatprep.mubr.f32.mxu0 %v4732_v3  ;;  %3749 = vmatprep.subr.bf16.mxu1 %v3748_v52  ;;  %v3756_v3 = vpack.c.bf16 %v2761_v42, %v2760_v33  ;;  %v2766_v33 = vld [vmem:[%s5486_s1 + $0x1d0] sm:$0xff]  ;;  %v2767_v42 = vld [vmem:[%s5486_s1 + $0x1d8] sm:$0xff] }
  0x83   : > { %3293 = vmatmul.mubr.f32.vlgmr.msra.gmra.mrb[0].mxu1 %v4549_v35  ;;  %3877 = vmatprep.subr.bf16.mxu0 %v3876_v17  ;;  %v2825_v35 = vld [vmem:[%s5486_s1 + $0x3a8] sm:$0xff] }
  0x84   : > { %3517 = vmatmul.mubr.f32.vlgmr.msra.gmra.mrb[0].mxu0 %v4760_v36  ;;  %3751 = vmatpush3.bf16.msra.mxu1 %v3748_v52  ;;  %v3884_v36 = vpack.c.bf16 %v2825_v35, %v2824_v34  ;;  %v2763_v52 = vld [vmem:[%s5486_s1 + $0x1b8] sm:$0xff]  ;;  %v2830_v34 = vld [vmem:[%s5486_s1 + $0x3d0] sm:$0xff] }
  0x85   : > { %3879 = vmatpush3.bf16.msra.mxu0 %v3876_v17  ;;  %3295 = vmatprep.mubr.f32.mxu1 %v4554_v39  ;;  %v2827_v17 = vld [vmem:[%s5486_s1 + $0x3b8] sm:$0xff]  ;;  %v3760_v53 = vpack.c.bf16 %v2763_v52, %v2762_v1  ;;  %v755_v1 = vrot.slane %v4516_v11, 2 }
  0x86   : > { %3519 = vmatprep.mubr.f32.mxu0 %v4771_v37  ;;  %3753 = vmatprep.subr.bf16.mxu1 %v3752_v55  ;;  %v2826_v37 = vld [vmem:[%s5486_s1 + $0x3b0] sm:$0xff]  ;;  %v2831_v35 = vld [vmem:[%s5486_s1 + $0x3d8] sm:$0xff] }
  0x87   : > { %3296 = vmatmul.mubr.f32.gmra.mrb[2].mxu1 %v4557_v40  ;;  %3881 = vmatprep.subr.bf16.mxu0 %v3880_v59  ;;  %v3896_v52 = vpack.c.bf16 %v2831_v35, %v2830_v34 }
  0x88   : > { %3520 = vmatmul.mubr.f32.gmra.mrb[2].mxu0 %v4777_v29  ;;  %3755 = vmatpush3.bf16.msra.mxu1 %v3752_v55  ;;  %v3888_v29 = vpack.c.bf16 %v2827_v17, %v2826_v37  ;;  %v3764_v55 = vpack.c.bf16 %v2765_v6, %v2764_v14  ;;  %v2768_v37 = vld [vmem:[%s5486_s1 + $0x1e0] sm:$0xff]  ;;  %v2833_v14 = vld [vmem:[%s5486_s1 + $0x3e8] sm:$0xff] }
  0x89   : > { %3883 = vmatpush3.bf16.msra.mxu0 %v3880_v59  ;;  %3298 = vmatprep.mubr.f32.mxu1 %v4565_v45  ;;  %v751_v59 = vrot.slane %v4467_v38, 2 }
  0x8a   : > { %3522 = vmatprep.mubr.f32.mxu0 %v4813_v58  ;;  %3757 = vmatprep.subr.bf16.mxu1 %v3756_v3  ;;  %v2828_v58 = vld [vmem:[%s5486_s1 + $0x3c0] sm:$0xff] }
  0x8b   : > { %3299 = vmatmul.mubr.f32.gmra.mrb[4].mxu1 %v4573_v51  ;;  %3885 = vmatprep.subr.bf16.mxu0 %v3884_v36 }
  0x8c   : > { %3523 = vmatmul.mubr.f32.gmra.mrb[4].mxu0 %v4845_v21  ;;  %3759 = vmatpush3.bf16.msra.mxu1 %v3756_v3  ;;  %v3892_v21 = vpack.c.bf16 %v2829_v4, %v2828_v58  ;;  %v5501_v3 = vrot.slane %v4454_v27, 2  ;;  %v759_v58 = vrot.slane %v4562_v44, 2  ;;  %v5063_v4 = vld [vmem:[%s4317_s8 + $0xa0] sm:$0xff] }
  0x8d   : > { %3887 = vmatpush3.bf16.msra.mxu0 %v3884_v36  ;;  %3301 = vmatprep.mubr.f32.mxu1 %v4578_v54  ;;  %v3768_v36 = vpack.c.bf16 %v2767_v42, %v2766_v33  ;;  %v2834_v42 = vld [vmem:[%s5486_s1 + $0x3f0] sm:$0xff]  ;;  %v1603_v34 = vrot.slane %v5063_v4, 4 }
  0x8e   : > { %3525 = vmatprep.mubr.f32.mxu0 %v4856_v32  ;;  %3761 = vmatprep.subr.bf16.mxu1 %v3760_v53  ;;  %v753_v32 = vrot.slane %v4487_v49, 2 }
  0x8f   : > { %3302 = vmatmul.mubr.f32.gmra.mrb[6].mxu1 %v4595_v0  ;;  %3889 = vmatprep.subr.bf16.mxu0 %v3888_v29 }
  0x90   : > { %3526 = vmatmul.mubr.f32.gmra.mrb[6].mxu0 %v4874_v61  ;;  %3763 = vmatpush3.bf16.msra.mxu1 %v3760_v53  ;;  %v5035_v61 = vsel %vm729_vm2, %v5501_v3, %v751_v59  ;;  %v5047_v17 = vsel %vm729_vm2, %v751_v59, %v753_v32  ;;  %v757_v53 = vrot.slane %v4537_v25, 2  ;;  %v1601_v59 = vrot.slane %v4712_v48, 4 }
  0x91   : > { %3891 = vmatpush3.bf16.msra.mxu0 %v3888_v29  ;;  %3304 = vmatprep.mubr.f32.mxu1 %v4609_v7  ;;  %v2832_v29 = vld [vmem:[%s5486_s1 + $0x3e0] sm:$0xff] }
  0x92   : > { %3528 = vmatprep.mubr.f32.mxu0 %v4880_v63  ;;  %3765 = vmatprep.subr.bf16.mxu1 %v3764_v55  ;;  %v2769_v63 = vld [vmem:[%s5486_s1 + $0x1e8] sm:$0xff]  ;;  %v5075_v33 = vsel %vm729_vm2, %v755_v1, %v757_v53  ;;  %v1602_v3 = vsel %vm1371_vm3, %v1403_v41, %v1601_v59  ;;  %v1604_v18 = vsel %vm1371_vm3, %v1601_v59, %v1603_v34  ;;  %v1817_v34 = vrot.slane %v5063_v4, 5 }
  0x93   : > { %3305 = vmatmul.mubr.f32.gmra.mrb[8].mxu1 %v4614_v8  ;;  %3893 = vmatprep.subr.bf16.mxu0 %v3892_v21  ;;  %v3772_v6 = vpack.c.bf16 %v2769_v63, %v2768_v37  ;;  %v2839_v63 = vld [vmem:[%s5486_s1 + $0x418] sm:$0xff] }
  0x94   : > { %3529 = vmatmul.mubr.f32.gmra.mrb[8].mxu0 %v4898_v13  ;;  %3767 = vmatpush3.bf16.msra.mxu1 %v3764_v55  ;;  %v5059_v13 = vsel %vm729_vm2, %v753_v32, %v755_v1  ;;  %v3900_v55 = vpack.c.bf16 %v2833_v14, %v2832_v29  ;;  %v2835_v32 = vld [vmem:[%s5486_s1 + $0x3f8] sm:$0xff]  ;;  %v2836_v1 = vld [vmem:[%s5486_s1 + $0x400] sm:$0xff]  ;;  %v2841_v14 = vld [vmem:[%s5486_s1 + $0x428] sm:$0xff] }
  0x95   : > { %3895 = vmatpush3.bf16.msra.mxu0 %v3892_v21  ;;  %3307 = vmatprep.mubr.f32.mxu1 %v5035_v61  ;;  %v2770_v21 = vld [vmem:[%s5486_s1 + $0x1f0] sm:$0xff]  ;;  %v2840_v29 = vld [vmem:[%s5486_s1 + $0x420] sm:$0xff] }
  0x96   : > { %3531 = vmatprep.mubr.f32.mxu0 %v4904_v19  ;;  %3769 = vmatprep.subr.bf16.mxu1 %v3768_v36  ;;  %v2771_v19 = vld [vmem:[%s5486_s1 + $0x1f8] sm:$0xff] }
  0x97   : > { %3308 = vmatmul.mubr.f32.gmra.mrb[10].mxu1 %v5047_v17  ;;  %3897 = vmatprep.subr.bf16.mxu0 %v3896_v52  ;;  %v3776_v35 = vpack.c.bf16 %v2771_v19, %v2770_v21  ;;  %v2848_v21 = vld [vmem:[%s5486_s1 + $0x460] sm:$0xff]  ;;  %v2849_v19 = vld [vmem:[%s5486_s1 + $0x468] sm:$0xff] }
  0x98   : > { %3532 = vmatmul.mubr.f32.gmra.mrb[10].mxu0 %v4922_v5  ;;  %3771 = vmatpush3.bf16.msra.mxu1 %v3768_v36  ;;  %v5087_v5 = vsel %vm729_vm2, %v757_v53, %v759_v58  ;;  %v3904_v36 = vpack.c.bf16 %v2835_v32, %v2834_v42  ;;  %v3932_v42 = vpack.c.bf16 %v2849_v19, %v2848_v21  ;;  %v2850_v32 = vld [vmem:[%s5486_s1 + $0x470] sm:$0xff] }
  0x99   : > { %3899 = vmatpush3.bf16.msra.mxu0 %v3896_v52  ;;  %3310 = vmatprep.mubr.f32.mxu1 %v5059_v13  ;;  %v5502_v52 = vrot.slane %v4570_v50, 2 }
  0x9a   : > { %3534 = vmatprep.mubr.f32.mxu0 %v4928_v26  ;;  %3773 = vmatprep.subr.bf16.mxu1 %v3772_v6  ;;  %v2837_v26 = vld [vmem:[%s5486_s1 + $0x408] sm:$0xff] }
  0x9b   : > { %3311 = vmatmul.mubr.f32.gmra.mrb[12].mxu1 %v5075_v33  ;;  %3901 = vmatprep.subr.bf16.mxu0 %v3900_v55  ;;  %v5103_v37 = vsel %vm729_vm2, %v759_v58, %v5502_v52  ;;  %v3908_v41 = vpack.c.bf16 %v2837_v26, %v2836_v1  ;;  %v1807_v58 = vrot.slane %v4562_v44, 5  ;;  %v2033_v26 = vrot.slane %v4537_v25, 6 }
  0x9c   : > { %3535 = vmatmul.mubr.f32.gmra.mrb[12].mxu0 %v4947_v24  ;;  %3775 = vmatpush3.bf16.msra.mxu1 %v3772_v6  ;;  %v2838_v24 = vld [vmem:[%s5486_s1 + $0x410] sm:$0xff]  ;;  %v1803_v6 = vrot.slane %v4516_v11, 5  ;;  %v2035_v52 = vrot.slane %v4562_v44, 6 }
  0x9d   : > { %3903 = vmatpush3.bf16.msra.mxu0 %v3900_v55  ;;  %3313 = vmatprep.mubr.f32.mxu1 %v5087_v5  ;;  %v3912_v53 = vpack.c.bf16 %v2839_v63, %v2838_v24  ;;  %v2260_v63 = vld [vmem:[%s4251_s9 + $0x18] sm:$0xff] }
  0x9e   : > { %3537 = vmatprep.mubr.f32.mxu0 %v1602_v3  ;;  %3777 = vmatprep.subr.bf16.mxu1 %v3776_v35  ;;  %v2036_v44 = vsel %vm2013_vm5, %v2033_v26, %v2035_v52 }
  0x9f   : > { %3314 = vmatmul.mubr.f32.gmra.mrb[14].mxu1 %v5103_v37  ;;  %3905 = vmatprep.subr.bf16.mxu0 %v3904_v36 }
  0xa0   : > { %3538 = vmatmul.mubr.f32.gmra.mrb[14].mxu0 %v1604_v18  ;;  %3779 = vmatpush3.bf16.msra.mxu1 %v3776_v35  ;;  %v4128_v35 = vld [vmem:[%s4317_s8 + $0x60] sm:$0xff] }
  0xa1   : > { %3907 = vmatpush3.bf16.msra.mxu0 %v3904_v36  ;;  %3348 = vmatprep.mubr.f32.mxu1 %v4554_v39  ;;  %v3916_v39 = vpack.c.bf16 %v2841_v14, %v2840_v29  ;;  %v2029_v3 = vrot.slane %v4128_v35, 6  ;;  %v4129_v36 = vld [vmem:[%s4317_s8 + $0x68] sm:$0xff] }
  0xa2   : > { %3572 = vmatprep.mubr.f32.mxu0 %v4660_v62  ;;  %3909 = vmatprep.subr.bf16.mxu0 %v3908_v41  ;;  %v2842_v62 = vld [vmem:[%s5486_s1 + $0x430] sm:$0xff]  ;;  %v2031_v1 = vrot.slane %v4129_v36, 6  ;;  %v5508_v29 = vld [vmem:[#allocation7_spill] sm:$0xff] }
  0xa3   : > { %3349 = vmatmul.mubr.f32.vlgmr.msra.gmra.mrb[0].mxu1 %v4557_v40  ;;  %3940 = vmatprep.subr.bf16.mxu1 %v3908_v41  ;;  %v1799_v40 = vrot.slane %v4467_v38, 5  ;;  %v2262_v14 = vld [vmem:[%s4251_s9 + $0x28] sm:$0xff] }
  0xa4   : > { %3573 = vmatmul.mubr.f32.vlgmr.msra.gmra.mrb[0].mxu0 %v4663_v2  ;;  %3948 = vmatpush3.bf16.msra.mxu1 %v3908_v41  ;;  %v2843_v2 = vld [vmem:[%s5486_s1 + $0x438] sm:$0xff] }
  0xa5   : > { %3911 = vmatpush3.bf16.msra.mxu0 %v3908_v41  ;;  %3351 = vmatprep.mubr.f32.mxu1 %v4565_v45  ;;  %v1801_v45 = vrot.slane %v4487_v49, 5  ;;  %v3920_v38 = vpack.c.bf16 %v2843_v2, %v2842_v62  ;;  %v2845_v49 = vld [vmem:[%s5486_s1 + $0x448] sm:$0xff]  ;;  %v2271_v2 = vld [vmem:[%s4251_s9 + $0x70] sm:$0xff] }
  0xa6   : > { %3575 = vmatprep.mubr.f32.mxu0 %v4677_v16  ;;  %3913 = vmatprep.subr.bf16.mxu0 %v3912_v53  ;;  %v2258_v41 = vld [vmem:[%s4251_s9 + $0x8] sm:$0xff] }
  0xa7   : > { %3352 = vmatmul.mubr.f32.gmra.mrb[2].mxu1 %v4573_v51  ;;  %3941 = vmatprep.subr.bf16.mxu1 %v3912_v53  ;;  %v5503_v51 = vrot.slane %v4454_v27, 5  ;;  %v2263_v27 = vld [vmem:[%s4251_s9 + $0x30] sm:$0xff]  ;;  %v2270_v62 = vld [vmem:[%s4251_s9 + $0x68] sm:$0xff] }
  0xa8   : > { %3576 = vmatmul.mubr.f32.gmra.mrb[2].mxu0 %v4680_v12  ;;  %3949 = vmatpush3.bf16.msra.mxu1 %v3912_v53  ;;  %v2844_v12 = vld [vmem:[%s5486_s1 + $0x440] sm:$0xff] }
  0xa9   : > { %3915 = vmatpush3.bf16.msra.mxu0 %v3912_v53  ;;  %3354 = vmatprep.mubr.f32.mxu1 %v4578_v54  ;;  %v1800_v16 = vsel %vm1785_vm4, %v5503_v51, %v1799_v40  ;;  %v1802_v54 = vsel %vm1785_vm4, %v1799_v40, %v1801_v45  ;;  %v3924_v11 = vpack.c.bf16 %v2845_v49, %v2844_v12  ;;  %v2261_v53 = vld [vmem:[%s4251_s9 + $0x20] sm:$0xff] }
  0xaa   : > { %3578 = vmatprep.mubr.f32.mxu0 %v4692_v31  ;;  %3917 = vmatprep.subr.bf16.mxu0 %v3916_v39  ;;  %v1804_v31 = vsel %vm1785_vm4, %v1801_v45, %v1803_v6  ;;  %v2269_v40 = vld [vmem:[%s4251_s9 + $0x60] sm:$0xff]  ;;  %v2272_v45 = vld [vmem:[%s4251_s9 + $0x78] sm:$0xff] }
  0xab   : > { %3355 = vmatmul.mubr.f32.gmra.mrb[4].mxu1 %v4595_v0  ;;  %3942 = vmatprep.subr.bf16.mxu1 %v3916_v39  ;;  %v1805_v0 = vrot.slane %v4537_v25, 5  ;;  %v2034_v25 = vsel %vm2013_vm5, %v2031_v1, %v2033_v26 }
  0xac   : > { %3579 = vmatmul.mubr.f32.gmra.mrb[4].mxu0 %v4697_v20  ;;  %3950 = vmatpush3.bf16.msra.mxu1 %v3916_v39  ;;  %v2846_v20 = vld [vmem:[%s5486_s1 + $0x450] sm:$0xff] }
  0xad   : > { %3919 = vmatpush3.bf16.msra.mxu0 %v3916_v39  ;;  %3357 = vmatprep.mubr.f32.mxu1 %v4609_v7  ;;  %v2847_v7 = vld [vmem:[%s5486_s1 + $0x458] sm:$0xff]  ;;  %v1808_v59 = vsel %vm1785_vm4, %v1805_v0, %v1807_v58 }
  0xae   : > { %3581 = vmatprep.mubr.f32.mxu0 %v1800_v16  ;;  %3921 = vmatprep.subr.bf16.mxu0 %v3920_v38  ;;  %v3928_v55 = vpack.c.bf16 %v2847_v7, %v2846_v20  ;;  %v2268_v39 = vld [vmem:[%s4251_s9 + $0x58] sm:$0xff] }
  0xaf   : > { %3358 = vmatmul.mubr.f32.gmra.mrb[6].mxu1 %v4614_v8  ;;  %3943 = vmatprep.subr.bf16.mxu1 %v3920_v38  ;;  %v1806_v8 = vsel %vm1785_vm4, %v1803_v6, %v1805_v0 }
  0xb0   : > { %3582 = vmatmul.mubr.f32.gmra.mrb[6].mxu0 %v1802_v54  ;;  %3951 = vmatpush3.bf16.msra.mxu1 %v3920_v38 }
  0xb1   : > { %3923 = vmatpush3.bf16.msra.mxu0 %v3920_v38  ;;  %3360 = vmatprep.mubr.f32.mxu1 %v5035_v61  ;;  %v5504_v61 = vrot.slane %v4570_v50, 5 }
  0xb2   : > { %3584 = vmatprep.mubr.f32.mxu0 %v1804_v31  ;;  %3925 = vmatprep.subr.bf16.mxu0 %v3924_v11 }
  0xb3   : > { %3361 = vmatmul.mubr.f32.gmra.mrb[8].mxu1 %v5047_v17  ;;  %3944 = vmatprep.subr.bf16.mxu1 %v3924_v11  ;;  %v1810_v17 = vsel %vm1785_vm4, %v1807_v58, %v5504_v61 }
  0xb4   : > { %3585 = vmatmul.mubr.f32.gmra.mrb[8].mxu0 %v1806_v8  ;;  %3952 = vmatpush3.bf16.msra.mxu1 %v3924_v11 }
  0xb5   : > { %3927 = vmatpush3.bf16.msra.mxu0 %v3924_v11  ;;  %3363 = vmatprep.mubr.f32.mxu1 %v5059_v13  ;;  %v2851_v13 = vld [vmem:[%s5486_s1 + $0x478] sm:$0xff] }
  0xb6   : > { %3587 = vmatprep.mubr.f32.mxu0 %v1808_v59  ;;  %3929 = vmatprep.subr.bf16.mxu0 %v3928_v55 }
  0xb7   : > { %3364 = vmatmul.mubr.f32.gmra.mrb[10].mxu1 %v5075_v33  ;;  %3945 = vmatprep.subr.bf16.mxu1 %v3928_v55  ;;  %v3936_v33 = vpack.c.bf16 %v2851_v13, %v2850_v32 }
  0xb8   : > { %3588 = vmatmul.mubr.f32.gmra.mrb[10].mxu0 %v1810_v17  ;;  %3953 = vmatpush3.bf16.msra.mxu1 %v3928_v55 }
  0xb9   : > { %3931 = vmatpush3.bf16.msra.mxu0 %v3928_v55  ;;  %3366 = vmatprep.mubr.f32.mxu1 %v5087_v5 }
  0xba   : > { %3590 = vmatprep.mubr.f32.mxu0 %v4725_v28  ;;  %3933 = vmatprep.subr.bf16.mxu0 %v3932_v42  ;;  %v5505_v28 = vrot.slane %v4712_v48, 5 }
  0xbb   : > { %3367 = vmatmul.mubr.f32.gmra.mrb[12].mxu1 %v5103_v37  ;;  %3946 = vmatprep.subr.bf16.mxu1 %v3932_v42  ;;  %v5506_v37 = vrot.slane %v4570_v50, 6  ;;  %v2045_v50 = vrot.slane %v5063_v4, 6 }
  0xbc   : > { %3591 = vmatmul.mubr.f32.gmra.mrb[12].mxu0 %v4742_v15  ;;  %3954 = vmatpush3.bf16.msra.mxu1 %v3932_v42  ;;  %v1818_v5 = vsel %vm1785_vm4, %v5505_v28, %v1817_v34  ;;  %v2032_v15 = vsel %vm2013_vm5, %v2029_v3, %v2031_v1 }
  0xbd   : > { %3935 = vmatpush3.bf16.msra.mxu0 %v3932_v42  ;;  %3369 = vmatprep.mubr.f32.mxu1 %v4747_v30  ;;  %v2257_v30 = vld [vmem:[%s4251_s9] sm:$0xff]  ;;  %v2038_v18 = vsel %vm2013_vm5, %v2035_v52, %v5506_v37 }
  0xbe   : > { %3593 = vmatprep.mubr.f32.mxu0 %v4752_v22  ;;  %3937 = vmatprep.subr.bf16.mxu0 %v3936_v33  ;;  %v4174_v22 = vmov 0  }
  0xbf   : > { %3370 = vmatmul.mubr.f32.gmra.mrb[14].mxu1 %v4755_v23  ;;  %3947 = vmatprep.subr.bf16.mxu1 %v3936_v33  ;;  %v2259_v23 = vld [vmem:[%s4251_s9 + $0x10] sm:$0xff] }
  0xc0   : > { %3594 = vmatmul.mubr.f32.gmra.mrb[14].mxu0 %v1818_v5  ;;  %3955 = vmatpush3.bf16.msra.mxu1 %v3936_v33 }
  0xc1   : > { %3939 = vmatpush3.bf16.msra.mxu0 %v3936_v33  ;;  %3628 = vmatprep.mubr.f32.mxu0 %v4787_v9  ;;  %v4130_v9 = vld [vmem:[%s4317_s8 + $0x58] sm:$0xff] }
  0xc2   : > { %3640 = vmatprep.mubr.f32.mxu1 %v2032_v15  ;;  %4126 = vset.pattern.permute.xlu0 %v4174_v22  ;;  %v2027_v24 = vrot.slane %v4130_v9, 6 }
  0xc3   : > { %3641 = vmatmul.mubr.f32.vlgmr.msra.gmra.mrb[16].mxu1 %v2034_v25  ;;  %2275 = vperm.xlu0 %4126, %v2257_v30  }
  0xc4   : > { %3629 = vmatmul.mubr.f32.vlgmr.msra.gmra.mrb[0].mxu0 %v4792_v57  ;;  %3643 = vmatprep.mubr.f32.mxu1 %v2036_v44  ;;  %v5507_v57 = vld [vmem:[#allocation8_spill] sm:$0xff] }
  0xc5   : > { %3631 = vmatprep.mubr.f32.mxu0 %v4795_v60  ;;  %4127 = vset.pattern.permute.xlu1 %v4174_v22  ;;  %v2028_v60 = vsel %vm2013_vm5, %v2025_v47, %v2027_v24  ;;  %v2030_v47 = vsel %vm2013_vm5, %v2027_v24, %v2029_v3 }
  0xc6   : > { %2285 = vperm.xlu1 %4127, %v2259_v23  }
  0xc7   : > { %3644 = vmatmul.mubr.f32.gmra.mrb[18].mxu1 %v2038_v18  ;;  %2280 = vperm.xlu0 %4126, %v2258_v41  }
  0xc8   : > { %3632 = vmatmul.mubr.f32.gmra.mrb[2].mxu0 %v4801_v10  ;;  %3646 = vmatprep.mubr.f32.mxu1 %v5507_v57  ;;  %v5509_v10 = vrot.slane %v4712_v48, 6  ;;  %v2266_v48 = vld [vmem:[%s4251_s9 + $0x48] sm:$0xff] }
  0xc9   : > { %3634 = vmatprep.mubr.f32.mxu0 %v5508_v29 }
  0xca   : > { %2290 = vperm.xlu1 %4127, %v2260_v63   ;;  %v2046_v4 = vsel %vm2013_vm5, %v5509_v10, %v2045_v50 }
  0xcb   : > { %3647 = vmatmul.mubr.f32.gmra.mrb[20].mxu1 %v4841_v43  ;;  %2295 = vperm.xlu0 %4126, %v2261_v53   ;;  %v2264_v43 = vld [vmem:[%s4251_s9 + $0x38] sm:$0xff] }
  0xcc   : > { %3635 = vmatmul.mubr.f32.gmra.mrb[4].mxu0 %v4838_v56  ;;  %3649 = vmatprep.mubr.f32.mxu1 %v4851_v46  ;;  %v2265_v56 = vld [vmem:[%s4251_s9 + $0x40] sm:$0xff]  ;;  %v2267_v46 = vld [vmem:[%s4251_s9 + $0x50] sm:$0xff]  ;;  %s5261_s9 = scalar_lea.vmem [#allocation2], %s4246_s29 }
  0xcd   : > { %3637 = vmatprep.mubr.f32.mxu0 %v2028_v60 }
  0xce   : > { %2300 = vperm.xlu1 %4127, %v2262_v14  }
  0xcf   : > { %3650 = vmatmul.mubr.f32.gmra.mrb[22].mxu1 %v2046_v4  ;;  %2305 = vperm.xlu0 %4126, %v2263_v27  }
  0xd0   : > { %3638 = vmatmul.mubr.f32.gmra.mrb[6].mxu0 %v2030_v47 }
  0xd2   : > { %2310 = vperm.xlu1 %4127, %v2264_v43  }
  0xd3   : > { %2315 = vperm.xlu0 %4126, %v2265_v56  }
  0xd6   : > { %2320 = vperm.xlu1 %4127, %v2266_v48  }
  0xd7   : > { %2325 = vperm.xlu0 %4126, %v2267_v46  }
  0xda   : > { %2330 = vperm.xlu1 %4127, %v2268_v39  }
  0xdb   : > { %2335 = vperm.xlu0 %4126, %v2269_v40  }
  0xde   : > { %2340 = vperm.xlu1 %4127, %v2270_v62  }
  0xdf   : > { %2345 = vperm.xlu0 %4126, %v2271_v2  }
  0xe2   : > { %2350 = vperm.xlu1 %4127, %v2272_v45  }
 0x142   : > { %v2276_v55 = vpop.permute.xlu0 %2275 }
 0x145   : > { %v5248_v61 = vpop.permute.xlu1 %2285 }
 0x146   : > { %v2281_v35 = vpop.permute.xlu0 %2280 }
 0x149   : > { %v2291_v26 = vpop.permute.xlu1 %2290 }
 0x14a   : > { %v5254_v44 = vpop.permute.xlu0 %2295 }
 0x14d   : > { %v2301_v41 = vpop.permute.xlu1 %2300 }
 0x14e   : > { %v5277_v4 = vpop.permute.xlu0 %2305 }
 0x151   : > { %v2311_v40 = vpop.permute.xlu1 %2310 }
 0x176   : > { %v3350_v38 = vpop.f32.mrb[0].mxu1 }
 0x177   : > { %v1031_v51 = vpop.f32.mrb[1].mxu1 }
 0x17a   : > { %v3353_v16 = vpop.f32.mrb[2].mxu1 }
 0x17b   : > { %v5238_v6 = vpop.f32.mrb[3].mxu1 }
 0x17e   : > { %v5240_v12 = vpop.f32.mrb[4].mxu1 }
 0x17f   : > { %v5242_v49 = vpop.f32.mrb[5].mxu1 }
 0x182   : > { %v5244_v54 = vpop.f32.mrb[6].mxu1 }
 0x183   : > { %v5246_v0 = vpop.f32.mrb[7].mxu1 }
 0x186   : > { %v3362_v11 = vpop.f32.mrb[8].mxu1 }
 0x187   : > { %v3586_v31 = vpop.f32.mrb[8].mxu0  ;;  %v1071_v58 = vpop.f32.mrb[9].mxu1 }
 0x188   : > { %v3964_v20 = vadd.f32 %v3586_v31, %v3362_v11  ;;  %v1941_v7 = vpop.f32.mrb[9].mxu0 }
 0x189   : > { %v3966_v8 = vadd.f32 %v1941_v7, %v1071_v58 }
 0x18a   : > { %v3365_v59 = vpop.f32.mrb[10].mxu1 }
 0x18b   : > { %v3589_v21 = vpop.f32.mrb[10].mxu0  ;;  %v1081_v19 = vpop.f32.mrb[11].mxu1 }
 0x18c   : > { %v3968_v17 = vadd.f32 %v3589_v21, %v3365_v59  ;;  %v1951_v42 = vpop.f32.mrb[11].mxu0 }
 0x18d   : > { %v3970_v32 = vadd.f32 %v1951_v42, %v1081_v19 }
 0x18e   : > { %v3368_v13 = vpop.f32.mrb[12].mxu1 }
 0x18f   : > { %v3592_v34 = vpop.f32.mrb[12].mxu0  ;;  %v1091_v33 = vpop.f32.mrb[13].mxu1 }
 0x190   : > { %v3972_v3 = vadd.f32 %v3592_v34, %v3368_v13  ;;  %v1961_v36 = vpop.f32.mrb[13].mxu0 }
 0x191   : > { %v3974_v1 = vadd.f32 %v1961_v36, %v1091_v33 }
 0x192   : > { %v3371_v28 = vpop.f32.mrb[14].mxu1 }
 0x193   : > { %v3595_v5 = vpop.f32.mrb[14].mxu0  ;;  %v1101_v52 = vpop.f32.mrb[15].mxu1 }
 0x194   : > { %v5250_v15 = vadd.f32 %v3595_v5, %v3371_v28  ;;  %v1971_v25 = vpop.f32.mrb[15].mxu0 }
 0x195   : > { %v5252_v30 = vadd.f32 %v1971_v25, %v1101_v52 }
 0x196   : > { %v3642_v22 = vpop.f32.mrb[16].mxu1 }
 0x197   : > { %v3630_v23 = vpop.f32.mrb[0].mxu0  ;;  %v5256_v37 = vadd.f32 %v3964_v20, %v3642_v22  ;;  %v2169_v18 = vpop.f32.mrb[17].mxu1 }
 0x198   : > { %v3956_v9 = vadd.f32 %v3630_v23, %v3350_v38  ;;  %v2129_v24 = vpop.f32.mrb[1].mxu0  ;;  %v5258_v63 = vadd.f32 %v3966_v8, %v2169_v18 }
 0x199   : > { %2234 = vst [vmem:[%s5261_s9 + $0x48] sm:$0xff] %v5256_v37  ;;  %2250 = vst [vmem:[%s4261_s15 + $0x48] sm:$0xff] %v5256_v37  ;;  %v3957_v57 = vadd.f32 %v2129_v24, %v1031_v51 }
 0x19a   : > { %2226 = vst [vmem:[%s5261_s9 + $0x8] sm:$0xff] %v3956_v9  ;;  %2242 = vst [vmem:[%s4261_s15 + $0x8] sm:$0xff] %v3956_v9  ;;  %v2354_v50 = vmul.f32 %v3956_v9, %v2281_v35  ;;  %v3645_v53 = vpop.f32.mrb[18].mxu1 }
 0x19b   : > { %2233 = vst [vmem:[%s5261_s9 + $0x40] sm:$0xff] %v5258_v63  ;;  %2249 = vst [vmem:[%s4261_s15 + $0x40] sm:$0xff] %v5258_v63  ;;  %v2353_v29 = vmul.f32 %v3957_v57, %v2276_v55  ;;  %v3633_v60 = vpop.f32.mrb[2].mxu0  ;;  %v5275_v14 = vadd.f32 %v3968_v17, %v3645_v53  ;;  %v2179_v10 = vpop.f32.mrb[19].mxu1 }
 0x19c   : > { %2225 = vst [vmem:[%s5261_s9] sm:$0xff] %v3957_v57  ;;  %2241 = vst [vmem:[%s4261_s15] sm:$0xff] %v3957_v57  ;;  %v2395_v27 = vmul.f32 %v3956_v9, %v2354_v50  ;;  %v3958_v47 = vadd.f32 %v3633_v60, %v3353_v16  ;;  %v2139_v43 = vpop.f32.mrb[3].mxu0  ;;  %v5279_v56 = vadd.f32 %v3970_v32, %v2179_v10  ;;  %v2316_v55 = vpop.permute.xlu0 %2315 }
 0x19d   : > { %v2370_v48 = vadd.f32 %v2354_v50, %v2353_v29  ;;  %v2394_v46 = vmul.f32 %v3957_v57, %v2353_v29  ;;  %2236 = vst [vmem:[%s5261_s9 + $0x58] sm:$0xff] %v5275_v14  ;;  %2252 = vst [vmem:[%s4261_s15 + $0x58] sm:$0xff] %v5275_v14  ;;  %v3959_v39 = vadd.f32 %v2139_v43, %v5238_v6  ;;  %v2321_v32 = vpop.permute.xlu1 %2320 }
 0x19e   : > { %2228 = vst [vmem:[%s5261_s9 + $0x18] sm:$0xff] %v3958_v47  ;;  %2244 = vst [vmem:[%s4261_s15 + $0x18] sm:$0xff] %v3958_v47  ;;  %v3648_v62 = vpop.f32.mrb[20].mxu1  ;;  %v2356_v45 = vmul.f32 %v3958_v47, %v2291_v26 }
 0x19f   : > { %2235 = vst [vmem:[%s5261_s9 + $0x50] sm:$0xff] %v5279_v56  ;;  %2251 = vst [vmem:[%s4261_s15 + $0x50] sm:$0xff] %v5279_v56  ;;  %v2410_v2 = vadd.f32 %v2395_v27, %v2394_v46  ;;  %v2355_v38 = vmul.f32 %v3959_v39, %v5248_v61  ;;  %v3636_v51 = vpop.f32.mrb[4].mxu0  ;;  %v5295_v16 = vadd.f32 %v3972_v3, %v3648_v62  ;;  %v2189_v6 = vpop.f32.mrb[21].mxu1 }
 0x1a0   : > { %2227 = vst [vmem:[%s5261_s9 + $0x10] sm:$0xff] %v3959_v39  ;;  %2243 = vst [vmem:[%s4261_s15 + $0x10] sm:$0xff] %v3959_v39  ;;  %v3960_v11 = vadd.f32 %v3636_v51, %v5240_v12  ;;  %v2149_v31 = vpop.f32.mrb[5].mxu0  ;;  %v5298_v58 = vadd.f32 %v3974_v1, %v2189_v6  ;;  %v2397_v21 = vmul.f32 %v3958_v47, %v2356_v45  ;;  %v2326_v25 = vpop.permute.xlu0 %2325 }
 0x1a1   : > { %v2371_v20 = vadd.f32 %v2370_v48, %v2355_v38  ;;  %v2396_v7 = vmul.f32 %v3959_v39, %v2355_v38  ;;  %2238 = vst [vmem:[%s5261_s9 + $0x68] sm:$0xff] %v5295_v16  ;;  %2254 = vst [vmem:[%s4261_s15 + $0x68] sm:$0xff] %v5295_v16  ;;  %v3961_v8 = vadd.f32 %v2149_v31, %v5242_v49  ;;  %v2331_v18 = vpop.permute.xlu1 %2330 }
 0x1a2   : > { %2230 = vst [vmem:[%s5261_s9 + $0x28] sm:$0xff] %v3960_v11  ;;  %2246 = vst [vmem:[%s4261_s15 + $0x28] sm:$0xff] %v3960_v11  ;;  %v2358_v59 = vmul.f32 %v3960_v11, %v2301_v41  ;;  %v3651_v12 = vpop.f32.mrb[22].mxu1  ;;  %v2362_v41 = vmul.f32 %v5256_v37, %v2321_v32  ;;  %v2363_v50 = vmul.f32 %v5279_v56, %v2326_v25 }
 0x1a3   : > { %2237 = vst [vmem:[%s5261_s9 + $0x60] sm:$0xff] %v5298_v58  ;;  %2253 = vst [vmem:[%s4261_s15 + $0x60] sm:$0xff] %v5298_v58  ;;  %v2411_v19 = vadd.f32 %v2410_v2, %v2396_v7  ;;  %v2357_v61 = vmul.f32 %v3961_v8, %v5254_v44  ;;  %v2372_v49 = vadd.f32 %v2371_v20, %v2356_v45  ;;  %v3639_v17 = vpop.f32.mrb[6].mxu0  ;;  %v2199_v42 = vpop.f32.mrb[23].mxu1 }
 0x1a4   : > { %2229 = vst [vmem:[%s5261_s9 + $0x20] sm:$0xff] %v3961_v8  ;;  %2245 = vst [vmem:[%s4261_s15 + $0x20] sm:$0xff] %v3961_v8  ;;  %v3962_v13 = vadd.f32 %v3639_v17, %v5244_v54  ;;  %v3977_v34 = vadd.f32 %v5250_v15, %v3651_v12  ;;  %v2159_v33 = vpop.f32.mrb[7].mxu0  ;;  %v2399_v26 = vmul.f32 %v3960_v11, %v2358_v59  ;;  %v2336_v60 = vpop.permute.xlu0 %2335 }
 0x1a5   : > { %v2373_v35 = vadd.f32 %v2372_v49, %v2357_v61  ;;  %v2398_v3 = vmul.f32 %v3961_v8, %v2357_v61  ;;  %v2412_v36 = vadd.f32 %v2411_v19, %v2397_v21  ;;  %v3963_v1 = vadd.f32 %v2159_v33, %v5246_v0  ;;  %v2341_v43 = vpop.permute.xlu1 %2340 }
 0x1a6   : > { %2232 = vst [vmem:[%s5261_s9 + $0x38] sm:$0xff] %v3962_v13  ;;  %2248 = vst [vmem:[%s4261_s15 + $0x38] sm:$0xff] %v3962_v13  ;;  %v3979_v28 = vadd.f32 %v5252_v30, %v2199_v42  ;;  %v2360_v54 = vmul.f32 %v3962_v13, %v2311_v40  ;;  %v2361_v44 = vmul.f32 %v5258_v63, %v2316_v55 }
 0x1a7   : > { %2240 = vst [vmem:[%s5261_s9 + $0x78] sm:$0xff] %v3977_v34  ;;  %2256 = vst [vmem:[%s4261_s15 + $0x78] sm:$0xff] %v3977_v34  ;;  %v2413_v5 = vadd.f32 %v2412_v36, %v2398_v3  ;;  %v2359_v52 = vmul.f32 %v3963_v1, %v5277_v4  ;;  %v2374_v15 = vadd.f32 %v2373_v35, %v2358_v59 }
 0x1a8   : > { %2231 = vst [vmem:[%s5261_s9 + $0x30] sm:$0xff] %v3963_v1  ;;  %2247 = vst [vmem:[%s4261_s15 + $0x30] sm:$0xff] %v3963_v1  ;;  %v2401_v9 = vmul.f32 %v3962_v13, %v2360_v54  ;;  %v2402_v57 = vmul.f32 %v5258_v63, %v2361_v44  ;;  %v2403_v10 = vmul.f32 %v5256_v37, %v2362_v41  ;;  %v2346_v38 = vpop.permute.xlu0 %2345 }
 0x1a9   : > { %2239 = vst [vmem:[%s5261_s9 + $0x70] sm:$0xff] %v3979_v28  ;;  %2255 = vst [vmem:[%s4261_s15 + $0x70] sm:$0xff] %v3979_v28  ;;  %v2375_v0 = vadd.f32 %v2374_v15, %v2359_v52  ;;  %v2400_v22 = vmul.f32 %v3963_v1, %v2359_v52  ;;  %v2414_v23 = vadd.f32 %v2413_v5, %v2399_v26  ;;  %v2351_v31 = vpop.permute.xlu1 %2350  ;;  %v2393_v26 = vld [vmem:[#allocation4] sm:$0x1] }
 0x1aa   : > { %v2364_v4 = vmul.f32 %v5275_v14, %v2331_v18  ;;  %v2404_v48 = vmul.f32 %v5279_v56, %v2363_v50  ;;  %v2365_v46 = vmul.f32 %v5298_v58, %v2336_v60  ;;  %v2366_v62 = vmul.f32 %v5295_v16, %v2341_v43 }
 0x1ab   : > { %v2376_v30 = vadd.f32 %v2375_v0, %v2360_v54  ;;  %v2415_v24 = vadd.f32 %v2414_v23, %v2400_v22  ;;  %v2367_v51 = vmul.f32 %v3979_v28, %v2346_v38  ;;  %v2368_v56 = vmul.f32 %v3977_v34, %v2351_v31 }
 0x1ac   : > { %v2405_v63 = vmul.f32 %v5275_v14, %v2364_v4  ;;  %v2406_v37 = vmul.f32 %v5298_v58, %v2365_v46  ;;  %v2407_v20 = vmul.f32 %v5295_v16, %v2366_v62  ;;  %v2369_v16 = vld [vmem:[#allocation3] sm:$0x1] }
 0x1ad   : > { %v2377_v53 = vadd.f32 %v2376_v30, %v2361_v44  ;;  %v2416_v29 = vadd.f32 %v2415_v24, %v2401_v9  ;;  %v2408_v59 = vmul.f32 %v3979_v28, %v2367_v51  ;;  %v2409_v14 = vmul.f32 %v3977_v34, %v2368_v56 }
 0x1af   : > { %v2378_v27 = vadd.f32 %v2377_v53, %v2362_v41  ;;  %v2417_v47 = vadd.f32 %v2416_v29, %v2402_v57 }
 0x1b1   : > { %v2418_v39 = vadd.f32 %v2417_v47, %v2403_v10  ;;  %v2379_v40 = vadd.f32 %v2378_v27, %v2363_v50 }
 0x1b3   : > { %v2380_v2 = vadd.f32 %v2379_v40, %v2364_v4  ;;  %v2419_v45 = vadd.f32 %v2418_v39, %v2404_v48 }
 0x1b5   : > { %v2381_v6 = vadd.f32 %v2380_v2, %v2365_v46  ;;  %v2420_v11 = vadd.f32 %v2419_v45, %v2405_v63 }
 0x1b7   : > { %v2382_v7 = vadd.f32 %v2381_v6, %v2366_v62  ;;  %v2421_v8 = vadd.f32 %v2420_v11, %v2406_v37 }
 0x1b9   : > { %v2383_v55 = vadd.f32 %v2382_v7, %v2367_v51  ;;  %v2422_v12 = vadd.f32 %v2421_v8, %v2407_v20 }
 0x1bb   : > { %v2384_v21 = vadd.f32 %v2383_v55, %v2368_v56  ;;  %v2423_v19 = vadd.f32 %v2422_v12, %v2408_v59 }
 0x1bd   : > { %v2385_v61 = vrot.slane %v2384_v21, 4  ;;  %v2424_v49 = vadd.f32 %v2423_v19, %v2409_v14 }
 0x1bf   : > { %v2386_v17 = vadd.f32 %v2385_v61, %v2384_v21  ;;  %v2425_v42 = vrot.slane %v2424_v49, 4 }
 0x1c1   : > { %v2387_v58 = vrot.slane %v2386_v17, 2  ;;  %v2426_v32 = vadd.f32 %v2425_v42, %v2424_v49 }
 0x1c3   : > { %v2388_v13 = vadd.f32 %v2387_v58, %v2386_v17  ;;  %v2427_v33 = vrot.slane %v2426_v32, 2 }
 0x1c5   : > { %v2389_v35 = vrot.slane %v2388_v13, 1  ;;  %v2428_v3 = vadd.f32 %v2427_v33, %v2426_v32 }
 0x1c7   : > { %v2390_v36 = vadd.f32 %v2389_v35, %v2388_v13  ;;  %v2429_v1 = vrot.slane %v2428_v3, 1  ;;  %2436 = sbr.rel (%p2852_p8) target bundleno = 487 (0x1e7), region = 56 }
 0x1c9   : > { %v2391_v5 = vadd.f32 %v2390_v36, %v2369_v16  ;;  %v2430_v28 = vadd.f32 %v2429_v1, %v2428_v3 }
 0x1cb   : > { %2392 = vst [vmem:[#allocation3] sm:$0x1] %v2391_v5  ;;  %v2431_v34 = vadd.f32 %v2430_v28, %v2393_v26 }
 0x1cd   : > { %2432 = vst [vmem:[#allocation4] sm:$0x1] %v2431_v34 }
 0x1d2   : > { %v2437_v54 = vld [vmem:[#allocation3] sm:$0x1] }
 0x1d3   : > { %v2438_v15 = vmul.f32 0.001953125, %v2437_v54 }
 0x1d4   : > { %v2439_v52 = vld [vmem:[#allocation4] sm:$0x1] }
 0x1d5   : > { %v2440_v25 = vmul.f32 0.001953125, %v2439_v52  ;;  %v2441_v44 = vmul.f32 %v2438_v15, %v2438_v15  ;;  %2443 = vst [vmem:[#allocation5] sm:$0x1] %v2438_v15 }
 0x1d7   : > { %v2442_v0 = vsub.f32 %v2440_v25, %v2441_v44 }
 0x1d9   : > { %v2444_v22 = vadd.f32 1e-05, %v2442_v0 }
 0x1db   : > { %4131 = vrsqrt.f32 %v2444_v22 }
 0x1e5   : > { %v4132_v23 = vpop.eup %4131 }
 0x1e6   : > { %2446 = vst [vmem:[#allocation6] sm:$0x1] %v4132_v23 }
 0x1e7 PF: > { %p2853_p9 = scmp.ne.s32.totalorder %s4159_s22, 1 }
 0x1e8   : > { %v5341_v18 = vld [vmem:[#allocation5] ss:$0 sm:$0xff] (!%p2853_p9)  ;;  %s5344_s21 = scalar_lea.vmem (!%p2853_p9), [#allocation2], %s4246_s29  ;;  %v5355_v50 = vld [vmem:[%s5487_s2] ss:$0 sm:$0xff] (!%p2853_p9)  ;;  %v2561_v56 = vld [vmem:[%s4256_s12 + $0x8] sm:$0xff] (!%p2853_p9) }
 0x1e9   : > { %2450 = sbr.rel (%p2853_p9) target bundleno = 521 (0x209), region = 60  ;;  %v2452_v41 = vld [vmem:[%s5344_s21] sm:$0xff] (!%p2853_p9)  ;;  %v2453_v24 = vld [vmem:[%s5344_s21 + $0x8] sm:$0xff] (!%p2853_p9)  ;;  %v2454_v57 = vld [vmem:[%s5344_s21 + $0x10] sm:$0xff] (!%p2853_p9) }
 0x1ea   : > { %v2475_v30 = vsub.f32 (!%p2853_p9), %v2452_v41, %v5341_v18  ;;  %v2476_v53 = vsub.f32 (!%p2853_p9), %v2453_v24, %v5341_v18  ;;  %v2477_v29 = vsub.f32 (!%p2853_p9), %v2454_v57, %v5341_v18  ;;  %v2455_v60 = vld [vmem:[%s5344_s21 + $0x18] sm:$0xff] (!%p2853_p9)  ;;  %v2456_v27 = vld [vmem:[%s5344_s21 + $0x20] sm:$0xff] (!%p2853_p9)  ;;  %v2457_v47 = vld [vmem:[%s5344_s21 + $0x28] sm:$0xff] (!%p2853_p9) }
 0x1eb   : > { %v2478_v4 = vsub.f32 (!%p2853_p9), %v2455_v60, %v5341_v18  ;;  %v5367_v43 = vld [vmem:[%s5488_s3] ss:$0 sm:$0xff] (!%p2853_p9)  ;;  %v2479_v39 = vsub.f32 (!%p2853_p9), %v2456_v27, %v5341_v18  ;;  %v2480_v40 = vsub.f32 (!%p2853_p9), %v2457_v47, %v5341_v18  ;;  %v2458_v63 = vld [vmem:[%s5344_s21 + $0x30] sm:$0xff] (!%p2853_p9)  ;;  %v2459_v38 = vld [vmem:[%s5344_s21 + $0x38] sm:$0xff] (!%p2853_p9) }
 0x1ec   : > { %v2481_v45 = vsub.f32 (!%p2853_p9), %v2458_v63, %v5341_v18  ;;  %v2560_v37 = vld [vmem:[%s4256_s12] sm:$0xff] (!%p2853_p9)  ;;  %v2562_v7 = vld [vmem:[%s4256_s12 + $0x10] sm:$0xff] (!%p2853_p9)  ;;  %v2482_v59 = vsub.f32 (!%p2853_p9), %v2459_v38, %v5341_v18  ;;  %v2563_v21 = vld [vmem:[%s4256_s12 + $0x18] sm:$0xff] (!%p2853_p9) }
 0x1ed   : > { %v5347_v9 = vld [vmem:[#allocation6] ss:$0 sm:$0xff] (!%p2853_p9)  ;;  %v2565_v58 = vld [vmem:[%s4256_s12 + $0x28] sm:$0xff] (!%p2853_p9)  ;;  %v2566_v36 = vld [vmem:[%s4256_s12 + $0x30] sm:$0xff] (!%p2853_p9) }
 0x1ee   : > { %v2498_v10 = vmul.f32 (!%p2853_p9), %v5347_v9, %v2475_v30  ;;  %v2499_v48 = vmul.f32 (!%p2853_p9), %v5347_v9, %v2476_v53  ;;  %v2500_v46 = vmul.f32 (!%p2853_p9), %v5347_v9, %v2477_v29  ;;  %v2501_v2 = vmul.f32 (!%p2853_p9), %v5347_v9, %v2478_v4  ;;  %v2564_v42 = vld [vmem:[%s4256_s12 + $0x20] sm:$0xff] (!%p2853_p9)  ;;  %v2461_v54 = vld [vmem:[%s5344_s21 + $0x48] sm:$0xff] (!%p2853_p9)  ;;  %v2462_v52 = vld [vmem:[%s5344_s21 + $0x50] sm:$0xff] (!%p2853_p9) }
 0x1ef   : > { %v2502_v11 = vmul.f32 (!%p2853_p9), %v5347_v9, %v2479_v39  ;;  %v2503_v31 = vmul.f32 (!%p2853_p9), %v5347_v9, %v2480_v40  ;;  %v2504_v55 = vmul.f32 (!%p2853_p9), %v5347_v9, %v2481_v45  ;;  %v2505_v13 = vmul.f32 (!%p2853_p9), %v5347_v9, %v2482_v59  ;;  %v2460_v1 = vld [vmem:[%s5344_s21 + $0x40] sm:$0xff] (!%p2853_p9)  ;;  %v2567_v22 = vld [vmem:[%s4256_s12 + $0x38] sm:$0xff] (!%p2853_p9)  ;;  %v2465_v29 = vld [vmem:[%s5344_s21 + $0x68] sm:$0xff] (!%p2853_p9) }
 0x1f0   : > { %v2521_v62 = vmul.f32 %v5355_v50, %v2498_v10  ;;  %v2522_v51 = vmul.f32 %v5355_v50, %v2499_v48  ;;  %v2523_v6 = vmul.f32 %v5355_v50, %v2500_v46  ;;  %v2524_v8 = vmul.f32 %v5355_v50, %v2501_v2  ;;  %v2463_v23 = vld [vmem:[%s5344_s21 + $0x58] sm:$0xff]  ;;  %v2464_v53 = vld [vmem:[%s5344_s21 + $0x60] sm:$0xff]  ;;  %v2466_v47 = vld [vmem:[%s5344_s21 + $0x70] sm:$0xff] }
 0x1f1   : > { %v2525_v19 = vmul.f32 %v5355_v50, %v2502_v11  ;;  %v2526_v61 = vmul.f32 %v5355_v50, %v2503_v31  ;;  %v2527_v32 = vmul.f32 %v5355_v50, %v2504_v55  ;;  %v2528_v34 = vmul.f32 %v5355_v50, %v2505_v13  ;;  %v2467_v38 = vld [vmem:[%s5344_s21 + $0x78] sm:$0xff]  ;;  %v2568_v31 = vld [vmem:[%s4256_s12 + $0x40] sm:$0xff]  ;;  %v2569_v59 = vld [vmem:[%s4256_s12 + $0x48] sm:$0xff] }
 0x1f2   : > { %v2544_v20 = vadd.f32 %v5367_v43, %v2521_v62  ;;  %v2545_v12 = vadd.f32 %v5367_v43, %v2522_v51  ;;  %v2546_v14 = vadd.f32 %v5367_v43, %v2523_v6  ;;  %v2547_v17 = vadd.f32 %v5367_v43, %v2524_v8 }
 0x1f3   : > { %v2548_v3 = vadd.f32 %v5367_v43, %v2525_v19  ;;  %v2549_v16 = vadd.f32 %v5367_v43, %v2526_v61  ;;  %v2550_v28 = vadd.f32 %v5367_v43, %v2527_v32  ;;  %v2551_v24 = vadd.f32 %v5367_v43, %v2528_v34 }
 0x1f4   : > { %v2576_v49 = vadd.f32 %v2560_v37, %v2544_v20  ;;  %v2577_v33 = vadd.f32 %v2561_v56, %v2545_v12  ;;  %v2578_v35 = vadd.f32 %v2562_v7, %v2546_v14  ;;  %v2579_v5 = vadd.f32 %v2563_v21, %v2547_v17  ;;  %v2570_v12 = vld [vmem:[%s4256_s12 + $0x50] sm:$0xff]  ;;  %v2571_v17 = vld [vmem:[%s4256_s12 + $0x58] sm:$0xff] }
 0x1f5   : > { %v2580_v44 = vadd.f32 %v2564_v42, %v2548_v3  ;;  %v2581_v0 = vadd.f32 %v2565_v58, %v2549_v16  ;;  %v2582_v30 = vadd.f32 %v2566_v36, %v2550_v28  ;;  %v2483_v57 = vsub.f32 %v2460_v1, %v5341_v18 }
 0x1f6   : > { %v2592_v26 = vmax.f32 %v2576_v49, 0.0  ;;  %v2593_v15 = vmax.f32 %v2577_v33, 0.0  ;;  %v2594_v25 = vmax.f32 %v2578_v35, 0.0  ;;  %v2595_v41 = vmax.f32 %v2579_v5, 0.0  ;;  %v2572_v33 = vld [vmem:[%s4256_s12 + $0x60] sm:$0xff]  ;;  %v2573_v35 = vld [vmem:[%s4256_s12 + $0x68] sm:$0xff] }
 0x1f7   : > { %v2596_v60 = vmax.f32 %v2580_v44, 0.0  ;;  %v2597_v10 = vmax.f32 %v2581_v0, 0.0  ;;  %v2484_v4 = vsub.f32 %v2461_v54, %v5341_v18  ;;  %v2485_v27 = vsub.f32 %v2462_v52, %v5341_v18  ;;  %v2574_v5 = vld [vmem:[%s4256_s12 + $0x70] sm:$0xff]  ;;  %v2575_v0 = vld [vmem:[%s4256_s12 + $0x78] sm:$0xff] }
 0x1f8   : > { %2608 = vst [vmem:[%s4261_s15] sm:$0xff] %v2592_v26  ;;  %2609 = vst [vmem:[%s4261_s15 + $0x8] sm:$0xff] %v2593_v15  ;;  %v2598_v48 = vmax.f32 %v2582_v30, 0.0  ;;  %v2583_v46 = vadd.f32 %v2567_v22, %v2551_v24  ;;  %v2506_v39 = vmul.f32 %v5347_v9, %v2483_v57  ;;  %v2486_v40 = vsub.f32 %v2463_v23, %v5341_v18 }
 0x1f9   : > { %2610 = vst [vmem:[%s4261_s15 + $0x10] sm:$0xff] %v2594_v25  ;;  %2611 = vst [vmem:[%s4261_s15 + $0x18] sm:$0xff] %v2595_v41  ;;  %v2507_v63 = vmul.f32 %v5347_v9, %v2484_v4  ;;  %v2508_v62 = vmul.f32 %v5347_v9, %v2485_v27  ;;  %v2487_v2 = vsub.f32 %v2464_v53, %v5341_v18 }
 0x1fa   : > { %2612 = vst [vmem:[%s4261_s15 + $0x20] sm:$0xff] %v2596_v60  ;;  %2613 = vst [vmem:[%s4261_s15 + $0x28] sm:$0xff] %v2597_v10  ;;  %v2488_v45 = vsub.f32 %v2465_v29, %v5341_v18  ;;  %v2599_v37 = vmax.f32 %v2583_v46, 0.0  ;;  %v2529_v51 = vmul.f32 %v5355_v50, %v2506_v39  ;;  %v2509_v6 = vmul.f32 %v5347_v9, %v2486_v40 }
 0x1fb   : > { %2614 = vst [vmem:[%s4261_s15 + $0x30] sm:$0xff] %v2598_v48  ;;  %v2489_v11 = vsub.f32 %v2466_v47, %v5341_v18  ;;  %v2530_v20 = vmul.f32 %v5355_v50, %v2507_v63  ;;  %v2531_v56 = vmul.f32 %v5355_v50, %v2508_v62  ;;  %v2510_v7 = vmul.f32 %v5347_v9, %v2487_v2 }
 0x1fc   : > { %v2511_v8 = vmul.f32 %v5347_v9, %v2488_v45  ;;  %2615 = vst [vmem:[%s4261_s15 + $0x38] sm:$0xff] %v2599_v37  ;;  %v2552_v55 = vadd.f32 %v5367_v43, %v2529_v51  ;;  %v2532_v14 = vmul.f32 %v5355_v50, %v2509_v6  ;;  %v2490_v19 = vsub.f32 %v2467_v38, %v5341_v18 }
 0x1fd   : > { %v2512_v21 = vmul.f32 %v5347_v9, %v2489_v11  ;;  %v2553_v61 = vadd.f32 %v5367_v43, %v2530_v20  ;;  %v2554_v49 = vadd.f32 %v5367_v43, %v2531_v56  ;;  %v2533_v42 = vmul.f32 %v5355_v50, %v2510_v7 }
 0x1fe   : > { %v2534_v58 = vmul.f32 %v5355_v50, %v2511_v8  ;;  %v2584_v32 = vadd.f32 %v2568_v31, %v2552_v55  ;;  %v2555_v13 = vadd.f32 %v5367_v43, %v2532_v14  ;;  %v2513_v18 = vmul.f32 %v5347_v9, %v2490_v19 }
 0x1ff   : > { %v2535_v3 = vmul.f32 %v5355_v50, %v2512_v21  ;;  %v2585_v16 = vadd.f32 %v2569_v59, %v2553_v61  ;;  %v2586_v36 = vadd.f32 %v2570_v12, %v2554_v49  ;;  %v2556_v1 = vadd.f32 %v5367_v43, %v2533_v42 }
 0x200   : > { %v2557_v26 = vadd.f32 %v5367_v43, %v2534_v58  ;;  %v2600_v28 = vmax.f32 %v2584_v32, 0.0  ;;  %v2587_v34 = vadd.f32 %v2571_v17, %v2555_v13  ;;  %v2536_v52 = vmul.f32 %v5355_v50, %v2513_v18 }
 0x201   : > { %v2558_v54 = vadd.f32 %v5367_v43, %v2535_v3  ;;  %v2601_v15 = vmax.f32 %v2585_v16, 0.0  ;;  %v2602_v25 = vmax.f32 %v2586_v36, 0.0  ;;  %v2588_v9 = vadd.f32 %v2572_v33, %v2556_v1 }
 0x202   : > { %v2589_v44 = vadd.f32 %v2573_v35, %v2557_v26  ;;  %2616 = vst [vmem:[%s4261_s15 + $0x40] sm:$0xff] %v2600_v28  ;;  %v2603_v22 = vmax.f32 %v2587_v34, 0.0  ;;  %v2559_v41 = vadd.f32 %v5367_v43, %v2536_v52 }
 0x203   : > { %v2590_v23 = vadd.f32 %v2574_v5, %v2558_v54  ;;  %2617 = vst [vmem:[%s4261_s15 + $0x48] sm:$0xff] %v2601_v15  ;;  %2618 = vst [vmem:[%s4261_s15 + $0x50] sm:$0xff] %v2602_v25  ;;  %v2604_v30 = vmax.f32 %v2588_v9, 0.0 }
 0x204   : > { %v2605_v24 = vmax.f32 %v2589_v44, 0.0  ;;  %2619 = vst [vmem:[%s4261_s15 + $0x58] sm:$0xff] %v2603_v22  ;;  %v2591_v57 = vadd.f32 %v2575_v0, %v2559_v41 }
 0x205   : > { %v2606_v50 = vmax.f32 %v2590_v23, 0.0  ;;  %2620 = vst [vmem:[%s4261_s15 + $0x60] sm:$0xff] %v2604_v30 }
 0x206   : > { %2621 = vst [vmem:[%s4261_s15 + $0x68] sm:$0xff] %v2605_v24  ;;  %v2607_v53 = vmax.f32 %v2591_v57, 0.0 }
 0x207   : > { %2622 = vst [vmem:[%s4261_s15 + $0x70] sm:$0xff] %v2606_v50 }
 0x208   : > { %2623 = vst [vmem:[%s4261_s15 + $0x78] sm:$0xff] %v2607_v53 }
 0x209 PF: > { %s16_s25 = sadd.s32 1, %s4171_s25   ;;  %s5510_s21 = smov %s4163_s23 }
 0x20a   : > { %p13_p10 = scmp.ge.s32.totalorder %s16_s25, 14   ;;  %s5511_s22 = smov %s4167_s24 }
 0x20b   : > { %s5512_s23 = smov %s5515_s26  ;;  %s5513_s24 = smov %s5519_s27 }
 0x20c   :  { %15 = sbr.rel (!%p13_p10) target bundleno = 3 (0x3), region = 104 }

</bundles_post_ra>
